<compile_context>
chip_gen: v7x
topology: tpu7x:2x2x1
jax: 0.10.0
libtpu: 0.0.40
codegen_flags: <defaults>
</compile_context>

<pallas_src>
import functools

import jax
import jax.numpy as jnp
import numpy as np
from jax.experimental import pallas as pl
from jax.experimental.pallas import tpu as pltpu


# ----------------------------------------------------------------------------
# Pallas kernel
# ----------------------------------------------------------------------------
def _mag_mae_kernel(xyf_ref, basis_ref, o_ref):
    fft = basis_ref.shape[0]
    half = fft // 2
    n_freq = half + 1
    tile = xyf_ref.shape[1]

    # Output block index depends only on the parallel axis (axis 0), so o_ref
    # stays resident in VMEM across the reduction axis (axis 1) and acts as a
    # per-element partial-sum accumulator.
    @pl.when(pl.program_id(1) == 0)
    def _():
        o_ref[...] = jnp.zeros_like(o_ref)

    # (2, tile, fft) -> (2*tile, fft): layout-free merge of the leading
    # sublane dims; ONE MXU matmul covers both signals, basis staged once.
    fr = xyf_ref[...].reshape(2 * tile, fft)
    s = jnp.dot(fr, basis_ref[...], preferred_element_type=jnp.float32)

    # Packed basis layout: lanes [0, half] hold Re (cos) of bins 0..half,
    # lanes [half+1, fft-1] hold Im (sin) of bins 1..half-1.
    # power(bin b) = Re_b^2 + Im_b^2; Im_b^2 sits `half` lanes to the right,
    # so a half-rotation on the XLU lines it up.  Lanes 0 / half (DC/Nyquist)
    # have no Im term and must not receive the rolled value.
    sq = s * s
    rolled = pltpu.roll(sq, shift=half, axis=1)
    lane = jax.lax.broadcasted_iota(jnp.int32, sq.shape, 1)
    mid = jnp.logical_and(lane > 0, lane < half)
    pw = sq + jnp.where(mid, rolled, 0.0)

    # log|X| = 0.5 * log(max(|X|^2, 1e-7)); the 0.5 is folded into the
    # wrapper's final normalization.  Zero-padded frame rows clamp identically
    # for x and y -> contribute exactly 0.
    lp = jnp.log(jnp.maximum(pw, 1e-7))
    diff = jnp.abs(lp[tile:, :] - lp[:tile, :])      # rows: x first, y second

    # Lanes >= n_freq hold Im-only junk; mask them out of the accumulation.
    valid = jax.lax.broadcasted_iota(jnp.int32, diff.shape, 1) < n_freq
    o_ref[...] += jnp.where(valid, diff, 0.0)        # pure VPU accumulate


# ----------------------------------------------------------------------------
# Wrapper helpers
# ----------------------------------------------------------------------------
def _round_up(a, b):
    return ((a + b - 1) // b) * b


def _hann_window(win_length):
    # torch.hann_window (periodic=True): 0.5 - 0.5*cos(2*pi*n/N)
    n = jnp.arange(win_length, dtype=jnp.float32)
    return 0.5 - 0.5 * jnp.cos(2.0 * jnp.pi * n / win_length)


def _make_packed_basis(fft_size, win_length):
    """Windowed DFT basis packed to exactly fft_size lanes.

    Columns [0, fft/2]       : cos (real part) of bins 0..fft/2
    Columns [fft/2+1, fft-1] : -sin (imag part) of bins 1..fft/2-1
    (sin of DC / Nyquist is identically zero, so nothing is lost.)
    """
    win = _hann_window(win_length)
    left = (fft_size - win_length) // 2          # torch.stft centers the window
    win_full = jnp.zeros((fft_size,), jnp.float32)
    win_full = win_full.at[left:left + win_length].set(win)

    half = fft_size // 2
    n = jnp.arange(fft_size, dtype=jnp.float32)[:, None]
    f_cos = jnp.arange(half + 1, dtype=jnp.float32)[None, :]
    f_sin = jnp.arange(1, half, dtype=jnp.float32)[None, :]
    cos_b = win_full[:, None] * jnp.cos(2.0 * jnp.pi * n * f_cos / fft_size)
    sin_b = -win_full[:, None] * jnp.sin(2.0 * jnp.pi * n * f_sin / fft_size)
    return jnp.concatenate([cos_b, sin_b], axis=1)          # (fft, fft)


def _frame_signal(x, fft_size, hop_size):
    """Center (reflect) pad and frame: (B, T) -> ((B*n_frames, fft), n_frames)."""
    B, T = x.shape
    p = fft_size // 2
    x_pad = jnp.pad(x, ((0, 0), (p, p)), mode="reflect")
    t_pad = T + 2 * p
    n_frames = 1 + (t_pad - fft_size) // hop_size

    if fft_size % hop_size == 0:
        # hop | fft: build frames from fft/hop contiguous strided views and
        # interleave them -> no XLA gather, no index tensor.
        r = fft_size // hop_size
        views, m_max = [], 0
        for k in range(r):
            m_k = (n_frames - 1 - k) // r + 1            # frames with j % r == k
            m_k = max(m_k, 0)
            m_max = max(m_max, m_k)
            start = k * hop_size
            seg = x_pad[:, start:start + m_k * fft_size]
            views.append(seg.reshape(B, m_k, fft_size))
        views = [jnp.pad(v, ((0, 0), (0, m_max - v.shape[1]), (0, 0)))
                 for v in views]
        frames = jnp.stack(views, axis=2).reshape(B, m_max * r, fft_size)
        frames = frames[:, :n_frames]
    else:
        # TODO(synk): generic hop still uses an XLA gather; in-kernel framing
        # via manual DMA of the padded signal would remove it entirely.
        idx = (jnp.arange(n_frames)[:, None] * hop_size
               + jnp.arange(fft_size)[None, :])
        frames = jnp.take(x_pad, idx, axis=1)            # (B, n_frames, fft)
    return frames.reshape(B * n_frames, fft_size), n_frames


def _guess_num_tensorcores():
    """Best-effort TensorCores addressable by one Pallas 'parallel' grid axis."""
    try:
        kind = jax.devices()[0].device_kind.lower()
    except Exception:
        return 1
    # v4/v5p megacore and v7x expose 2 TCs per device; v2/v3/v5e/v6e are 1-TC.
    if ("v4" in kind) or ("v5p" in kind) or ("7" in kind):
        return 2
    return 1


# ----------------------------------------------------------------------------
# Public entry point (matches MagMAELoss.forward semantics)
# ----------------------------------------------------------------------------
@functools.partial(jax.jit, static_argnames=("fft_size", "shift_size",
                                             "win_length", "tile_m", "n_split"))
def mag_mae_loss(x, y, *, fft_size=1024, shift_size=120, win_length=600,
                 tile_m=1024, n_split=None):
    B, _ = x.shape
    n_freq = fft_size // 2 + 1

    xf, n_frames = _frame_signal(x.astype(jnp.float32), fft_size, shift_size)
    yf, _ = _frame_signal(y.astype(jnp.float32), fft_size, shift_size)
    F = B * n_frames

    # HBM-bound kernel: make tiles as big as possible, but cap so the stacked
    # (2, tile, fft) f32 block stays ~<=2 MiB per pipeline buffer.
    bytes_cap = (2 * 1024 * 1024) // (2 * 4 * fft_size)
    bytes_cap = max(8, (bytes_cap // 8) * 8)
    tile_cap = max(8, min(_round_up(tile_m, 8), bytes_cap))

    if n_split is None:
        n_split = _guess_num_tensorcores()
    # On single-TC parts, or when there isn't enough work for two cores, a
    # 2-way split is a serial loop that only shrinks the tiles.
    if F < 2 * tile_cap:
        n_split = 1

    tile = max(8, min(tile_cap, _round_up(pl.cdiv(F, n_split), 8)))
    f_pad = _round_up(F, n_split * tile)
    tiles_per_split = f_pad // (n_split * tile)

    xyf = jnp.stack([xf, yf], axis=0)                      # (2, F, fft)
    xyf = jnp.pad(xyf, ((0, 0), (0, f_pad - F), (0, 0)))   # zero rows -> 0 loss

    basis = _make_packed_basis(fft_size, win_length)       # (fft, fft)

    partial = pl.pallas_call(
        _mag_mae_kernel,
        out_shape=jax.ShapeDtypeStruct((n_split * tile, fft_size), jnp.float32),
        grid_spec=pltpu.PrefetchScalarGridSpec(
            num_scalar_prefetch=0,
            grid=(n_split, tiles_per_split),
            in_specs=[
                pl.BlockSpec((2, tile, fft_size),
                             lambda c, i: (0, c * tiles_per_split + i, 0)),
                pl.BlockSpec((fft_size, fft_size), lambda c, i: (0, 0)),
            ],
            out_specs=pl.BlockSpec((tile, fft_size), lambda c, i: (c, 0)),
        ),
        compiler_params=pltpu.CompilerParams(
            dimension_semantics=("parallel", "arbitrary"),
            vmem_limit_bytes=40 * 1024 * 1024),
    )(xyf, basis)

    # Single cross-lane reduce of the small partial-sum slab; the 0.5 converts
    # the log-power diff back to the log-magnitude diff (replaces the sqrt).
    total = jnp.sum(partial)
    return 0.5 * total / jnp.float32(F * n_freq)


# ----------------------------------------------------------------------------
# Independent pure-JAX (FFT-based) reference for a silent correctness check.
# ----------------------------------------------------------------------------
def _reference(x, y, fft_size, shift_size, win_length):
    def log_mag(sig):
        sig = sig.astype(jnp.float32)
        B, T = sig.shape
        p = fft_size // 2
        sp = jnp.pad(sig, ((0, 0), (p, p)), mode="reflect")
        n_frames = 1 + (T + 2 * p - fft_size) // shift_size
        idx = (jnp.arange(n_frames)[:, None] * shift_size
               + jnp.arange(fft_size)[None, :])
        fr = sp[:, idx]                                    # (B, n_frames, fft)
        n = jnp.arange(win_length, dtype=jnp.float32)
        win = 0.5 - 0.5 * jnp.cos(2.0 * jnp.pi * n / win_length)
        left = (fft_size - win_length) // 2
        wfull = jnp.zeros((fft_size,), jnp.float32)
        wfull = wfull.at[left:left + win_length].set(win)
        spec = jnp.fft.rfft(fr * wfull, n=fft_size, axis=-1)
        power = jnp.real(spec) ** 2 + jnp.imag(spec) ** 2
        return jnp.log(jnp.sqrt(jnp.maximum(power, 1e-7)))
    return jnp.mean(jnp.abs(log_mag(y) - log_mag(x)))


if __name__ == "__main__":
    key = jax.random.PRNGKey(0)

    # Config 1: the module's default STFT (fft=1024, hop=120, win=600).
    B, T = 2, 2400
    kx, ky = jax.random.split(key)
    x = jax.random.normal(kx, (B, T), dtype=jnp.float32)
    y = jax.random.normal(ky, (B, T), dtype=jnp.float32)
    loss = jax.block_until_ready(mag_mae_loss(x, y))
    ref = jax.block_until_ready(_reference(x, y, 1024, 120, 600))
    np.testing.assert_allclose(np.asarray(loss), np.asarray(ref),
                               rtol=1e-3, atol=1e-3)

    # Config 2: small fft where hop | fft exercises the strided framing path.
    B2, T2 = 2, 512
    kx2, ky2 = jax.random.split(jax.random.fold_in(key, 1))
    x2 = jax.random.normal(kx2, (B2, T2), dtype=jnp.float32)
    y2 = jax.random.normal(ky2, (B2, T2), dtype=jnp.float32)
    loss2 = jax.block_until_ready(
        mag_mae_loss(x2, y2, fft_size=128, shift_size=32, win_length=128))
    ref2 = jax.block_until_ready(_reference(x2, y2, 128, 32, 128))
    np.testing.assert_allclose(np.asarray(loss2), np.asarray(ref2),
                               rtol=1e-3, atol=1e-3)

    print("KERNEL_OK")
</pallas_src>

<mosaic_0001>
module attributes {stable_mosaic.version = 11 : i64} {
  func.func @_mag_mae_kernel(%arg0: i32, %arg1: i32, %arg2: memref<2x48x1024xf32, #tpu.memory_space<vmem>>, %arg3: memref<1024x1024xf32, #tpu.memory_space<vmem>>, %arg4: memref<48x1024xf32, #tpu.memory_space<vmem>>) attributes {dimension_semantics = [#tpu.dimension_semantics<parallel>, #tpu.dimension_semantics<arbitrary>], iteration_bounds = array<i64: 1, 1>, scalar_prefetch = 0 : i64, scratch_operands = 0 : i64, tpu.core_type = #tpu.core_type<tc>, window_params = [{transform_indices = @transform_0, window_bounds = array<i64: 2, 48, 1024>}, {pipeline_mode = #tpu.pipeline_mode<synchronous>, transform_indices = @transform_1, window_bounds = array<i64: 1024, 1024>}, {transform_indices = @transform_2, window_bounds = array<i64: 48, 1024>}]} {
    %c0_i32 = arith.constant 0 : i32
    %0 = arith.cmpi eq, %arg1, %c0_i32 : i32
    %1 = arith.extui %0 : i1 to i32
    %c0_i32_0 = arith.constant 0 : i32
    %2 = arith.cmpi ne, %1, %c0_i32_0 : i32
    scf.if %2 {
      %cst_14 = arith.constant 0.000000e+00 : f32
      %33 = vector.broadcast %cst_14 : f32 to vector<48x1024xf32>
      %c0_15 = arith.constant 0 : index
      %c0_16 = arith.constant 0 : index
      %34 = vector.load %arg4[%c0_15, %c0_16] : memref<48x1024xf32, #tpu.memory_space<vmem>>, vector<48x1024xf32>
      tpu.vector_store %arg4[%c0_15, %c0_16], %33 {strides = array<i32>} : memref<48x1024xf32, #tpu.memory_space<vmem>>, vector<48x1024xf32>,
    } else {
    }
    %c0 = arith.constant 0 : index
    %c0_1 = arith.constant 0 : index
    %c0_2 = arith.constant 0 : index
    %3 = vector.load %arg2[%c0, %c0_1, %c0_2] : memref<2x48x1024xf32, #tpu.memory_space<vmem>>, vector<2x48x1024xf32>
    %4 = vector.shape_cast %3 : vector<2x48x1024xf32> to vector<96x1024xf32>
    %c0_3 = arith.constant 0 : index
    %c0_4 = arith.constant 0 : index
    %5 = vector.load %arg3[%c0_3, %c0_4] : memref<1024x1024xf32, #tpu.memory_space<vmem>>, vector<1024x1024xf32>
    %cst = arith.constant dense<0.000000e+00> : vector<96x1024xf32>
    %6 = tpu.matmul %4, %5, %cst {dimension_numbers = #tpu.dot_dimension_numbers<[1], [0], [0], [1], [0, 0, 1, 1], [], []>} : vector<96x1024xf32>, vector<1024x1024xf32>, vector<96x1024xf32> -> vector<96x1024xf32>
    %7 = arith.mulf %6, %6 : vector<96x1024xf32>
    %c512_i32 = arith.constant 512 : i32
    %8 = tpu.dynamic_rotate %7 by %c512_i32 dim 1 : vector<96x1024xf32>, i32 -> vector<96x1024xf32>
    %9 = tpu.iota {dimensions = array<i32: 1>} : vector<96x1024xi32>
    %c0_i32_5 = arith.constant 0 : i32
    %10 = vector.broadcast %c0_i32_5 : i32 to vector<96x1024xi32>
    %11 = arith.cmpi sgt, %9, %10 : vector<96x1024xi32>
    %c512_i32_6 = arith.constant 512 : i32
    %12 = vector.broadcast %c512_i32_6 : i32 to vector<96x1024xi32>
    %13 = arith.cmpi slt, %9, %12 : vector<96x1024xi32>
    %14 = arith.andi %11, %13 : vector<96x1024xi1>
    %cst_7 = arith.constant 0.000000e+00 : f32
    %15 = vector.broadcast %cst_7 : f32 to vector<96x1024xf32>
    %16 = arith.select %14, %8, %15 : vector<96x1024xi1>, vector<96x1024xf32>
    %17 = arith.addf %7, %16 : vector<96x1024xf32>
    %cst_8 = arith.constant 1.000000e-07 : f32
    %18 = vector.broadcast %cst_8 : f32 to vector<96x1024xf32>
    %19 = arith.maximumf %17, %18 : vector<96x1024xf32>
    %20 = math.log %19 : vector<96x1024xf32>
    %21 = vector.extract_strided_slice %20 {offsets = [48, 0], sizes = [48, 1024], strides = [1, 1]} : vector<96x1024xf32> to vector<48x1024xf32>
    %22 = vector.extract_strided_slice %20 {offsets = [0, 0], sizes = [48, 1024], strides = [1, 1]} : vector<96x1024xf32> to vector<48x1024xf32>
    %23 = arith.subf %21, %22 : vector<48x1024xf32>
    %24 = math.absf %23 : vector<48x1024xf32>
    %25 = tpu.iota {dimensions = array<i32: 1>} : vector<48x1024xi32>
    %c513_i32 = arith.constant 513 : i32
    %26 = vector.broadcast %c513_i32 : i32 to vector<48x1024xi32>
    %27 = arith.cmpi slt, %25, %26 : vector<48x1024xi32>
    %c0_9 = arith.constant 0 : index
    %c0_10 = arith.constant 0 : index
    %28 = vector.load %arg4[%c0_9, %c0_10] : memref<48x1024xf32, #tpu.memory_space<vmem>>, vector<48x1024xf32>
    %cst_11 = arith.constant 0.000000e+00 : f32
    %29 = vector.broadcast %cst_11 : f32 to vector<48x1024xf32>
    %30 = arith.select %27, %24, %29 : vector<48x1024xi1>, vector<48x1024xf32>
    %31 = arith.addf %28, %30 : vector<48x1024xf32>
    %c0_12 = arith.constant 0 : index
    %c0_13 = arith.constant 0 : index
    %32 = vector.load %arg4[%c0_12, %c0_13] : memref<48x1024xf32, #tpu.memory_space<vmem>>, vector<48x1024xf32>
    tpu.vector_store %arg4[%c0_12, %c0_13], %31 {strides = array<i32>} : memref<48x1024xf32, #tpu.memory_space<vmem>>, vector<48x1024xf32>,
    return
  }
  func.func @transform_0(%arg0: i32, %arg1: i32) -> (i32, i32, i32) {
    %c1_i32 = arith.constant 1 : i32
    %0 = arith.muli %arg0, %c1_i32 : i32
    %1 = arith.addi %0, %arg1 : i32
    %c0_i32 = arith.constant 0 : i32
    %c0_i32_0 = arith.constant 0 : i32
    %c0_i32_1 = arith.constant 0 : i32
    return %c0_i32, %1, %c0_i32_0 : i32, i32, i32
  }
  func.func @transform_1(%arg0: i32, %arg1: i32) -> (i32, i32) {
    %c0_i32 = arith.constant 0 : i32
    %c0_i32_0 = arith.constant 0 : i32
    %c0_i32_1 = arith.constant 0 : i32
    return %c0_i32, %c0_i32_0 : i32, i32
  }
  func.func @transform_2(%arg0: i32, %arg1: i32) -> (i32, i32) {
    %c0_i32 = arith.constant 0 : i32
    %c0_i32_0 = arith.constant 0 : i32
    return %arg0, %c0_i32 : i32, i32
  }
}

</mosaic_0001>

<bundles_post_ra>
// kernel: mag_mae_loss.1
= control target key start
LH: loop header
LB: loop body
LE: loop exit
PB: predicated region body
PF: predicated region fallthrough
CT: control target
= control target key end

     0   :  { %s10238_s1 = inlined_call_operand.vmem [shape: f32[1024,1024], index: 1, kind: input, shape index: {}]   ;;  %s10239_s0 = inlined_call_operand.vmem [shape: f32[2,48,1024], index: 0, kind: input, shape index: {}]   ;;  %s10240_s2 = inlined_call_operand.vmem [shape: f32[48,1024], index: 2, kind: output, shape index: {}]  }
   0x1   :  { %v185_v0 = vld [vmem:[%s10238_s1 + $0x8] sm:$0xff]  ;;  %v187_v2 = vld [vmem:[%s10238_s1 + $0x18] sm:$0xff]  ;;  %v184_v5 = vld [vmem:[%s10238_s1] sm:$0xff] }
   0x2   :  { %v193_v1 = vld [vmem:[%s10238_s1 + $0x48] sm:$0xff]  ;;  %v195_v4 = vld [vmem:[%s10238_s1 + $0x58] sm:$0xff]  ;;  %v192_v6 = vld [vmem:[%s10238_s1 + $0x40] sm:$0xff] }
   0x3   :  { %v4315_v3 = vpack.c.bf16 %v193_v1, %v185_v0  ;;  %v4571_v7 = vpack.c.bf16 %v195_v4, %v187_v2  ;;  %v4317_v8 = vpack.c.bf16 %v192_v6, %v184_v5  ;;  %v186_v9 = vld [vmem:[%s10238_s1 + $0x10] sm:$0xff]  ;;  %v201_v11 = vld [vmem:[%s10238_s1 + $0x88] sm:$0xff]  ;;  %v203_v14 = vld [vmem:[%s10238_s1 + $0x98] sm:$0xff] }
   0x4   :  { %v194_v10 = vld [vmem:[%s10238_s1 + $0x50] sm:$0xff]  ;;  %v209_v13 = vld [vmem:[%s10238_s1 + $0xc8] sm:$0xff]  ;;  %v211_v15 = vld [vmem:[%s10238_s1 + $0xd8] sm:$0xff] }
   0x5   :  { %4316 = vmatprep.subr.bf16.mxu0 %v4315_v3  ;;  %v4573_v12 = vpack.c.bf16 %v194_v10, %v186_v9  ;;  %4572 = vmatprep.subr.bf16.mxu1 %v4571_v7  ;;  %v4319_v16 = vpack.c.bf16 %v209_v13, %v201_v11  ;;  %v4575_v17 = vpack.c.bf16 %v211_v15, %v203_v14  ;;  %v200_v18 = vld [vmem:[%s10238_s1 + $0x80] sm:$0xff]  ;;  %v202_v20 = vld [vmem:[%s10238_s1 + $0x90] sm:$0xff]  ;;  %v217_v23 = vld [vmem:[%s10238_s1 + $0x108] sm:$0xff] }
   0x6   :  { %4318 = vmatpush1.bf16.msra.mxu0 %v4317_v8  ;;  %v208_v19 = vld [vmem:[%s10238_s1 + $0xc0] sm:$0xff]  ;;  %v210_v22 = vld [vmem:[%s10238_s1 + $0xd0] sm:$0xff]  ;;  %v225_v24 = vld [vmem:[%s10238_s1 + $0x148] sm:$0xff] }
   0x7   :  { %4574 = vmatpush1.bf16.msra.mxu1 %v4573_v12  ;;  %v4321_v21 = vpack.c.bf16 %v208_v19, %v200_v18  ;;  %4320 = vmatprep.subr.bf16.mxu0 %v4319_v16  ;;  %v4577_v25 = vpack.c.bf16 %v210_v22, %v202_v20  ;;  %v4323_v26 = vpack.c.bf16 %v225_v24, %v217_v23  ;;  %v219_v27 = vld [vmem:[%s10238_s1 + $0x118] sm:$0xff]  ;;  %v216_v29 = vld [vmem:[%s10238_s1 + $0x100] sm:$0xff]  ;;  %v218_v32 = vld [vmem:[%s10238_s1 + $0x110] sm:$0xff] }
   0x8   :  { %4576 = vmatprep.subr.bf16.mxu1 %v4575_v17  ;;  %v227_v28 = vld [vmem:[%s10238_s1 + $0x158] sm:$0xff]  ;;  %v224_v31 = vld [vmem:[%s10238_s1 + $0x140] sm:$0xff]  ;;  %v226_v33 = vld [vmem:[%s10238_s1 + $0x150] sm:$0xff] }
   0x9   :  { %v4579_v30 = vpack.c.bf16 %v227_v28, %v219_v27  ;;  %v4325_v34 = vpack.c.bf16 %v224_v31, %v216_v29  ;;  %v233_v35 = vld [vmem:[%s10238_s1 + $0x188] sm:$0xff]  ;;  %v235_v37 = vld [vmem:[%s10238_s1 + $0x198] sm:$0xff]  ;;  %v4581_v38 = vpack.c.bf16 %v226_v33, %v218_v32  ;;  %v232_v41 = vld [vmem:[%s10238_s1 + $0x180] sm:$0xff] }
   0xa   :  { %4322 = vmatpush1.bf16.msra.mxu0 %v4321_v21  ;;  %v241_v36 = vld [vmem:[%s10238_s1 + $0x1c8] sm:$0xff]  ;;  %v243_v40 = vld [vmem:[%s10238_s1 + $0x1d8] sm:$0xff]  ;;  %v240_v42 = vld [vmem:[%s10238_s1 + $0x1c0] sm:$0xff] }
   0xb   :  { %4578 = vmatpush1.bf16.msra.mxu1 %v4577_v25  ;;  %4324 = vmatprep.subr.bf16.mxu0 %v4323_v26  ;;  %v4327_v39 = vpack.c.bf16 %v241_v36, %v233_v35  ;;  %v4583_v43 = vpack.c.bf16 %v243_v40, %v235_v37  ;;  %v234_v44 = vld [vmem:[%s10238_s1 + $0x190] sm:$0xff]  ;;  %v249_v46 = vld [vmem:[%s10238_s1 + $0x208] sm:$0xff]  ;;  %v251_v48 = vld [vmem:[%s10238_s1 + $0x218] sm:$0xff]  ;;  %v4329_v50 = vpack.c.bf16 %v240_v42, %v232_v41 }
   0xc   :  { %4580 = vmatprep.subr.bf16.mxu1 %v4579_v30  ;;  %v242_v45 = vld [vmem:[%s10238_s1 + $0x1d0] sm:$0xff]  ;;  %v257_v47 = vld [vmem:[%s10238_s1 + $0x248] sm:$0xff]  ;;  %v259_v49 = vld [vmem:[%s10238_s1 + $0x258] sm:$0xff] }
   0xd   :  { %v4585_v51 = vpack.c.bf16 %v242_v45, %v234_v44  ;;  %v4331_v52 = vpack.c.bf16 %v257_v47, %v249_v46  ;;  %v248_v53 = vld [vmem:[%s10238_s1 + $0x200] sm:$0xff]  ;;  %v250_v55 = vld [vmem:[%s10238_s1 + $0x210] sm:$0xff]  ;;  %v4587_v56 = vpack.c.bf16 %v259_v49, %v251_v48  ;;  %v265_v58 = vld [vmem:[%s10238_s1 + $0x288] sm:$0xff] }
   0xe   :  { %4326 = vmatpush1.bf16.msra.mxu0 %v4325_v34  ;;  %v256_v54 = vld [vmem:[%s10238_s1 + $0x240] sm:$0xff]  ;;  %v258_v57 = vld [vmem:[%s10238_s1 + $0x250] sm:$0xff]  ;;  %v273_v59 = vld [vmem:[%s10238_s1 + $0x2c8] sm:$0xff] }
   0xf   :  { %4582 = vmatpush1.bf16.msra.mxu1 %v4581_v38  ;;  %4328 = vmatprep.subr.bf16.mxu0 %v4327_v39  ;;  %v267_v60 = vld [vmem:[%s10238_s1 + $0x298] sm:$0xff]  ;;  %v4333_v62 = vpack.c.bf16 %v256_v54, %v248_v53  ;;  %v4589_v63 = vpack.c.bf16 %v258_v57, %v250_v55  ;;  %v4335_v0 = vpack.c.bf16 %v273_v59, %v265_v58  ;;  %v264_v1 = vld [vmem:[%s10238_s1 + $0x280] sm:$0xff]  ;;  %v266_v3 = vld [vmem:[%s10238_s1 + $0x290] sm:$0xff] }
  0x10   :  { %4584 = vmatprep.subr.bf16.mxu1 %v4583_v43  ;;  %v275_v61 = vld [vmem:[%s10238_s1 + $0x2d8] sm:$0xff]  ;;  %v272_v2 = vld [vmem:[%s10238_s1 + $0x2c0] sm:$0xff]  ;;  %v274_v5 = vld [vmem:[%s10238_s1 + $0x2d0] sm:$0xff] }
  0x11   :  { %v4591_v4 = vpack.c.bf16 %v275_v61, %v267_v60  ;;  %v281_v6 = vld [vmem:[%s10238_s1 + $0x308] sm:$0xff]  ;;  %v283_v8 = vld [vmem:[%s10238_s1 + $0x318] sm:$0xff]  ;;  %v4337_v10 = vpack.c.bf16 %v272_v2, %v264_v1  ;;  %v4593_v11 = vpack.c.bf16 %v274_v5, %v266_v3  ;;  %v280_v13 = vld [vmem:[%s10238_s1 + $0x300] sm:$0xff] }
  0x12   :  { %4330 = vmatpush1.bf16.msra.mxu0 %v4329_v50  ;;  %v289_v7 = vld [vmem:[%s10238_s1 + $0x348] sm:$0xff]  ;;  %v291_v9 = vld [vmem:[%s10238_s1 + $0x358] sm:$0xff]  ;;  %v288_v14 = vld [vmem:[%s10238_s1 + $0x340] sm:$0xff] }
  0x13   :  { %4586 = vmatpush1.bf16.msra.mxu1 %v4585_v51  ;;  %4332 = vmatprep.subr.bf16.mxu0 %v4331_v52  ;;  %v4339_v12 = vpack.c.bf16 %v289_v7, %v281_v6  ;;  %v282_v15 = vld [vmem:[%s10238_s1 + $0x310] sm:$0xff]  ;;  %v4595_v16 = vpack.c.bf16 %v291_v9, %v283_v8  ;;  %v297_v18 = vld [vmem:[%s10238_s1 + $0x388] sm:$0xff]  ;;  %v299_v20 = vld [vmem:[%s10238_s1 + $0x398] sm:$0xff]  ;;  %v4341_v22 = vpack.c.bf16 %v288_v14, %v280_v13 }
  0x14   :  { %4588 = vmatprep.subr.bf16.mxu1 %v4587_v56  ;;  %v290_v17 = vld [vmem:[%s10238_s1 + $0x350] sm:$0xff]  ;;  %v305_v19 = vld [vmem:[%s10238_s1 + $0x3c8] sm:$0xff]  ;;  %v307_v21 = vld [vmem:[%s10238_s1 + $0x3d8] sm:$0xff] }
  0x15   :  { %v4597_v23 = vpack.c.bf16 %v290_v17, %v282_v15  ;;  %v4343_v24 = vpack.c.bf16 %v305_v19, %v297_v18  ;;  %v296_v25 = vld [vmem:[%s10238_s1 + $0x380] sm:$0xff]  ;;  %v298_v27 = vld [vmem:[%s10238_s1 + $0x390] sm:$0xff]  ;;  %v4599_v28 = vpack.c.bf16 %v307_v21, %v299_v20  ;;  %v313_v30 = vld [vmem:[%s10238_s1 + $0x408] sm:$0xff] }
  0x16   :  { %4334 = vmatpush1.bf16.msra.mxu0 %v4333_v62  ;;  %v304_v26 = vld [vmem:[%s10238_s1 + $0x3c0] sm:$0xff]  ;;  %v306_v29 = vld [vmem:[%s10238_s1 + $0x3d0] sm:$0xff]  ;;  %v321_v31 = vld [vmem:[%s10238_s1 + $0x448] sm:$0xff] }
  0x17   :  { %4590 = vmatpush1.bf16.msra.mxu1 %v4589_v63  ;;  %4336 = vmatprep.subr.bf16.mxu0 %v4335_v0  ;;  %v315_v32 = vld [vmem:[%s10238_s1 + $0x418] sm:$0xff]  ;;  %v4345_v34 = vpack.c.bf16 %v304_v26, %v296_v25  ;;  %v4601_v35 = vpack.c.bf16 %v306_v29, %v298_v27  ;;  %v4347_v36 = vpack.c.bf16 %v321_v31, %v313_v30  ;;  %v312_v37 = vld [vmem:[%s10238_s1 + $0x400] sm:$0xff]  ;;  %v314_v39 = vld [vmem:[%s10238_s1 + $0x410] sm:$0xff] }
  0x18   :  { %4592 = vmatprep.subr.bf16.mxu1 %v4591_v4  ;;  %v323_v33 = vld [vmem:[%s10238_s1 + $0x458] sm:$0xff]  ;;  %v320_v38 = vld [vmem:[%s10238_s1 + $0x440] sm:$0xff]  ;;  %v322_v41 = vld [vmem:[%s10238_s1 + $0x450] sm:$0xff] }
  0x19   :  { %v4603_v40 = vpack.c.bf16 %v323_v33, %v315_v32  ;;  %v329_v42 = vld [vmem:[%s10238_s1 + $0x488] sm:$0xff]  ;;  %v331_v44 = vld [vmem:[%s10238_s1 + $0x498] sm:$0xff]  ;;  %v4349_v46 = vpack.c.bf16 %v320_v38, %v312_v37  ;;  %v4605_v47 = vpack.c.bf16 %v322_v41, %v314_v39  ;;  %v328_v49 = vld [vmem:[%s10238_s1 + $0x480] sm:$0xff] }
  0x1a   :  { %4338 = vmatpush1.bf16.msra.mxu0 %v4337_v10  ;;  %v337_v43 = vld [vmem:[%s10238_s1 + $0x4c8] sm:$0xff]  ;;  %v339_v45 = vld [vmem:[%s10238_s1 + $0x4d8] sm:$0xff]  ;;  %v336_v50 = vld [vmem:[%s10238_s1 + $0x4c0] sm:$0xff] }
  0x1b   :  { %4594 = vmatpush1.bf16.msra.mxu1 %v4593_v11  ;;  %4340 = vmatprep.subr.bf16.mxu0 %v4339_v12  ;;  %v4351_v48 = vpack.c.bf16 %v337_v43, %v329_v42  ;;  %v330_v51 = vld [vmem:[%s10238_s1 + $0x490] sm:$0xff]  ;;  %v4607_v52 = vpack.c.bf16 %v339_v45, %v331_v44  ;;  %v345_v54 = vld [vmem:[%s10238_s1 + $0x508] sm:$0xff]  ;;  %v347_v56 = vld [vmem:[%s10238_s1 + $0x518] sm:$0xff]  ;;  %v4353_v58 = vpack.c.bf16 %v336_v50, %v328_v49 }
  0x1c   :  { %4596 = vmatprep.subr.bf16.mxu1 %v4595_v16  ;;  %v338_v53 = vld [vmem:[%s10238_s1 + $0x4d0] sm:$0xff]  ;;  %v353_v55 = vld [vmem:[%s10238_s1 + $0x548] sm:$0xff]  ;;  %v355_v57 = vld [vmem:[%s10238_s1 + $0x558] sm:$0xff] }
  0x1d   :  { %v4609_v59 = vpack.c.bf16 %v338_v53, %v330_v51  ;;  %v4355_v60 = vpack.c.bf16 %v353_v55, %v345_v54  ;;  %v344_v61 = vld [vmem:[%s10238_s1 + $0x500] sm:$0xff]  ;;  %v346_v63 = vld [vmem:[%s10238_s1 + $0x510] sm:$0xff]  ;;  %v4611_v0 = vpack.c.bf16 %v355_v57, %v347_v56  ;;  %v361_v2 = vld [vmem:[%s10238_s1 + $0x588] sm:$0xff] }
  0x1e   :  { %4342 = vmatpush1.bf16.msra.mxu0 %v4341_v22  ;;  %v352_v62 = vld [vmem:[%s10238_s1 + $0x540] sm:$0xff]  ;;  %v354_v1 = vld [vmem:[%s10238_s1 + $0x550] sm:$0xff]  ;;  %v369_v3 = vld [vmem:[%s10238_s1 + $0x5c8] sm:$0xff] }
  0x1f   :  { %4598 = vmatpush1.bf16.msra.mxu1 %v4597_v23  ;;  %4344 = vmatprep.subr.bf16.mxu0 %v4343_v24  ;;  %v363_v4 = vld [vmem:[%s10238_s1 + $0x598] sm:$0xff]  ;;  %v4357_v6 = vpack.c.bf16 %v352_v62, %v344_v61  ;;  %v360_v7 = vld [vmem:[%s10238_s1 + $0x580] sm:$0xff]  ;;  %v4613_v8 = vpack.c.bf16 %v354_v1, %v346_v63  ;;  %v4359_v9 = vpack.c.bf16 %v369_v3, %v361_v2  ;;  %v362_v11 = vld [vmem:[%s10238_s1 + $0x590] sm:$0xff] }
  0x20   :  { %4600 = vmatprep.subr.bf16.mxu1 %v4599_v28  ;;  %v371_v5 = vld [vmem:[%s10238_s1 + $0x5d8] sm:$0xff]  ;;  %v368_v10 = vld [vmem:[%s10238_s1 + $0x5c0] sm:$0xff]  ;;  %v370_v12 = vld [vmem:[%s10238_s1 + $0x5d0] sm:$0xff] }
  0x21   :  { %v4615_v13 = vpack.c.bf16 %v371_v5, %v363_v4  ;;  %v377_v14 = vld [vmem:[%s10238_s1 + $0x608] sm:$0xff]  ;;  %v379_v17 = vld [vmem:[%s10238_s1 + $0x618] sm:$0xff]  ;;  %v4361_v19 = vpack.c.bf16 %v368_v10, %v360_v7  ;;  %v4617_v20 = vpack.c.bf16 %v370_v12, %v362_v11  ;;  %v376_v22 = vld [vmem:[%s10238_s1 + $0x600] sm:$0xff] }
  0x22   :  { %4346 = vmatpush1.bf16.msra.mxu0 %v4345_v34  ;;  %v385_v15 = vld [vmem:[%s10238_s1 + $0x648] sm:$0xff]  ;;  %v387_v18 = vld [vmem:[%s10238_s1 + $0x658] sm:$0xff]  ;;  %v384_v23 = vld [vmem:[%s10238_s1 + $0x640] sm:$0xff] }
  0x23   :  { %4602 = vmatpush1.bf16.msra.mxu1 %v4601_v35  ;;  %4348 = vmatprep.subr.bf16.mxu0 %v4347_v36  ;;  %v89_v16 = vld [vmem:[%s10239_s0 + $0x8] sm:$0xff]  ;;  %v4363_v21 = vpack.c.bf16 %v385_v15, %v377_v14  ;;  %v378_v24 = vld [vmem:[%s10238_s1 + $0x610] sm:$0xff]  ;;  %v4619_v25 = vpack.c.bf16 %v387_v18, %v379_v17  ;;  %v395_v29 = vld [vmem:[%s10238_s1 + $0x698] sm:$0xff]  ;;  %v4365_v31 = vpack.c.bf16 %v384_v23, %v376_v22 }
  0x24   :  { %4604 = vmatprep.subr.bf16.mxu1 %v4603_v40  ;;  %1272 = vmatprep.mubr.f32.mxu0 %v89_v16  ;;  %v386_v26 = vld [vmem:[%s10238_s1 + $0x650] sm:$0xff]  ;;  %v393_v27 = vld [vmem:[%s10238_s1 + $0x688] sm:$0xff]  ;;  %v403_v30 = vld [vmem:[%s10238_s1 + $0x6d8] sm:$0xff] }
  0x25   :  { %1820 = vmatprep.mubr.f32.mxu1 %v89_v16  ;;  %v401_v28 = vld [vmem:[%s10238_s1 + $0x6c8] sm:$0xff]  ;;  %v4621_v32 = vpack.c.bf16 %v386_v26, %v378_v24  ;;  %v392_v34 = vld [vmem:[%s10238_s1 + $0x680] sm:$0xff]  ;;  %v394_v36 = vld [vmem:[%s10238_s1 + $0x690] sm:$0xff]  ;;  %v4623_v37 = vpack.c.bf16 %v403_v30, %v395_v29 }
  0x26   :  { %4350 = vmatpush1.bf16.msra.mxu0 %v4349_v46  ;;  %v4367_v33 = vpack.c.bf16 %v401_v28, %v393_v27  ;;  %v400_v35 = vld [vmem:[%s10238_s1 + $0x6c0] sm:$0xff]  ;;  %v402_v38 = vld [vmem:[%s10238_s1 + $0x6d0] sm:$0xff]  ;;  %v409_v39 = vld [vmem:[%s10238_s1 + $0x708] sm:$0xff] }
  0x27   :  { %4606 = vmatpush1.bf16.msra.mxu1 %v4605_v47  ;;  %4352 = vmatprep.subr.bf16.mxu0 %v4351_v48  ;;  %v417_v40 = vld [vmem:[%s10238_s1 + $0x748] sm:$0xff]  ;;  %v411_v41 = vld [vmem:[%s10238_s1 + $0x718] sm:$0xff]  ;;  %v4369_v43 = vpack.c.bf16 %v400_v35, %v392_v34  ;;  %v4625_v44 = vpack.c.bf16 %v402_v38, %v394_v36  ;;  %v408_v46 = vld [vmem:[%s10238_s1 + $0x700] sm:$0xff] }
  0x28   :  { %4608 = vmatprep.subr.bf16.mxu1 %v4607_v52  ;;  %v419_v42 = vld [vmem:[%s10238_s1 + $0x758] sm:$0xff]  ;;  %v4371_v45 = vpack.c.bf16 %v417_v40, %v409_v39  ;;  %v416_v47 = vld [vmem:[%s10238_s1 + $0x740] sm:$0xff]  ;;  %v410_v48 = vld [vmem:[%s10238_s1 + $0x710] sm:$0xff] }
  0x29   :  { %v4627_v49 = vpack.c.bf16 %v419_v42, %v411_v41  ;;  %v418_v50 = vld [vmem:[%s10238_s1 + $0x750] sm:$0xff]  ;;  %v425_v51 = vld [vmem:[%s10238_s1 + $0x788] sm:$0xff]  ;;  %v427_v53 = vld [vmem:[%s10238_s1 + $0x798] sm:$0xff]  ;;  %v4373_v55 = vpack.c.bf16 %v416_v47, %v408_v46 }
  0x2a   :  { %4354 = vmatpush1.bf16.msra.mxu0 %v4353_v58  ;;  %v433_v52 = vld [vmem:[%s10238_s1 + $0x7c8] sm:$0xff]  ;;  %v435_v54 = vld [vmem:[%s10238_s1 + $0x7d8] sm:$0xff]  ;;  %v4629_v56 = vpack.c.bf16 %v418_v50, %v410_v48  ;;  %v424_v58 = vld [vmem:[%s10238_s1 + $0x780] sm:$0xff] }
  0x2b   :  { %4610 = vmatpush1.bf16.msra.mxu1 %v4609_v59  ;;  %4356 = vmatprep.subr.bf16.mxu0 %v4355_v60  ;;  %v4375_v57 = vpack.c.bf16 %v433_v52, %v425_v51  ;;  %v432_v59 = vld [vmem:[%s10238_s1 + $0x7c0] sm:$0xff]  ;;  %v426_v60 = vld [vmem:[%s10238_s1 + $0x790] sm:$0xff]  ;;  %v4631_v61 = vpack.c.bf16 %v435_v54, %v427_v53  ;;  %v441_v63 = vld [vmem:[%s10238_s1 + $0x808] sm:$0xff] }
  0x2c   :  { %4612 = vmatprep.subr.bf16.mxu1 %v4611_v0  ;;  %v434_v62 = vld [vmem:[%s10238_s1 + $0x7d0] sm:$0xff]  ;;  %v449_v0 = vld [vmem:[%s10238_s1 + $0x848] sm:$0xff]  ;;  %v443_v1 = vld [vmem:[%s10238_s1 + $0x818] sm:$0xff]  ;;  %v4377_v3 = vpack.c.bf16 %v432_v59, %v424_v58 }
  0x2d   :  { %v451_v2 = vld [vmem:[%s10238_s1 + $0x858] sm:$0xff]  ;;  %v4633_v4 = vpack.c.bf16 %v434_v62, %v426_v60  ;;  %v4379_v5 = vpack.c.bf16 %v449_v0, %v441_v63  ;;  %v448_v7 = vld [vmem:[%s10238_s1 + $0x840] sm:$0xff]  ;;  %v450_v10 = vld [vmem:[%s10238_s1 + $0x850] sm:$0xff] }
  0x2e   :  { %4358 = vmatpush1.bf16.msra.mxu0 %v4357_v6  ;;  %v440_v6 = vld [vmem:[%s10238_s1 + $0x800] sm:$0xff]  ;;  %v457_v11 = vld [vmem:[%s10238_s1 + $0x888] sm:$0xff]  ;;  %v467_v14 = vld [vmem:[%s10238_s1 + $0x8d8] sm:$0xff] }
  0x2f   :  { %4614 = vmatpush1.bf16.msra.mxu1 %v4613_v8  ;;  %4360 = vmatprep.subr.bf16.mxu0 %v4359_v9  ;;  %v442_v8 = vld [vmem:[%s10238_s1 + $0x810] sm:$0xff]  ;;  %v4635_v9 = vpack.c.bf16 %v451_v2, %v443_v1  ;;  %v465_v12 = vld [vmem:[%s10238_s1 + $0x8c8] sm:$0xff]  ;;  %v88_v15 = vld [vmem:[%s10239_s0] sm:$0xff]  ;;  %v4381_v16 = vpack.c.bf16 %v448_v7, %v440_v6 }
  0x30   :  { %4616 = vmatprep.subr.bf16.mxu1 %v4615_v13  ;;  %v459_v13 = vld [vmem:[%s10238_s1 + $0x898] sm:$0xff]  ;;  %v4637_v17 = vpack.c.bf16 %v450_v10, %v442_v8  ;;  %v4383_v18 = vpack.c.bf16 %v465_v12, %v457_v11  ;;  %v466_v23 = vld [vmem:[%s10238_s1 + $0x8d0] sm:$0xff]  ;;  %v473_v24 = vld [vmem:[%s10238_s1 + $0x908] sm:$0xff] }
  0x31   :  { %v4639_v22 = vpack.c.bf16 %v467_v14, %v459_v13  ;;  %v475_v26 = vld [vmem:[%s10238_s1 + $0x918] sm:$0xff]  ;;  %v97_v28 = vld [vmem:[%s10239_s0 + $0x48] sm:$0xff]  ;;  %v96_v30 = vld [vmem:[%s10239_s0 + $0x40] sm:$0xff] }
  0x32   :  { %4362 = vmatpush1.bf16.msra.mxu0 %v4361_v19  ;;  %v456_v19 = vld [vmem:[%s10238_s1 + $0x880] sm:$0xff]  ;;  %v483_v27 = vld [vmem:[%s10238_s1 + $0x958] sm:$0xff]  ;;  %v474_v35 = vld [vmem:[%s10238_s1 + $0x910] sm:$0xff] }
  0x33   :  { %4618 = vmatpush1.bf16.msra.mxu1 %v4617_v20  ;;  %4364 = vmatprep.subr.bf16.mxu0 %v4363_v21  ;;  %v464_v20 = vld [vmem:[%s10238_s1 + $0x8c0] sm:$0xff]  ;;  %v458_v21 = vld [vmem:[%s10238_s1 + $0x890] sm:$0xff]  ;;  %v4643_v36 = vpack.c.bf16 %v483_v27, %v475_v26  ;;  %v489_v38 = vld [vmem:[%s10238_s1 + $0x988] sm:$0xff] }
  0x34   :  { %4620 = vmatprep.subr.bf16.mxu1 %v4619_v25  ;;  %v481_v25 = vld [vmem:[%s10238_s1 + $0x948] sm:$0xff]  ;;  %v4385_v29 = vpack.c.bf16 %v464_v20, %v456_v19  ;;  %v480_v34 = vld [vmem:[%s10238_s1 + $0x940] sm:$0xff]  ;;  %v491_v40 = vld [vmem:[%s10238_s1 + $0x998] sm:$0xff] }
  0x35   :  { %v497_v39 = vld [vmem:[%s10238_s1 + $0x9c8] sm:$0xff]  ;;  %v499_v41 = vld [vmem:[%s10238_s1 + $0x9d8] sm:$0xff]  ;;  %v488_v47 = vld [vmem:[%s10238_s1 + $0x980] sm:$0xff] }
  0x36   :  { %4366 = vmatpush1.bf16.msra.mxu0 %v4365_v31  ;;  %v4641_v31 = vpack.c.bf16 %v466_v23, %v458_v21  ;;  %v105_v42 = vld [vmem:[%s10239_s0 + $0x88] sm:$0xff]  ;;  %v4391_v46 = vpack.c.bf16 %v497_v39, %v489_v38  ;;  %v496_v48 = vld [vmem:[%s10238_s1 + $0x9c0] sm:$0xff]  ;;  %v4647_v50 = vpack.c.bf16 %v499_v41, %v491_v40  ;;  %v498_v51 = vld [vmem:[%s10238_s1 + $0x9d0] sm:$0xff] }
  0x37   :  { %4622 = vmatpush1.bf16.msra.mxu1 %v4621_v32  ;;  %4368 = vmatprep.subr.bf16.mxu0 %v4367_v33  ;;  %v4387_v32 = vpack.c.bf16 %v481_v25, %v473_v24  ;;  %v472_v33 = vld [vmem:[%s10238_s1 + $0x900] sm:$0xff]  ;;  %v505_v52 = vld [vmem:[%s10238_s1 + $0xa08] sm:$0xff]  ;;  %v507_v54 = vld [vmem:[%s10238_s1 + $0xa18] sm:$0xff] }
  0x38   :  { %4624 = vmatprep.subr.bf16.mxu1 %v4623_v37  ;;  %v482_v37 = vld [vmem:[%s10238_s1 + $0x950] sm:$0xff]  ;;  %v513_v53 = vld [vmem:[%s10238_s1 + $0xa48] sm:$0xff]  ;;  %v112_v58 = vld [vmem:[%s10239_s0 + $0xc0] sm:$0xff] }
  0x39   :  { %v4395_v60 = vpack.c.bf16 %v513_v53, %v505_v52  ;;  %v512_v62 = vld [vmem:[%s10238_s1 + $0xa40] sm:$0xff]  ;;  %v506_v63 = vld [vmem:[%s10238_s1 + $0xa10] sm:$0xff]  ;;  %v521_v2 = vld [vmem:[%s10238_s1 + $0xa88] sm:$0xff] }
  0x3a   :  { %4370 = vmatpush1.bf16.msra.mxu0 %v4369_v43  ;;  %v4389_v43 = vpack.c.bf16 %v480_v34, %v472_v33  ;;  %v514_v1 = vld [vmem:[%s10238_s1 + $0xa50] sm:$0xff]  ;;  %v121_v6 = vld [vmem:[%s10239_s0 + $0x108] sm:$0xff]  ;;  %v120_v8 = vld [vmem:[%s10239_s0 + $0x100] sm:$0xff] }
  0x3b   :  { %4626 = vmatpush1.bf16.msra.mxu1 %v4625_v44  ;;  %4372 = vmatprep.subr.bf16.mxu0 %v4371_v45  ;;  %v104_v44 = vld [vmem:[%s10239_s0 + $0x80] sm:$0xff]  ;;  %v4645_v45 = vpack.c.bf16 %v482_v37, %v474_v35  ;;  %v522_v13 = vld [vmem:[%s10238_s1 + $0xa90] sm:$0xff]  ;;  %v547_v19 = vld [vmem:[%s10238_s1 + $0xb58] sm:$0xff] }
  0x3c   :  { %4628 = vmatprep.subr.bf16.mxu1 %v4627_v49  ;;  %v490_v49 = vld [vmem:[%s10238_s1 + $0x990] sm:$0xff]  ;;  %v520_v11 = vld [vmem:[%s10238_s1 + $0xa80] sm:$0xff]  ;;  %v129_v20 = vld [vmem:[%s10239_s0 + $0x148] sm:$0xff] }
  0x3d   :  { %v4649_v59 = vpack.c.bf16 %v498_v51, %v490_v49  ;;  %v528_v12 = vld [vmem:[%s10238_s1 + $0xac0] sm:$0xff]  ;;  %v538_v27 = vld [vmem:[%s10238_s1 + $0xb10] sm:$0xff]  ;;  %v563_v33 = vld [vmem:[%s10238_s1 + $0xbd8] sm:$0xff] }
  0x3e   :  { %4374 = vmatpush1.bf16.msra.mxu0 %v4373_v55  ;;  %v515_v55 = vld [vmem:[%s10238_s1 + $0xa58] sm:$0xff]  ;;  %v4401_v21 = vpack.c.bf16 %v528_v12, %v520_v11  ;;  %v536_v25 = vld [vmem:[%s10238_s1 + $0xb00] sm:$0xff]  ;;  %v137_v34 = vld [vmem:[%s10239_s0 + $0x188] sm:$0xff] }
  0x3f   :  { %4630 = vmatpush1.bf16.msra.mxu1 %v4629_v56  ;;  %4376 = vmatprep.subr.bf16.mxu0 %v4375_v57  ;;  %v113_v56 = vld [vmem:[%s10239_s0 + $0xc8] sm:$0xff]  ;;  %v4393_v57 = vpack.c.bf16 %v496_v48, %v488_v47  ;;  %v4651_v0 = vpack.c.bf16 %v515_v55, %v507_v54  ;;  %v544_v26 = vld [vmem:[%s10238_s1 + $0xb40] sm:$0xff]  ;;  %v554_v41 = vld [vmem:[%s10238_s1 + $0xb90] sm:$0xff] }
  0x40   :  { %4632 = vmatprep.subr.bf16.mxu1 %v4631_v61  ;;  %v504_v61 = vld [vmem:[%s10238_s1 + $0xa00] sm:$0xff]  ;;  %v4405_v35 = vpack.c.bf16 %v544_v26, %v536_v25  ;;  %v579_v47 = vld [vmem:[%s10238_s1 + $0xc58] sm:$0xff]  ;;  %v145_v48 = vld [vmem:[%s10239_s0 + $0x1c8] sm:$0xff] }
  0x41   :  { %v4397_v7 = vpack.c.bf16 %v512_v62, %v504_v61  ;;  %v552_v39 = vld [vmem:[%s10238_s1 + $0xb80] sm:$0xff]  ;;  %v570_v55 = vld [vmem:[%s10238_s1 + $0xc10] sm:$0xff]  ;;  %v595_v61 = vld [vmem:[%s10238_s1 + $0xcd8] sm:$0xff] }
  0x42   :  { %4378 = vmatpush1.bf16.msra.mxu0 %v4377_v3  ;;  %v529_v3 = vld [vmem:[%s10238_s1 + $0xac8] sm:$0xff]  ;;  %v560_v40 = vld [vmem:[%s10238_s1 + $0xbc0] sm:$0xff]  ;;  %v611_v11 = vld [vmem:[%s10238_s1 + $0xd58] sm:$0xff] }
  0x43   :  { %4634 = vmatpush1.bf16.msra.mxu1 %v4633_v4  ;;  %4380 = vmatprep.subr.bf16.mxu0 %v4379_v5  ;;  %v523_v4 = vld [vmem:[%s10238_s1 + $0xa98] sm:$0xff]  ;;  %v4399_v10 = vpack.c.bf16 %v529_v3, %v521_v2  ;;  %v4409_v49 = vpack.c.bf16 %v560_v40, %v552_v39  ;;  %v568_v53 = vld [vmem:[%s10238_s1 + $0xc00] sm:$0xff]  ;;  %v153_v62 = vld [vmem:[%s10239_s0 + $0x208] sm:$0xff] }
  0x44   :  { %4636 = vmatprep.subr.bf16.mxu1 %v4635_v9  ;;  %v531_v5 = vld [vmem:[%s10238_s1 + $0xad8] sm:$0xff]  ;;  %v4653_v9 = vpack.c.bf16 %v514_v1, %v506_v63  ;;  %v576_v54 = vld [vmem:[%s10238_s1 + $0xc40] sm:$0xff]  ;;  %v161_v12 = vld [vmem:[%s10239_s0 + $0x248] sm:$0xff] }
  0x45   :  { %1273 = vmatmul.mubr.f32.vlgmr.msra.gmra.mrb[0].mxu0 %v88_v15  ;;  %v4655_v14 = vpack.c.bf16 %v531_v5, %v523_v4  ;;  %v4413_v63 = vpack.c.bf16 %v576_v54, %v568_v53  ;;  %v584_v3 = vld [vmem:[%s10238_s1 + $0xc80] sm:$0xff]  ;;  %v586_v5 = vld [vmem:[%s10238_s1 + $0xc90] sm:$0xff]  ;;  %v627_v25 = vld [vmem:[%s10238_s1 + $0xdd8] sm:$0xff] }
  0x46   :  { %4382 = vmatpush1.bf16.msra.mxu0 %v4381_v16  ;;  %1821 = vmatmul.mubr.f32.vlgmr.msra.gmra.mrb[0].mxu1 %v88_v15  ;;  %v530_v15 = vld [vmem:[%s10238_s1 + $0xad0] sm:$0xff]  ;;  %v537_v16 = vld [vmem:[%s10238_s1 + $0xb08] sm:$0xff]  ;;  %v592_v4 = vld [vmem:[%s10238_s1 + $0xcc0] sm:$0xff] }
  0x47   :  { %4638 = vmatpush1.bf16.msra.mxu1 %v4637_v17  ;;  %4384 = vmatprep.subr.bf16.mxu0 %v4383_v18  ;;  %v545_v17 = vld [vmem:[%s10238_s1 + $0xb48] sm:$0xff]  ;;  %v539_v18 = vld [vmem:[%s10238_s1 + $0xb18] sm:$0xff]  ;;  %v4657_v23 = vpack.c.bf16 %v530_v15, %v522_v13  ;;  %v4417_v13 = vpack.c.bf16 %v592_v4, %v584_v3 }
  0x48   :  { %4640 = vmatprep.subr.bf16.mxu1 %v4639_v22  ;;  %1278 = vmatprep.mubr.f32.mxu0 %v97_v28  ;;  %v128_v22 = vld [vmem:[%s10239_s0 + $0x140] sm:$0xff]  ;;  %v4403_v24 = vpack.c.bf16 %v545_v17, %v537_v16  ;;  %v169_v26 = vld [vmem:[%s10239_s0 + $0x288] sm:$0xff]  ;;  %v643_v39 = vld [vmem:[%s10238_s1 + $0xe58] sm:$0xff] }
  0x49   :  { %1826 = vmatprep.mubr.f32.mxu1 %v97_v28  ;;  %1279 = vmatmul.mubr.f32.gmra.mrb[2].mxu0 %v96_v30  ;;  %v4659_v28 = vpack.c.bf16 %v547_v19, %v539_v18  ;;  %v600_v17 = vld [vmem:[%s10238_s1 + $0xd00] sm:$0xff]  ;;  %v602_v19 = vld [vmem:[%s10238_s1 + $0xd10] sm:$0xff]  ;;  %v177_v40 = vld [vmem:[%s10239_s0 + $0x2c8] sm:$0xff] }
  0x4a   :  { %4386 = vmatpush1.bf16.msra.mxu0 %v4385_v29  ;;  %1827 = vmatmul.mubr.f32.gmra.mrb[2].mxu1 %v96_v30  ;;  %v546_v29 = vld [vmem:[%s10238_s1 + $0xb50] sm:$0xff]  ;;  %v553_v30 = vld [vmem:[%s10238_s1 + $0xb88] sm:$0xff]  ;;  %v608_v18 = vld [vmem:[%s10238_s1 + $0xd40] sm:$0xff] }
  0x4b   :  { %4642 = vmatpush1.bf16.msra.mxu1 %v4641_v31  ;;  %4388 = vmatprep.subr.bf16.mxu0 %v4387_v32  ;;  %v561_v31 = vld [vmem:[%s10238_s1 + $0xbc8] sm:$0xff]  ;;  %v555_v32 = vld [vmem:[%s10238_s1 + $0xb98] sm:$0xff]  ;;  %v4661_v37 = vpack.c.bf16 %v546_v29, %v538_v27  ;;  %v4421_v27 = vpack.c.bf16 %v608_v18, %v600_v17  ;;  %v680_v18 = vld [vmem:[%s10238_s1 + $0xf80] sm:$0xff] }
  0x4c   :  { %4644 = vmatprep.subr.bf16.mxu1 %v4643_v36  ;;  %1284 = vmatprep.mubr.f32.mxu0 %v105_v42  ;;  %v136_v36 = vld [vmem:[%s10239_s0 + $0x180] sm:$0xff]  ;;  %v4407_v38 = vpack.c.bf16 %v561_v31, %v553_v30  ;;  %v659_v53 = vld [vmem:[%s10238_s1 + $0xed8] sm:$0xff] }
  0x4d   :  { %1832 = vmatprep.mubr.f32.mxu1 %v105_v42  ;;  %1285 = vmatmul.mubr.f32.gmra.mrb[4].mxu0 %v104_v44  ;;  %v4663_v42 = vpack.c.bf16 %v563_v33, %v555_v32  ;;  %v616_v31 = vld [vmem:[%s10238_s1 + $0xd80] sm:$0xff]  ;;  %v618_v33 = vld [vmem:[%s10238_s1 + $0xd90] sm:$0xff]  ;;  %v91_v54 = vld [vmem:[%s10239_s0 + $0x18] sm:$0xff] }
  0x4e   :  { %4390 = vmatpush1.bf16.msra.mxu0 %v4389_v43  ;;  %1833 = vmatmul.mubr.f32.gmra.mrb[4].mxu1 %v104_v44  ;;  %v562_v43 = vld [vmem:[%s10238_s1 + $0xbd0] sm:$0xff]  ;;  %v569_v44 = vld [vmem:[%s10238_s1 + $0xc08] sm:$0xff]  ;;  %v624_v32 = vld [vmem:[%s10238_s1 + $0xdc0] sm:$0xff] }
  0x4f   :  { %4646 = vmatpush1.bf16.msra.mxu1 %v4645_v45  ;;  %4392 = vmatprep.subr.bf16.mxu0 %v4391_v46  ;;  %v577_v45 = vld [vmem:[%s10238_s1 + $0xc48] sm:$0xff]  ;;  %v571_v46 = vld [vmem:[%s10238_s1 + $0xc18] sm:$0xff]  ;;  %v4665_v51 = vpack.c.bf16 %v562_v43, %v554_v41  ;;  %v4425_v41 = vpack.c.bf16 %v624_v32, %v616_v31  ;;  %v704_v31 = vld [vmem:[%s10238_s1 + $0x1040] sm:$0xff] }
  0x50   :  { %4648 = vmatprep.subr.bf16.mxu1 %v4647_v50  ;;  %1290 = vmatprep.mubr.f32.mxu0 %v113_v56  ;;  %v144_v50 = vld [vmem:[%s10239_s0 + $0x1c0] sm:$0xff]  ;;  %v4411_v52 = vpack.c.bf16 %v577_v45, %v569_v44  ;;  %v698_v32 = vld [vmem:[%s10238_s1 + $0x1010] sm:$0xff] }
  0x51   :  { %1838 = vmatprep.mubr.f32.mxu1 %v113_v56  ;;  %1291 = vmatmul.mubr.f32.gmra.mrb[6].mxu0 %v112_v58  ;;  %v4667_v56 = vpack.c.bf16 %v579_v47, %v571_v46  ;;  %v632_v45 = vld [vmem:[%s10238_s1 + $0xe00] sm:$0xff]  ;;  %v634_v47 = vld [vmem:[%s10238_s1 + $0xe10] sm:$0xff] }
  0x52   :  { %4394 = vmatpush1.bf16.msra.mxu0 %v4393_v57  ;;  %1839 = vmatmul.mubr.f32.gmra.mrb[6].mxu1 %v112_v58  ;;  %v578_v57 = vld [vmem:[%s10238_s1 + $0xc50] sm:$0xff]  ;;  %v585_v58 = vld [vmem:[%s10238_s1 + $0xc88] sm:$0xff]  ;;  %v640_v46 = vld [vmem:[%s10238_s1 + $0xe40] sm:$0xff] }
  0x53   :  { %4650 = vmatpush1.bf16.msra.mxu1 %v4649_v59  ;;  %4396 = vmatprep.subr.bf16.mxu0 %v4395_v60  ;;  %v593_v59 = vld [vmem:[%s10238_s1 + $0xcc8] sm:$0xff]  ;;  %v587_v60 = vld [vmem:[%s10238_s1 + $0xc98] sm:$0xff]  ;;  %v4669_v1 = vpack.c.bf16 %v578_v57, %v570_v55  ;;  %v4429_v55 = vpack.c.bf16 %v640_v46, %v632_v45  ;;  %v714_v45 = vld [vmem:[%s10238_s1 + $0x1090] sm:$0xff] }
  0x54   :  { %4652 = vmatprep.subr.bf16.mxu1 %v4651_v0  ;;  %1296 = vmatprep.mubr.f32.mxu0 %v121_v6  ;;  %v152_v0 = vld [vmem:[%s10239_s0 + $0x200] sm:$0xff]  ;;  %v4415_v2 = vpack.c.bf16 %v593_v59, %v585_v58 }
  0x55   :  { %1844 = vmatprep.mubr.f32.mxu1 %v121_v6  ;;  %1297 = vmatmul.mubr.f32.gmra.mrb[8].mxu0 %v120_v8  ;;  %v4671_v6 = vpack.c.bf16 %v595_v61, %v587_v60  ;;  %v648_v58 = vld [vmem:[%s10238_s1 + $0xe80] sm:$0xff]  ;;  %v650_v60 = vld [vmem:[%s10238_s1 + $0xe90] sm:$0xff] }
  0x56   :  { %4398 = vmatpush1.bf16.msra.mxu0 %v4397_v7  ;;  %1845 = vmatmul.mubr.f32.gmra.mrb[8].mxu1 %v120_v8  ;;  %v594_v7 = vld [vmem:[%s10238_s1 + $0xcd0] sm:$0xff]  ;;  %v601_v8 = vld [vmem:[%s10238_s1 + $0xd08] sm:$0xff]  ;;  %v656_v59 = vld [vmem:[%s10238_s1 + $0xec0] sm:$0xff] }
  0x57   :  { %4654 = vmatpush1.bf16.msra.mxu1 %v4653_v9  ;;  %4400 = vmatprep.subr.bf16.mxu0 %v4399_v10  ;;  %v609_v9 = vld [vmem:[%s10238_s1 + $0xd48] sm:$0xff]  ;;  %v603_v10 = vld [vmem:[%s10238_s1 + $0xd18] sm:$0xff]  ;;  %v4673_v15 = vpack.c.bf16 %v594_v7, %v586_v5  ;;  %v4433_v3 = vpack.c.bf16 %v656_v59, %v648_v58  ;;  %v672_v7 = vld [vmem:[%s10238_s1 + $0xf40] sm:$0xff] }
  0x58   :  { %4656 = vmatprep.subr.bf16.mxu1 %v4655_v14  ;;  %1302 = vmatprep.mubr.f32.mxu0 %v129_v20  ;;  %v160_v14 = vld [vmem:[%s10239_s0 + $0x240] sm:$0xff]  ;;  %v4419_v16 = vpack.c.bf16 %v609_v9, %v601_v8  ;;  %v666_v8 = vld [vmem:[%s10238_s1 + $0xf10] sm:$0xff] }
  0x59   :  { %1850 = vmatprep.mubr.f32.mxu1 %v129_v20  ;;  %1303 = vmatmul.mubr.f32.gmra.mrb[10].mxu0 %v128_v22  ;;  %v4675_v20 = vpack.c.bf16 %v611_v11, %v603_v10  ;;  %v674_v10 = vld [vmem:[%s10238_s1 + $0xf50] sm:$0xff]  ;;  %v681_v11 = vld [vmem:[%s10238_s1 + $0xf88] sm:$0xff]  ;;  %v736_v58 = vld [vmem:[%s10238_s1 + $0x1140] sm:$0xff] }
  0x5a   :  { %4402 = vmatpush1.bf16.msra.mxu0 %v4401_v21  ;;  %1851 = vmatmul.mubr.f32.gmra.mrb[10].mxu1 %v128_v22  ;;  %v610_v21 = vld [vmem:[%s10238_s1 + $0xd50] sm:$0xff]  ;;  %v617_v22 = vld [vmem:[%s10238_s1 + $0xd88] sm:$0xff] }
  0x5b   :  { %4658 = vmatpush1.bf16.msra.mxu1 %v4657_v23  ;;  %4404 = vmatprep.subr.bf16.mxu0 %v4403_v24  ;;  %v625_v23 = vld [vmem:[%s10238_s1 + $0xdc8] sm:$0xff]  ;;  %v619_v24 = vld [vmem:[%s10238_s1 + $0xd98] sm:$0xff]  ;;  %v4677_v29 = vpack.c.bf16 %v610_v21, %v602_v19  ;;  %v688_v19 = vld [vmem:[%s10238_s1 + $0xfc0] sm:$0xff] }
  0x5c   :  { %4660 = vmatprep.subr.bf16.mxu1 %v4659_v28  ;;  %1308 = vmatprep.mubr.f32.mxu0 %v137_v34  ;;  %v168_v28 = vld [vmem:[%s10239_s0 + $0x280] sm:$0xff]  ;;  %v4423_v30 = vpack.c.bf16 %v625_v23, %v617_v22  ;;  %v690_v22 = vld [vmem:[%s10238_s1 + $0xfd0] sm:$0xff]  ;;  %v697_v23 = vld [vmem:[%s10238_s1 + $0x1008] sm:$0xff] }
  0x5d   :  { %1856 = vmatprep.mubr.f32.mxu1 %v137_v34  ;;  %1309 = vmatmul.mubr.f32.gmra.mrb[12].mxu0 %v136_v36  ;;  %v4679_v34 = vpack.c.bf16 %v627_v25, %v619_v24  ;;  %v705_v24 = vld [vmem:[%s10238_s1 + $0x1048] sm:$0xff]  ;;  %v699_v25 = vld [vmem:[%s10238_s1 + $0x1018] sm:$0xff]  ;;  %v730_v59 = vld [vmem:[%s10238_s1 + $0x1110] sm:$0xff] }
  0x5e   :  { %4406 = vmatpush1.bf16.msra.mxu0 %v4405_v35  ;;  %1857 = vmatmul.mubr.f32.gmra.mrb[12].mxu1 %v136_v36  ;;  %v626_v35 = vld [vmem:[%s10238_s1 + $0xdd0] sm:$0xff]  ;;  %v633_v36 = vld [vmem:[%s10238_s1 + $0xe08] sm:$0xff] }
  0x5f   :  { %4662 = vmatpush1.bf16.msra.mxu1 %v4661_v37  ;;  %4408 = vmatprep.subr.bf16.mxu0 %v4407_v38  ;;  %v641_v37 = vld [vmem:[%s10238_s1 + $0xe48] sm:$0xff]  ;;  %v635_v38 = vld [vmem:[%s10238_s1 + $0xe18] sm:$0xff]  ;;  %v4681_v43 = vpack.c.bf16 %v626_v35, %v618_v33 }
  0x60   :  { %4664 = vmatprep.subr.bf16.mxu1 %v4663_v42  ;;  %1314 = vmatprep.mubr.f32.mxu0 %v145_v48  ;;  %v176_v42 = vld [vmem:[%s10239_s0 + $0x2c0] sm:$0xff]  ;;  %v4427_v44 = vpack.c.bf16 %v641_v37, %v633_v36  ;;  %v713_v35 = vld [vmem:[%s10238_s1 + $0x1088] sm:$0xff]  ;;  %v715_v37 = vld [vmem:[%s10238_s1 + $0x1098] sm:$0xff] }
  0x61   :  { %1862 = vmatprep.mubr.f32.mxu1 %v145_v48  ;;  %1315 = vmatmul.mubr.f32.gmra.mrb[14].mxu0 %v144_v50  ;;  %v4683_v48 = vpack.c.bf16 %v643_v39, %v635_v38  ;;  %v721_v36 = vld [vmem:[%s10238_s1 + $0x10c8] sm:$0xff]  ;;  %v723_v38 = vld [vmem:[%s10238_s1 + $0x10d8] sm:$0xff]  ;;  %v90_v39 = vld [vmem:[%s10239_s0 + $0x10] sm:$0xff] }
  0x62   :  { %4410 = vmatpush1.bf16.msra.mxu0 %v4409_v49  ;;  %1863 = vmatmul.mubr.f32.gmra.mrb[14].mxu1 %v144_v50  ;;  %v642_v49 = vld [vmem:[%s10238_s1 + $0xe50] sm:$0xff]  ;;  %v649_v50 = vld [vmem:[%s10238_s1 + $0xe88] sm:$0xff]  ;;  %v4703_v46 = vpack.c.bf16 %v723_v38, %v715_v37 }
  0x63   :  { %4666 = vmatpush1.bf16.msra.mxu1 %v4665_v51  ;;  %4412 = vmatprep.subr.bf16.mxu0 %v4411_v52  ;;  %v657_v51 = vld [vmem:[%s10238_s1 + $0xec8] sm:$0xff]  ;;  %v651_v52 = vld [vmem:[%s10238_s1 + $0xe98] sm:$0xff]  ;;  %v778_v37 = vld [vmem:[%s10238_s1 + $0x1290] sm:$0xff] }
  0x64   :  { %4668 = vmatprep.subr.bf16.mxu1 %v4667_v56  ;;  %1320 = vmatprep.mubr.f32.mxu0 %v153_v62  ;;  %v4685_v56 = vpack.c.bf16 %v642_v49, %v634_v47  ;;  %v4431_v57 = vpack.c.bf16 %v657_v51, %v649_v50  ;;  %v4687_v61 = vpack.c.bf16 %v659_v53, %v651_v52  ;;  %v722_v47 = vld [vmem:[%s10238_s1 + $0x10d0] sm:$0xff]  ;;  %v737_v49 = vld [vmem:[%s10238_s1 + $0x1148] sm:$0xff]  ;;  %v731_v50 = vld [vmem:[%s10238_s1 + $0x1118] sm:$0xff] }
  0x65   :  { %1868 = vmatprep.mubr.f32.mxu1 %v153_v62  ;;  %1321 = vmatmul.mubr.f32.gmra.mrb[16].mxu0 %v152_v0  ;;  %v658_v62 = vld [vmem:[%s10238_s1 + $0xed0] sm:$0xff]  ;;  %v739_v51 = vld [vmem:[%s10238_s1 + $0x1158] sm:$0xff] }
  0x66   :  { %4414 = vmatpush1.bf16.msra.mxu0 %v4413_v63  ;;  %1869 = vmatmul.mubr.f32.gmra.mrb[16].mxu1 %v152_v0  ;;  %v665_v63 = vld [vmem:[%s10238_s1 + $0xf08] sm:$0xff]  ;;  %v4689_v4 = vpack.c.bf16 %v658_v62, %v650_v60  ;;  %v99_v52 = vld [vmem:[%s10239_s0 + $0x58] sm:$0xff]  ;;  %v4707_v60 = vpack.c.bf16 %v739_v51, %v731_v50  ;;  %v800_v50 = vld [vmem:[%s10238_s1 + $0x1340] sm:$0xff] }
  0x67   :  { %4670 = vmatpush1.bf16.msra.mxu1 %v4669_v1  ;;  %4416 = vmatprep.subr.bf16.mxu0 %v4415_v2  ;;  %v673_v0 = vld [vmem:[%s10238_s1 + $0xf48] sm:$0xff]  ;;  %v667_v1 = vld [vmem:[%s10238_s1 + $0xf18] sm:$0xff]  ;;  %v794_v51 = vld [vmem:[%s10238_s1 + $0x1310] sm:$0xff] }
  0x68   :  { %4672 = vmatprep.subr.bf16.mxu1 %v4671_v6  ;;  %1326 = vmatprep.mubr.f32.mxu0 %v161_v12  ;;  %v675_v2 = vld [vmem:[%s10238_s1 + $0xf58] sm:$0xff]  ;;  %v4435_v5 = vpack.c.bf16 %v673_v0, %v665_v63  ;;  %v664_v6 = vld [vmem:[%s10238_s1 + $0xf00] sm:$0xff]  ;;  %v745_v62 = vld [vmem:[%s10238_s1 + $0x1188] sm:$0xff] }
  0x69   :  { %1874 = vmatprep.mubr.f32.mxu1 %v161_v12  ;;  %1327 = vmatmul.mubr.f32.gmra.mrb[18].mxu0 %v160_v14  ;;  %v4691_v9 = vpack.c.bf16 %v675_v2, %v667_v1  ;;  %v689_v12 = vld [vmem:[%s10238_s1 + $0xfc8] sm:$0xff]  ;;  %v747_v0 = vld [vmem:[%s10238_s1 + $0x1198] sm:$0xff] }
  0x6a   :  { %4418 = vmatpush1.bf16.msra.mxu0 %v4417_v13  ;;  %1875 = vmatmul.mubr.f32.gmra.mrb[18].mxu1 %v160_v14  ;;  %v683_v13 = vld [vmem:[%s10238_s1 + $0xf98] sm:$0xff]  ;;  %v4439_v17 = vpack.c.bf16 %v689_v12, %v681_v11  ;;  %v753_v63 = vld [vmem:[%s10238_s1 + $0x11c8] sm:$0xff]  ;;  %v754_v11 = vld [vmem:[%s10238_s1 + $0x11d0] sm:$0xff] }
  0x6b   :  { %4674 = vmatpush1.bf16.msra.mxu1 %v4673_v15  ;;  %4420 = vmatprep.subr.bf16.mxu0 %v4419_v16  ;;  %v691_v14 = vld [vmem:[%s10238_s1 + $0xfd8] sm:$0xff]  ;;  %v4437_v15 = vpack.c.bf16 %v672_v7, %v664_v6  ;;  %v4693_v16 = vpack.c.bf16 %v674_v10, %v666_v8  ;;  %v4455_v6 = vpack.c.bf16 %v753_v63, %v745_v62  ;;  %v744_v7 = vld [vmem:[%s10238_s1 + $0x1180] sm:$0xff]  ;;  %v761_v12 = vld [vmem:[%s10238_s1 + $0x1208] sm:$0xff] }
  0x6c   :  { %4676 = vmatprep.subr.bf16.mxu1 %v4675_v20  ;;  %1332 = vmatprep.mubr.f32.mxu0 %v169_v26  ;;  %v682_v20 = vld [vmem:[%s10238_s1 + $0xf90] sm:$0xff]  ;;  %v4695_v21 = vpack.c.bf16 %v691_v14, %v683_v13  ;;  %v755_v1 = vld [vmem:[%s10238_s1 + $0x11d8] sm:$0xff]  ;;  %v752_v8 = vld [vmem:[%s10238_s1 + $0x11c0] sm:$0xff] }
  0x6d   :  { %1880 = vmatprep.mubr.f32.mxu1 %v169_v26  ;;  %1333 = vmatmul.mubr.f32.gmra.mrb[20].mxu0 %v168_v28  ;;  %v707_v26 = vld [vmem:[%s10238_s1 + $0x1058] sm:$0xff]  ;;  %v4711_v10 = vpack.c.bf16 %v755_v1, %v747_v0  ;;  %v769_v13 = vld [vmem:[%s10238_s1 + $0x1248] sm:$0xff]  ;;  %v808_v63 = vld [vmem:[%s10238_s1 + $0x1380] sm:$0xff] }
  0x6e   :  { %4422 = vmatpush1.bf16.msra.mxu0 %v4421_v27  ;;  %1881 = vmatmul.mubr.f32.gmra.mrb[20].mxu1 %v168_v28  ;;  %v4441_v27 = vpack.c.bf16 %v688_v19, %v680_v18  ;;  %v4697_v28 = vpack.c.bf16 %v690_v22, %v682_v20  ;;  %v4699_v33 = vpack.c.bf16 %v707_v26, %v699_v25  ;;  %v107_v2 = vld [vmem:[%s10239_s0 + $0x98] sm:$0xff]  ;;  %v114_v18 = vld [vmem:[%s10239_s0 + $0xd0] sm:$0xff]  ;;  %v768_v22 = vld [vmem:[%s10238_s1 + $0x1240] sm:$0xff] }
  0x6f   :  { %4678 = vmatpush1.bf16.msra.mxu1 %v4677_v29  ;;  %4424 = vmatprep.subr.bf16.mxu0 %v4423_v30  ;;  %v4443_v29 = vpack.c.bf16 %v705_v24, %v697_v23  ;;  %v696_v30 = vld [vmem:[%s10238_s1 + $0x1000] sm:$0xff]  ;;  %v763_v14 = vld [vmem:[%s10238_s1 + $0x1218] sm:$0xff]  ;;  %v4459_v20 = vpack.c.bf16 %v769_v13, %v761_v12  ;;  %v762_v23 = vld [vmem:[%s10238_s1 + $0x1210] sm:$0xff] }
  0x70   :  { %4680 = vmatprep.subr.bf16.mxu1 %v4679_v34  ;;  %1338 = vmatprep.mubr.f32.mxu0 %v177_v40  ;;  %v706_v34 = vld [vmem:[%s10238_s1 + $0x1050] sm:$0xff]  ;;  %v777_v26 = vld [vmem:[%s10238_s1 + $0x1288] sm:$0xff]  ;;  %v816_v0 = vld [vmem:[%s10238_s1 + $0x13c0] sm:$0xff] }
  0x71   :  { %1886 = vmatprep.mubr.f32.mxu1 %v177_v40  ;;  %1339 = vmatmul.mubr.f32.gmra.mrb[22].mxu0 %v176_v42  ;;  %v4445_v40 = vpack.c.bf16 %v704_v31, %v696_v30  ;;  %v770_v25 = vld [vmem:[%s10238_s1 + $0x1250] sm:$0xff]  ;;  %v123_v30 = vld [vmem:[%s10239_s0 + $0x118] sm:$0xff]  ;;  %v824_v13 = vld [vmem:[%s10238_s1 + $0x1400] sm:$0xff] }
  0x72   :  { %4426 = vmatpush1.bf16.msra.mxu0 %v4425_v41  ;;  %1887 = vmatmul.mubr.f32.gmra.mrb[22].mxu1 %v176_v42  ;;  %v4701_v41 = vpack.c.bf16 %v706_v34, %v698_v32  ;;  %v4447_v42 = vpack.c.bf16 %v721_v36, %v713_v35  ;;  %v122_v32 = vld [vmem:[%s10239_s0 + $0x110] sm:$0xff]  ;;  %v776_v35 = vld [vmem:[%s10238_s1 + $0x1280] sm:$0xff] }
  0x73   :  { %4682 = vmatpush1.bf16.msra.mxu1 %v4681_v43  ;;  %4428 = vmatprep.subr.bf16.mxu0 %v4427_v44  ;;  %v712_v43 = vld [vmem:[%s10238_s1 + $0x1080] sm:$0xff]  ;;  %v810_v1 = vld [vmem:[%s10238_s1 + $0x1390] sm:$0xff] }
  0x74   :  { %4684 = vmatprep.subr.bf16.mxu1 %v4683_v48  ;;  %1409 = vmatprep.mubr.f32.mxu0 %v91_v54  ;;  %v720_v44 = vld [vmem:[%s10238_s1 + $0x10c0] sm:$0xff]  ;;  %v729_v48 = vld [vmem:[%s10238_s1 + $0x1108] sm:$0xff] }
  0x75   :  { %1957 = vmatprep.mubr.f32.mxu1 %v91_v54  ;;  %v4449_v53 = vpack.c.bf16 %v720_v44, %v712_v43  ;;  %v98_v54 = vld [vmem:[%s10239_s0 + $0x50] sm:$0xff]  ;;  %v784_v36 = vld [vmem:[%s10238_s1 + $0x12c0] sm:$0xff]  ;;  %v803_v43 = vld [vmem:[%s10238_s1 + $0x1358] sm:$0xff] }
  0x76   :  { %4430 = vmatpush1.bf16.msra.mxu0 %v4429_v55  ;;  %v4705_v55 = vpack.c.bf16 %v722_v47, %v714_v45  ;;  %v131_v44 = vld [vmem:[%s10239_s0 + $0x158] sm:$0xff]  ;;  %v4465_v45 = vpack.c.bf16 %v784_v36, %v776_v35 }
  0x77   :  { %4686 = vmatpush1.bf16.msra.mxu1 %v4685_v56  ;;  %4432 = vmatprep.subr.bf16.mxu0 %v4431_v57  ;;  %v4451_v56 = vpack.c.bf16 %v737_v49, %v729_v48  ;;  %v728_v57 = vld [vmem:[%s10238_s1 + $0x1100] sm:$0xff]  ;;  %v867_v35 = vld [vmem:[%s10238_s1 + $0x1558] sm:$0xff] }
  0x78   :  { %4688 = vmatprep.subr.bf16.mxu1 %v4687_v61  ;;  %v738_v61 = vld [vmem:[%s10238_s1 + $0x1150] sm:$0xff]  ;;  %v792_v49 = vld [vmem:[%s10238_s1 + $0x1300] sm:$0xff]  ;;  %v163_v36 = vld [vmem:[%s10239_s0 + $0x258] sm:$0xff] }
  0x7a   :  { %4434 = vmatpush1.bf16.msra.mxu0 %v4433_v3  ;;  %v4453_v3 = vpack.c.bf16 %v736_v58, %v728_v57  ;;  %v819_v57 = vld [vmem:[%s10238_s1 + $0x13d8] sm:$0xff] }
  0x7b   :  { %4690 = vmatpush1.bf16.msra.mxu1 %v4689_v4  ;;  %4436 = vmatprep.subr.bf16.mxu0 %v4435_v5  ;;  %v106_v4 = vld [vmem:[%s10239_s0 + $0x90] sm:$0xff]  ;;  %v4709_v5 = vpack.c.bf16 %v738_v61, %v730_v59  ;;  %v139_v58 = vld [vmem:[%s10239_s0 + $0x198] sm:$0xff]  ;;  %v4469_v59 = vpack.c.bf16 %v800_v50, %v792_v49 }
  0x7c   :  { %4692 = vmatprep.subr.bf16.mxu1 %v4691_v9  ;;  %v746_v9 = vld [vmem:[%s10238_s1 + $0x1190] sm:$0xff]  ;;  %v883_v49 = vld [vmem:[%s10238_s1 + $0x15d8] sm:$0xff] }
  0x7d   :  { %v4713_v19 = vpack.c.bf16 %v754_v11, %v746_v9  ;;  %v4473_v9 = vpack.c.bf16 %v816_v0, %v808_v63  ;;  %v171_v50 = vld [vmem:[%s10239_s0 + $0x298] sm:$0xff] }
  0x7e   :  { %4438 = vmatpush1.bf16.msra.mxu0 %v4437_v15  ;;  %v771_v15 = vld [vmem:[%s10238_s1 + $0x1258] sm:$0xff] }
  0x7f   :  { %4694 = vmatpush1.bf16.msra.mxu1 %v4693_v16  ;;  %4440 = vmatprep.subr.bf16.mxu0 %v4439_v17  ;;  %v115_v16 = vld [vmem:[%s10239_s0 + $0xd8] sm:$0xff]  ;;  %v4457_v17 = vpack.c.bf16 %v752_v8, %v744_v7  ;;  %v4715_v24 = vpack.c.bf16 %v771_v15, %v763_v14  ;;  %v832_v14 = vld [vmem:[%s10238_s1 + $0x1440] sm:$0xff]  ;;  %v826_v15 = vld [vmem:[%s10238_s1 + $0x1410] sm:$0xff] }
  0x80   :  { %4696 = vmatprep.subr.bf16.mxu1 %v4695_v21  ;;  %v760_v21 = vld [vmem:[%s10238_s1 + $0x1200] sm:$0xff]  ;;  %v835_v7 = vld [vmem:[%s10238_s1 + $0x1458] sm:$0xff] }
  0x81   :  { %v4461_v31 = vpack.c.bf16 %v768_v22, %v760_v21  ;;  %v147_v8 = vld [vmem:[%s10239_s0 + $0x1d8] sm:$0xff] }
  0x82   :  { %4442 = vmatpush1.bf16.msra.mxu0 %v4441_v27  ;;  %v785_v27 = vld [vmem:[%s10238_s1 + $0x12c8] sm:$0xff]  ;;  %v851_v21 = vld [vmem:[%s10238_s1 + $0x14d8] sm:$0xff] }
  0x83   :  { %4698 = vmatpush1.bf16.msra.mxu1 %v4697_v28  ;;  %4444 = vmatprep.subr.bf16.mxu0 %v4443_v29  ;;  %v779_v28 = vld [vmem:[%s10238_s1 + $0x1298] sm:$0xff]  ;;  %v4463_v34 = vpack.c.bf16 %v785_v27, %v777_v26  ;;  %v840_v27 = vld [vmem:[%s10238_s1 + $0x1480] sm:$0xff] }
  0x84   :  { %4700 = vmatprep.subr.bf16.mxu1 %v4699_v33  ;;  %v787_v29 = vld [vmem:[%s10238_s1 + $0x12d8] sm:$0xff]  ;;  %v4717_v33 = vpack.c.bf16 %v770_v25, %v762_v23  ;;  %v4477_v23 = vpack.c.bf16 %v832_v14, %v824_v13  ;;  %v93_v14 = vld [vmem:[%s10239_s0 + $0x28] sm:$0xff] }
  0x85   :  { %1410 = vmatmul.mubr.f32.vlgmr.msra.gmra.mrb[0].mxu0 %v90_v39  ;;  %v4719_v38 = vpack.c.bf16 %v787_v29, %v779_v28  ;;  %v155_v22 = vld [vmem:[%s10239_s0 + $0x218] sm:$0xff]  ;;  %v848_v28 = vld [vmem:[%s10238_s1 + $0x14c0] sm:$0xff]  ;;  %v842_v29 = vld [vmem:[%s10238_s1 + $0x1490] sm:$0xff] }
  0x86   :  { %4446 = vmatpush1.bf16.msra.mxu0 %v4445_v40  ;;  %1958 = vmatmul.mubr.f32.vlgmr.msra.gmra.mrb[0].mxu1 %v90_v39  ;;  %v786_v39 = vld [vmem:[%s10238_s1 + $0x12d0] sm:$0xff]  ;;  %v793_v40 = vld [vmem:[%s10238_s1 + $0x1308] sm:$0xff]  ;;  %v899_v63 = vld [vmem:[%s10238_s1 + $0x1658] sm:$0xff] }
  0x87   :  { %4702 = vmatpush1.bf16.msra.mxu1 %v4701_v41  ;;  %4448 = vmatprep.subr.bf16.mxu0 %v4447_v42  ;;  %v801_v41 = vld [vmem:[%s10238_s1 + $0x1348] sm:$0xff]  ;;  %v795_v42 = vld [vmem:[%s10238_s1 + $0x1318] sm:$0xff]  ;;  %v4721_v47 = vpack.c.bf16 %v786_v39, %v778_v37  ;;  %v4481_v37 = vpack.c.bf16 %v848_v28, %v840_v27 }
  0x88   :  { %4704 = vmatprep.subr.bf16.mxu1 %v4703_v46  ;;  %1415 = vmatprep.mubr.f32.mxu0 %v99_v52  ;;  %v130_v46 = vld [vmem:[%s10239_s0 + $0x150] sm:$0xff]  ;;  %v4467_v48 = vpack.c.bf16 %v801_v41, %v793_v40  ;;  %v856_v41 = vld [vmem:[%s10238_s1 + $0x1500] sm:$0xff]  ;;  %v179_v0 = vld [vmem:[%s10239_s0 + $0x2d8] sm:$0xff] }
  0x89   :  { %1963 = vmatprep.mubr.f32.mxu1 %v99_v52  ;;  %1416 = vmatmul.mubr.f32.gmra.mrb[2].mxu0 %v98_v54  ;;  %v4723_v52 = vpack.c.bf16 %v803_v43, %v795_v42  ;;  %v864_v42 = vld [vmem:[%s10238_s1 + $0x1540] sm:$0xff]  ;;  %v858_v43 = vld [vmem:[%s10238_s1 + $0x1510] sm:$0xff]  ;;  %v915_v13 = vld [vmem:[%s10238_s1 + $0x16d8] sm:$0xff] }
  0x8a   :  { %4450 = vmatpush1.bf16.msra.mxu0 %v4449_v53  ;;  %1964 = vmatmul.mubr.f32.gmra.mrb[2].mxu1 %v98_v54  ;;  %v802_v53 = vld [vmem:[%s10238_s1 + $0x1350] sm:$0xff]  ;;  %v809_v54 = vld [vmem:[%s10238_s1 + $0x1388] sm:$0xff] }
  0x8b   :  { %4706 = vmatpush1.bf16.msra.mxu1 %v4705_v55  ;;  %4452 = vmatprep.subr.bf16.mxu0 %v4451_v56  ;;  %v817_v55 = vld [vmem:[%s10238_s1 + $0x13c8] sm:$0xff]  ;;  %v811_v56 = vld [vmem:[%s10238_s1 + $0x1398] sm:$0xff]  ;;  %v4725_v61 = vpack.c.bf16 %v802_v53, %v794_v51  ;;  %v4485_v51 = vpack.c.bf16 %v864_v42, %v856_v41  ;;  %v936_v42 = vld [vmem:[%s10238_s1 + $0x1780] sm:$0xff] }
  0x8c   :  { %4708 = vmatprep.subr.bf16.mxu1 %v4707_v60  ;;  %1421 = vmatprep.mubr.f32.mxu0 %v107_v2  ;;  %v138_v60 = vld [vmem:[%s10239_s0 + $0x190] sm:$0xff]  ;;  %v4471_v62 = vpack.c.bf16 %v817_v55, %v809_v54  ;;  %v872_v55 = vld [vmem:[%s10238_s1 + $0x1580] sm:$0xff] }
  0x8d   :  { %1969 = vmatprep.mubr.f32.mxu1 %v107_v2  ;;  %1422 = vmatmul.mubr.f32.gmra.mrb[4].mxu0 %v106_v4  ;;  %v4727_v2 = vpack.c.bf16 %v819_v57, %v811_v56  ;;  %v880_v56 = vld [vmem:[%s10238_s1 + $0x15c0] sm:$0xff]  ;;  %v874_v57 = vld [vmem:[%s10238_s1 + $0x1590] sm:$0xff] }
  0x8e   :  { %4454 = vmatpush1.bf16.msra.mxu0 %v4453_v3  ;;  %1970 = vmatmul.mubr.f32.gmra.mrb[4].mxu1 %v106_v4  ;;  %v818_v3 = vld [vmem:[%s10238_s1 + $0x13d0] sm:$0xff]  ;;  %v825_v4 = vld [vmem:[%s10238_s1 + $0x1408] sm:$0xff] }
  0x8f   :  { %4710 = vmatpush1.bf16.msra.mxu1 %v4709_v5  ;;  %4456 = vmatprep.subr.bf16.mxu0 %v4455_v6  ;;  %v833_v5 = vld [vmem:[%s10238_s1 + $0x1448] sm:$0xff]  ;;  %v827_v6 = vld [vmem:[%s10238_s1 + $0x1418] sm:$0xff]  ;;  %v4729_v11 = vpack.c.bf16 %v818_v3, %v810_v1  ;;  %v4489_v1 = vpack.c.bf16 %v880_v56, %v872_v55  ;;  %v960_v55 = vld [vmem:[%s10238_s1 + $0x1840] sm:$0xff] }
  0x90   :  { %4712 = vmatprep.subr.bf16.mxu1 %v4711_v10  ;;  %1427 = vmatprep.mubr.f32.mxu0 %v115_v16  ;;  %v146_v10 = vld [vmem:[%s10239_s0 + $0x1d0] sm:$0xff]  ;;  %v4475_v12 = vpack.c.bf16 %v833_v5, %v825_v4  ;;  %v888_v5 = vld [vmem:[%s10238_s1 + $0x1600] sm:$0xff] }
  0x91   :  { %1975 = vmatprep.mubr.f32.mxu1 %v115_v16  ;;  %1428 = vmatmul.mubr.f32.gmra.mrb[6].mxu0 %v114_v18  ;;  %v4731_v16 = vpack.c.bf16 %v835_v7, %v827_v6  ;;  %v896_v6 = vld [vmem:[%s10238_s1 + $0x1640] sm:$0xff]  ;;  %v890_v7 = vld [vmem:[%s10238_s1 + $0x1610] sm:$0xff] }
  0x92   :  { %4458 = vmatpush1.bf16.msra.mxu0 %v4457_v17  ;;  %1976 = vmatmul.mubr.f32.gmra.mrb[6].mxu1 %v114_v18  ;;  %v834_v17 = vld [vmem:[%s10238_s1 + $0x1450] sm:$0xff]  ;;  %v841_v18 = vld [vmem:[%s10238_s1 + $0x1488] sm:$0xff] }
  0x93   :  { %4714 = vmatpush1.bf16.msra.mxu1 %v4713_v19  ;;  %4460 = vmatprep.subr.bf16.mxu0 %v4459_v20  ;;  %v849_v19 = vld [vmem:[%s10238_s1 + $0x14c8] sm:$0xff]  ;;  %v843_v20 = vld [vmem:[%s10238_s1 + $0x1498] sm:$0xff]  ;;  %v4733_v25 = vpack.c.bf16 %v834_v17, %v826_v15  ;;  %v4493_v15 = vpack.c.bf16 %v896_v6, %v888_v5  ;;  %v954_v56 = vld [vmem:[%s10238_s1 + $0x1810] sm:$0xff] }
  0x94   :  { %4716 = vmatprep.subr.bf16.mxu1 %v4715_v24  ;;  %1433 = vmatprep.mubr.f32.mxu0 %v123_v30  ;;  %v154_v24 = vld [vmem:[%s10239_s0 + $0x210] sm:$0xff]  ;;  %v4479_v26 = vpack.c.bf16 %v849_v19, %v841_v18  ;;  %v904_v18 = vld [vmem:[%s10238_s1 + $0x1680] sm:$0xff] }
  0x95   :  { %1981 = vmatprep.mubr.f32.mxu1 %v123_v30  ;;  %1434 = vmatmul.mubr.f32.gmra.mrb[8].mxu0 %v122_v32  ;;  %v4735_v30 = vpack.c.bf16 %v851_v21, %v843_v20  ;;  %v912_v19 = vld [vmem:[%s10238_s1 + $0x16c0] sm:$0xff]  ;;  %v906_v20 = vld [vmem:[%s10238_s1 + $0x1690] sm:$0xff] }
  0x96   :  { %4462 = vmatpush1.bf16.msra.mxu0 %v4461_v31  ;;  %1982 = vmatmul.mubr.f32.gmra.mrb[8].mxu1 %v122_v32  ;;  %v850_v31 = vld [vmem:[%s10238_s1 + $0x14d0] sm:$0xff]  ;;  %v857_v32 = vld [vmem:[%s10238_s1 + $0x1508] sm:$0xff]  ;;  %v4497_v27 = vpack.c.bf16 %v912_v19, %v904_v18  ;;  %v992_v18 = vld [vmem:[%s10238_s1 + $0x1940] sm:$0xff] }
  0x97   :  { %4718 = vmatpush1.bf16.msra.mxu1 %v4717_v33  ;;  %4464 = vmatprep.subr.bf16.mxu0 %v4463_v34  ;;  %v865_v33 = vld [vmem:[%s10238_s1 + $0x1548] sm:$0xff]  ;;  %v859_v34 = vld [vmem:[%s10238_s1 + $0x1518] sm:$0xff]  ;;  %v4737_v39 = vpack.c.bf16 %v850_v31, %v842_v29  ;;  %v928_v31 = vld [vmem:[%s10238_s1 + $0x1740] sm:$0xff] }
  0x98   :  { %4720 = vmatprep.subr.bf16.mxu1 %v4719_v38  ;;  %1439 = vmatprep.mubr.f32.mxu0 %v131_v44  ;;  %v162_v38 = vld [vmem:[%s10239_s0 + $0x250] sm:$0xff]  ;;  %v4483_v40 = vpack.c.bf16 %v865_v33, %v857_v32 }
  0x99   :  { %1987 = vmatprep.mubr.f32.mxu1 %v131_v44  ;;  %1440 = vmatmul.mubr.f32.gmra.mrb[10].mxu0 %v130_v46  ;;  %v4739_v44 = vpack.c.bf16 %v867_v35, %v859_v34  ;;  %v922_v32 = vld [vmem:[%s10238_s1 + $0x1710] sm:$0xff]  ;;  %v937_v35 = vld [vmem:[%s10238_s1 + $0x1788] sm:$0xff] }
  0x9a   :  { %4466 = vmatpush1.bf16.msra.mxu0 %v4465_v45  ;;  %1988 = vmatmul.mubr.f32.gmra.mrb[10].mxu1 %v130_v46  ;;  %v866_v45 = vld [vmem:[%s10238_s1 + $0x1550] sm:$0xff]  ;;  %v873_v46 = vld [vmem:[%s10238_s1 + $0x1588] sm:$0xff] }
  0x9b   :  { %4722 = vmatpush1.bf16.msra.mxu1 %v4721_v47  ;;  %4468 = vmatprep.subr.bf16.mxu0 %v4467_v48  ;;  %v881_v47 = vld [vmem:[%s10238_s1 + $0x15c8] sm:$0xff]  ;;  %v875_v48 = vld [vmem:[%s10238_s1 + $0x1598] sm:$0xff]  ;;  %v4741_v53 = vpack.c.bf16 %v866_v45, %v858_v43  ;;  %v930_v34 = vld [vmem:[%s10238_s1 + $0x1750] sm:$0xff] }
  0x9c   :  { %4724 = vmatprep.subr.bf16.mxu1 %v4723_v52  ;;  %1445 = vmatprep.mubr.f32.mxu0 %v139_v58  ;;  %v170_v52 = vld [vmem:[%s10239_s0 + $0x290] sm:$0xff]  ;;  %v4487_v54 = vpack.c.bf16 %v881_v47, %v873_v46  ;;  %v944_v43 = vld [vmem:[%s10238_s1 + $0x17c0] sm:$0xff]  ;;  %v953_v47 = vld [vmem:[%s10238_s1 + $0x1808] sm:$0xff] }
  0x9d   :  { %1993 = vmatprep.mubr.f32.mxu1 %v139_v58  ;;  %1446 = vmatmul.mubr.f32.gmra.mrb[12].mxu0 %v138_v60  ;;  %v4743_v58 = vpack.c.bf16 %v883_v49, %v875_v48  ;;  %v946_v46 = vld [vmem:[%s10238_s1 + $0x17d0] sm:$0xff]  ;;  %v961_v48 = vld [vmem:[%s10238_s1 + $0x1848] sm:$0xff]  ;;  %v955_v49 = vld [vmem:[%s10238_s1 + $0x1818] sm:$0xff] }
  0x9e   :  { %4470 = vmatpush1.bf16.msra.mxu0 %v4469_v59  ;;  %1994 = vmatmul.mubr.f32.gmra.mrb[12].mxu1 %v138_v60  ;;  %v882_v59 = vld [vmem:[%s10238_s1 + $0x15d0] sm:$0xff]  ;;  %v889_v60 = vld [vmem:[%s10238_s1 + $0x1608] sm:$0xff] }
  0x9f   :  { %4726 = vmatpush1.bf16.msra.mxu1 %v4725_v61  ;;  %4472 = vmatprep.subr.bf16.mxu0 %v4471_v62  ;;  %v897_v61 = vld [vmem:[%s10238_s1 + $0x1648] sm:$0xff]  ;;  %v891_v62 = vld [vmem:[%s10238_s1 + $0x1618] sm:$0xff]  ;;  %v4745_v3 = vpack.c.bf16 %v882_v59, %v874_v57  ;;  %v970_v5 = vld [vmem:[%s10238_s1 + $0x1890] sm:$0xff] }
  0xa0   :  { %4728 = vmatprep.subr.bf16.mxu1 %v4727_v2  ;;  %1451 = vmatprep.mubr.f32.mxu0 %v147_v8  ;;  %v178_v2 = vld [vmem:[%s10239_s0 + $0x2d0] sm:$0xff]  ;;  %v4491_v4 = vpack.c.bf16 %v897_v61, %v889_v60  ;;  %v969_v59 = vld [vmem:[%s10238_s1 + $0x1888] sm:$0xff]  ;;  %v971_v61 = vld [vmem:[%s10238_s1 + $0x1898] sm:$0xff] }
  0xa1   :  { %1999 = vmatprep.mubr.f32.mxu1 %v147_v8  ;;  %1452 = vmatmul.mubr.f32.gmra.mrb[14].mxu0 %v146_v10  ;;  %v4747_v8 = vpack.c.bf16 %v899_v63, %v891_v62  ;;  %v977_v60 = vld [vmem:[%s10238_s1 + $0x18c8] sm:$0xff]  ;;  %v979_v62 = vld [vmem:[%s10238_s1 + $0x18d8] sm:$0xff]  ;;  %v92_v63 = vld [vmem:[%s10239_s0 + $0x20] sm:$0xff] }
  0xa2   :  { %4474 = vmatpush1.bf16.msra.mxu0 %v4473_v9  ;;  %2000 = vmatmul.mubr.f32.gmra.mrb[14].mxu1 %v146_v10  ;;  %v898_v9 = vld [vmem:[%s10238_s1 + $0x1650] sm:$0xff]  ;;  %v905_v10 = vld [vmem:[%s10238_s1 + $0x1688] sm:$0xff]  ;;  %v4767_v6 = vpack.c.bf16 %v979_v62, %v971_v61 }
  0xa3   :  { %4730 = vmatpush1.bf16.msra.mxu1 %v4729_v11  ;;  %4476 = vmatprep.subr.bf16.mxu0 %v4475_v12  ;;  %v913_v11 = vld [vmem:[%s10238_s1 + $0x16c8] sm:$0xff]  ;;  %v907_v12 = vld [vmem:[%s10238_s1 + $0x1698] sm:$0xff]  ;;  %v986_v19 = vld [vmem:[%s10238_s1 + $0x1910] sm:$0xff] }
  0xa4   :  { %4732 = vmatprep.subr.bf16.mxu1 %v4731_v16  ;;  %1457 = vmatprep.mubr.f32.mxu0 %v155_v22  ;;  %v4749_v16 = vpack.c.bf16 %v898_v9, %v890_v7  ;;  %v4495_v17 = vpack.c.bf16 %v913_v11, %v905_v10  ;;  %v4751_v21 = vpack.c.bf16 %v915_v13, %v907_v12  ;;  %v978_v7 = vld [vmem:[%s10238_s1 + $0x18d0] sm:$0xff]  ;;  %v993_v9 = vld [vmem:[%s10238_s1 + $0x1948] sm:$0xff]  ;;  %v987_v10 = vld [vmem:[%s10238_s1 + $0x1918] sm:$0xff] }
  0xa5   :  { %2005 = vmatprep.mubr.f32.mxu1 %v155_v22  ;;  %1458 = vmatmul.mubr.f32.gmra.mrb[16].mxu0 %v154_v24  ;;  %v914_v22 = vld [vmem:[%s10238_s1 + $0x16d0] sm:$0xff]  ;;  %v995_v11 = vld [vmem:[%s10238_s1 + $0x1958] sm:$0xff]  ;;  %v101_v12 = vld [vmem:[%s10239_s0 + $0x68] sm:$0xff] }
  0xa6   :  { %4478 = vmatpush1.bf16.msra.mxu0 %v4477_v23  ;;  %2006 = vmatmul.mubr.f32.gmra.mrb[16].mxu1 %v154_v24  ;;  %v921_v23 = vld [vmem:[%s10238_s1 + $0x1708] sm:$0xff]  ;;  %v4753_v28 = vpack.c.bf16 %v914_v22, %v906_v20  ;;  %v4771_v20 = vpack.c.bf16 %v995_v11, %v987_v10  ;;  %v1034_v61 = vld [vmem:[%s10238_s1 + $0x1a90] sm:$0xff]  ;;  %v1056_v10 = vld [vmem:[%s10238_s1 + $0x1b40] sm:$0xff] }
  0xa7   :  { %4734 = vmatpush1.bf16.msra.mxu1 %v4733_v25  ;;  %4480 = vmatprep.subr.bf16.mxu0 %v4479_v26  ;;  %v929_v24 = vld [vmem:[%s10238_s1 + $0x1748] sm:$0xff]  ;;  %v923_v25 = vld [vmem:[%s10238_s1 + $0x1718] sm:$0xff]  ;;  %v1050_v11 = vld [vmem:[%s10238_s1 + $0x1b10] sm:$0xff] }
  0xa8   :  { %4736 = vmatprep.subr.bf16.mxu1 %v4735_v30  ;;  %1463 = vmatprep.mubr.f32.mxu0 %v163_v36  ;;  %v931_v26 = vld [vmem:[%s10238_s1 + $0x1758] sm:$0xff]  ;;  %v4499_v29 = vpack.c.bf16 %v929_v24, %v921_v23  ;;  %v920_v30 = vld [vmem:[%s10238_s1 + $0x1700] sm:$0xff]  ;;  %v1001_v22 = vld [vmem:[%s10238_s1 + $0x1988] sm:$0xff] }
  0xa9   :  { %2011 = vmatprep.mubr.f32.mxu1 %v163_v36  ;;  %1464 = vmatmul.mubr.f32.gmra.mrb[18].mxu0 %v162_v38  ;;  %v4755_v33 = vpack.c.bf16 %v931_v26, %v923_v25  ;;  %v945_v36 = vld [vmem:[%s10238_s1 + $0x17c8] sm:$0xff]  ;;  %v1003_v24 = vld [vmem:[%s10238_s1 + $0x1998] sm:$0xff] }
  0xaa   :  { %4482 = vmatpush1.bf16.msra.mxu0 %v4481_v37  ;;  %2012 = vmatmul.mubr.f32.gmra.mrb[18].mxu1 %v162_v38  ;;  %v939_v37 = vld [vmem:[%s10238_s1 + $0x1798] sm:$0xff]  ;;  %v4503_v41 = vpack.c.bf16 %v945_v36, %v937_v35  ;;  %v1009_v23 = vld [vmem:[%s10238_s1 + $0x19c8] sm:$0xff]  ;;  %v1010_v35 = vld [vmem:[%s10238_s1 + $0x19d0] sm:$0xff] }
  0xab   :  { %4738 = vmatpush1.bf16.msra.mxu1 %v4737_v39  ;;  %4484 = vmatprep.subr.bf16.mxu0 %v4483_v40  ;;  %v947_v38 = vld [vmem:[%s10238_s1 + $0x17d8] sm:$0xff]  ;;  %v4501_v39 = vpack.c.bf16 %v928_v31, %v920_v30  ;;  %v4757_v40 = vpack.c.bf16 %v930_v34, %v922_v32  ;;  %v109_v26 = vld [vmem:[%s10239_s0 + $0xa8] sm:$0xff]  ;;  %v4519_v30 = vpack.c.bf16 %v1009_v23, %v1001_v22  ;;  %v1000_v31 = vld [vmem:[%s10238_s1 + $0x1980] sm:$0xff] }
  0xac   :  { %4740 = vmatprep.subr.bf16.mxu1 %v4739_v44  ;;  %1469 = vmatprep.mubr.f32.mxu0 %v171_v50  ;;  %v938_v44 = vld [vmem:[%s10238_s1 + $0x1790] sm:$0xff]  ;;  %v4759_v45 = vpack.c.bf16 %v947_v38, %v939_v37  ;;  %v1011_v25 = vld [vmem:[%s10238_s1 + $0x19d8] sm:$0xff]  ;;  %v1008_v32 = vld [vmem:[%s10238_s1 + $0x19c0] sm:$0xff] }
  0xad   :  { %2017 = vmatprep.mubr.f32.mxu1 %v171_v50  ;;  %1470 = vmatmul.mubr.f32.gmra.mrb[20].mxu0 %v170_v52  ;;  %v963_v50 = vld [vmem:[%s10238_s1 + $0x1858] sm:$0xff]  ;;  %v4775_v34 = vpack.c.bf16 %v1011_v25, %v1003_v24  ;;  %v1017_v36 = vld [vmem:[%s10238_s1 + $0x1a08] sm:$0xff]  ;;  %v1064_v23 = vld [vmem:[%s10238_s1 + $0x1b80] sm:$0xff] }
  0xae   :  { %4486 = vmatpush1.bf16.msra.mxu0 %v4485_v51  ;;  %2018 = vmatmul.mubr.f32.gmra.mrb[20].mxu1 %v170_v52  ;;  %v4505_v51 = vpack.c.bf16 %v944_v43, %v936_v42  ;;  %v4761_v52 = vpack.c.bf16 %v946_v46, %v938_v44  ;;  %v4763_v57 = vpack.c.bf16 %v963_v50, %v955_v49  ;;  %v1025_v37 = vld [vmem:[%s10238_s1 + $0x1a48] sm:$0xff]  ;;  %v1019_v38 = vld [vmem:[%s10238_s1 + $0x1a18] sm:$0xff]  ;;  %v116_v42 = vld [vmem:[%s10239_s0 + $0xe0] sm:$0xff] }
  0xaf   :  { %4742 = vmatpush1.bf16.msra.mxu1 %v4741_v53  ;;  %4488 = vmatprep.subr.bf16.mxu0 %v4487_v54  ;;  %v4507_v53 = vpack.c.bf16 %v961_v48, %v953_v47  ;;  %v952_v54 = vld [vmem:[%s10238_s1 + $0x1800] sm:$0xff]  ;;  %v4523_v44 = vpack.c.bf16 %v1025_v37, %v1017_v36  ;;  %v1018_v47 = vld [vmem:[%s10238_s1 + $0x1a10] sm:$0xff]  ;;  %v1033_v50 = vld [vmem:[%s10238_s1 + $0x1a88] sm:$0xff] }
  0xb0   :  { %4744 = vmatprep.subr.bf16.mxu1 %v4743_v58  ;;  %1475 = vmatprep.mubr.f32.mxu0 %v179_v0  ;;  %v962_v58 = vld [vmem:[%s10238_s1 + $0x1850] sm:$0xff]  ;;  %v1024_v46 = vld [vmem:[%s10238_s1 + $0x1a40] sm:$0xff] }
  0xb1   :  { %2023 = vmatprep.mubr.f32.mxu1 %v179_v0  ;;  %1476 = vmatmul.mubr.f32.gmra.mrb[22].mxu0 %v178_v2  ;;  %v4509_v0 = vpack.c.bf16 %v960_v55, %v952_v54  ;;  %v1026_v49 = vld [vmem:[%s10238_s1 + $0x1a50] sm:$0xff]  ;;  %v125_v54 = vld [vmem:[%s10239_s0 + $0x128] sm:$0xff]  ;;  %v1072_v24 = vld [vmem:[%s10238_s1 + $0x1bc0] sm:$0xff] }
  0xb2   :  { %4490 = vmatpush1.bf16.msra.mxu0 %v4489_v1  ;;  %2024 = vmatmul.mubr.f32.gmra.mrb[22].mxu1 %v178_v2  ;;  %v4765_v1 = vpack.c.bf16 %v962_v58, %v954_v56  ;;  %v4511_v2 = vpack.c.bf16 %v977_v60, %v969_v59  ;;  %v124_v56 = vld [vmem:[%s10239_s0 + $0x120] sm:$0xff]  ;;  %v1066_v25 = vld [vmem:[%s10238_s1 + $0x1b90] sm:$0xff] }
  0xb3   :  { %4746 = vmatpush1.bf16.msra.mxu1 %v4745_v3  ;;  %4492 = vmatprep.subr.bf16.mxu0 %v4491_v4  ;;  %v968_v3 = vld [vmem:[%s10238_s1 + $0x1880] sm:$0xff] }
  0xb4   :  { %4748 = vmatprep.subr.bf16.mxu1 %v4747_v8  ;;  %1546 = vmatprep.mubr.f32.mxu0 %v93_v14  ;;  %v976_v4 = vld [vmem:[%s10238_s1 + $0x18c0] sm:$0xff]  ;;  %v985_v8 = vld [vmem:[%s10238_s1 + $0x1908] sm:$0xff] }
  0xb5   :  { %2094 = vmatprep.mubr.f32.mxu1 %v93_v14  ;;  %v4513_v13 = vpack.c.bf16 %v976_v4, %v968_v3  ;;  %v100_v14 = vld [vmem:[%s10239_s0 + $0x60] sm:$0xff]  ;;  %v1059_v3 = vld [vmem:[%s10238_s1 + $0x1b58] sm:$0xff]  ;;  %v133_v4 = vld [vmem:[%s10239_s0 + $0x168] sm:$0xff] }
  0xb6   :  { %4494 = vmatpush1.bf16.msra.mxu0 %v4493_v15  ;;  %v4769_v15 = vpack.c.bf16 %v978_v7, %v970_v5  ;;  %v1032_v59 = vld [vmem:[%s10238_s1 + $0x1a80] sm:$0xff] }
  0xb7   :  { %4750 = vmatpush1.bf16.msra.mxu1 %v4749_v16  ;;  %4496 = vmatprep.subr.bf16.mxu0 %v4495_v17  ;;  %v4515_v16 = vpack.c.bf16 %v993_v9, %v985_v8  ;;  %v984_v17 = vld [vmem:[%s10238_s1 + $0x1900] sm:$0xff] }
  0xb8   :  { %4752 = vmatprep.subr.bf16.mxu1 %v4751_v21  ;;  %v994_v21 = vld [vmem:[%s10238_s1 + $0x1950] sm:$0xff]  ;;  %v1040_v60 = vld [vmem:[%s10238_s1 + $0x1ac0] sm:$0xff] }
  0xb9   :  { %v4529_v5 = vpack.c.bf16 %v1040_v60, %v1032_v59  ;;  %v1048_v9 = vld [vmem:[%s10238_s1 + $0x1b00] sm:$0xff]  ;;  %v1123_v59 = vld [vmem:[%s10238_s1 + $0x1d58] sm:$0xff]  ;;  %v165_v60 = vld [vmem:[%s10239_s0 + $0x268] sm:$0xff] }
  0xba   :  { %4498 = vmatpush1.bf16.msra.mxu0 %v4497_v27  ;;  %v4517_v27 = vpack.c.bf16 %v992_v18, %v984_v17  ;;  %v1075_v17 = vld [vmem:[%s10238_s1 + $0x1bd8] sm:$0xff]  ;;  %v141_v18 = vld [vmem:[%s10239_s0 + $0x1a8] sm:$0xff]  ;;  %v1080_v37 = vld [vmem:[%s10238_s1 + $0x1c00] sm:$0xff] }
  0xbb   :  { %4754 = vmatpush1.bf16.msra.mxu1 %v4753_v28  ;;  %4500 = vmatprep.subr.bf16.mxu0 %v4499_v29  ;;  %v108_v28 = vld [vmem:[%s10239_s0 + $0xa0] sm:$0xff]  ;;  %v4773_v29 = vpack.c.bf16 %v994_v21, %v986_v19  ;;  %v4533_v19 = vpack.c.bf16 %v1056_v10, %v1048_v9  ;;  %v1139_v9 = vld [vmem:[%s10238_s1 + $0x1dd8] sm:$0xff]  ;;  %v173_v10 = vld [vmem:[%s10239_s0 + $0x2a8] sm:$0xff] }
  0xbc   :  { %4756 = vmatprep.subr.bf16.mxu1 %v4755_v33  ;;  %v1002_v33 = vld [vmem:[%s10238_s1 + $0x1990] sm:$0xff] }
  0xbd   :  { %v4777_v43 = vpack.c.bf16 %v1010_v35, %v1002_v33  ;;  %v4537_v33 = vpack.c.bf16 %v1072_v24, %v1064_v23  ;;  %v1155_v23 = vld [vmem:[%s10238_s1 + $0x1e58] sm:$0xff]  ;;  %v181_v24 = vld [vmem:[%s10239_s0 + $0x2e8] sm:$0xff] }
  0xbe   :  { %4502 = vmatpush1.bf16.msra.mxu0 %v4501_v39  ;;  %v1027_v39 = vld [vmem:[%s10238_s1 + $0x1a58] sm:$0xff] }
  0xbf   :  { %4758 = vmatpush1.bf16.msra.mxu1 %v4757_v40  ;;  %4504 = vmatprep.subr.bf16.mxu0 %v4503_v41  ;;  %v117_v40 = vld [vmem:[%s10239_s0 + $0xe8] sm:$0xff]  ;;  %v4521_v41 = vpack.c.bf16 %v1008_v32, %v1000_v31  ;;  %v4779_v48 = vpack.c.bf16 %v1027_v39, %v1019_v38  ;;  %v1091_v31 = vld [vmem:[%s10238_s1 + $0x1c58] sm:$0xff]  ;;  %v1088_v38 = vld [vmem:[%s10238_s1 + $0x1c40] sm:$0xff] }
  0xc0   :  { %4760 = vmatprep.subr.bf16.mxu1 %v4759_v45  ;;  %v1016_v45 = vld [vmem:[%s10238_s1 + $0x1a00] sm:$0xff]  ;;  %v149_v32 = vld [vmem:[%s10239_s0 + $0x1e8] sm:$0xff]  ;;  %v1082_v39 = vld [vmem:[%s10238_s1 + $0x1c10] sm:$0xff] }
  0xc1   :  { %v4525_v55 = vpack.c.bf16 %v1024_v46, %v1016_v45  ;;  %v1107_v45 = vld [vmem:[%s10238_s1 + $0x1cd8] sm:$0xff]  ;;  %v157_v46 = vld [vmem:[%s10239_s0 + $0x228] sm:$0xff] }
  0xc2   :  { %4506 = vmatpush1.bf16.msra.mxu0 %v4505_v51  ;;  %v1041_v51 = vld [vmem:[%s10238_s1 + $0x1ac8] sm:$0xff] }
  0xc3   :  { %4762 = vmatpush1.bf16.msra.mxu1 %v4761_v52  ;;  %4508 = vmatprep.subr.bf16.mxu0 %v4507_v53  ;;  %v1035_v52 = vld [vmem:[%s10238_s1 + $0x1a98] sm:$0xff]  ;;  %v4527_v58 = vpack.c.bf16 %v1041_v51, %v1033_v50  ;;  %v1096_v51 = vld [vmem:[%s10238_s1 + $0x1c80] sm:$0xff] }
  0xc4   :  { %4764 = vmatprep.subr.bf16.mxu1 %v4763_v57  ;;  %v1043_v53 = vld [vmem:[%s10238_s1 + $0x1ad8] sm:$0xff]  ;;  %v4781_v57 = vpack.c.bf16 %v1026_v49, %v1018_v47  ;;  %v4541_v47 = vpack.c.bf16 %v1088_v38, %v1080_v37 }
  0xc5   :  { %1547 = vmatmul.mubr.f32.vlgmr.msra.gmra.mrb[0].mxu0 %v92_v63  ;;  %v4783_v62 = vpack.c.bf16 %v1043_v53, %v1035_v52  ;;  %v1104_v52 = vld [vmem:[%s10238_s1 + $0x1cc0] sm:$0xff]  ;;  %v1098_v53 = vld [vmem:[%s10238_s1 + $0x1c90] sm:$0xff]  ;;  %v1171_v37 = vld [vmem:[%s10238_s1 + $0x1ed8] sm:$0xff] }
  0xc6   :  { %4510 = vmatpush1.bf16.msra.mxu0 %v4509_v0  ;;  %2095 = vmatmul.mubr.f32.vlgmr.msra.gmra.mrb[0].mxu1 %v92_v63  ;;  %v1042_v63 = vld [vmem:[%s10238_s1 + $0x1ad0] sm:$0xff]  ;;  %v1049_v0 = vld [vmem:[%s10238_s1 + $0x1b08] sm:$0xff]  ;;  %v95_v38 = vld [vmem:[%s10239_s0 + $0x38] sm:$0xff] }
  0xc7   :  { %4766 = vmatpush1.bf16.msra.mxu1 %v4765_v1  ;;  %4512 = vmatprep.subr.bf16.mxu0 %v4511_v2  ;;  %v1057_v1 = vld [vmem:[%s10238_s1 + $0x1b48] sm:$0xff]  ;;  %v1051_v2 = vld [vmem:[%s10238_s1 + $0x1b18] sm:$0xff]  ;;  %v4785_v7 = vpack.c.bf16 %v1042_v63, %v1034_v61  ;;  %v4545_v61 = vpack.c.bf16 %v1104_v52, %v1096_v51 }
  0xc8   :  { %4768 = vmatprep.subr.bf16.mxu1 %v4767_v6  ;;  %1552 = vmatprep.mubr.f32.mxu0 %v101_v12  ;;  %v132_v6 = vld [vmem:[%s10239_s0 + $0x160] sm:$0xff]  ;;  %v4531_v8 = vpack.c.bf16 %v1057_v1, %v1049_v0 }
  0xc9   :  { %2100 = vmatprep.mubr.f32.mxu1 %v101_v12  ;;  %1553 = vmatmul.mubr.f32.gmra.mrb[2].mxu0 %v100_v14  ;;  %v4787_v12 = vpack.c.bf16 %v1059_v3, %v1051_v2  ;;  %v1112_v1 = vld [vmem:[%s10238_s1 + $0x1d00] sm:$0xff]  ;;  %v1114_v3 = vld [vmem:[%s10238_s1 + $0x1d10] sm:$0xff] }
  0xca   :  { %4514 = vmatpush1.bf16.msra.mxu0 %v4513_v13  ;;  %2101 = vmatmul.mubr.f32.gmra.mrb[2].mxu1 %v100_v14  ;;  %v1058_v13 = vld [vmem:[%s10238_s1 + $0x1b50] sm:$0xff]  ;;  %v1065_v14 = vld [vmem:[%s10238_s1 + $0x1b88] sm:$0xff]  ;;  %v1120_v2 = vld [vmem:[%s10238_s1 + $0x1d40] sm:$0xff] }
  0xcb   :  { %4770 = vmatpush1.bf16.msra.mxu1 %v4769_v15  ;;  %4516 = vmatprep.subr.bf16.mxu0 %v4515_v16  ;;  %v1073_v15 = vld [vmem:[%s10238_s1 + $0x1bc8] sm:$0xff]  ;;  %v1067_v16 = vld [vmem:[%s10238_s1 + $0x1b98] sm:$0xff]  ;;  %v4789_v21 = vpack.c.bf16 %v1058_v13, %v1050_v11  ;;  %v4549_v11 = vpack.c.bf16 %v1120_v2, %v1112_v1  ;;  %v1192_v2 = vld [vmem:[%s10238_s1 + $0x1f80] sm:$0xff] }
  0xcc   :  { %4772 = vmatprep.subr.bf16.mxu1 %v4771_v20  ;;  %1558 = vmatprep.mubr.f32.mxu0 %v109_v26  ;;  %v140_v20 = vld [vmem:[%s10239_s0 + $0x1a0] sm:$0xff]  ;;  %v4535_v22 = vpack.c.bf16 %v1073_v15, %v1065_v14 }
  0xcd   :  { %2106 = vmatprep.mubr.f32.mxu1 %v109_v26  ;;  %1559 = vmatmul.mubr.f32.gmra.mrb[4].mxu0 %v108_v28  ;;  %v4791_v26 = vpack.c.bf16 %v1075_v17, %v1067_v16  ;;  %v1128_v15 = vld [vmem:[%s10238_s1 + $0x1d80] sm:$0xff]  ;;  %v1130_v17 = vld [vmem:[%s10238_s1 + $0x1d90] sm:$0xff] }
  0xce   :  { %4518 = vmatpush1.bf16.msra.mxu0 %v4517_v27  ;;  %2107 = vmatmul.mubr.f32.gmra.mrb[4].mxu1 %v108_v28  ;;  %v1074_v27 = vld [vmem:[%s10238_s1 + $0x1bd0] sm:$0xff]  ;;  %v1081_v28 = vld [vmem:[%s10238_s1 + $0x1c08] sm:$0xff]  ;;  %v1136_v16 = vld [vmem:[%s10238_s1 + $0x1dc0] sm:$0xff] }
  0xcf   :  { %4774 = vmatpush1.bf16.msra.mxu1 %v4773_v29  ;;  %4520 = vmatprep.subr.bf16.mxu0 %v4519_v30  ;;  %v1089_v29 = vld [vmem:[%s10238_s1 + $0x1c48] sm:$0xff]  ;;  %v1083_v30 = vld [vmem:[%s10238_s1 + $0x1c18] sm:$0xff]  ;;  %v4793_v35 = vpack.c.bf16 %v1074_v27, %v1066_v25  ;;  %v4553_v25 = vpack.c.bf16 %v1136_v16, %v1128_v15  ;;  %v196_v15 = vld [vmem:[%s10238_s1 + $0x60] sm:$0xff] }
  0xd0   :  { %4776 = vmatprep.subr.bf16.mxu1 %v4775_v34  ;;  %1564 = vmatprep.mubr.f32.mxu0 %v117_v40  ;;  %v148_v34 = vld [vmem:[%s10239_s0 + $0x1e0] sm:$0xff]  ;;  %v4539_v36 = vpack.c.bf16 %v1089_v29, %v1081_v28 }
  0xd1   :  { %2112 = vmatprep.mubr.f32.mxu1 %v117_v40  ;;  %1565 = vmatmul.mubr.f32.gmra.mrb[6].mxu0 %v116_v42  ;;  %v4795_v40 = vpack.c.bf16 %v1091_v31, %v1083_v30  ;;  %v1144_v29 = vld [vmem:[%s10238_s1 + $0x1e00] sm:$0xff]  ;;  %v1146_v31 = vld [vmem:[%s10238_s1 + $0x1e10] sm:$0xff] }
  0xd2   :  { %4522 = vmatpush1.bf16.msra.mxu0 %v4521_v41  ;;  %2113 = vmatmul.mubr.f32.gmra.mrb[6].mxu1 %v116_v42  ;;  %v1090_v41 = vld [vmem:[%s10238_s1 + $0x1c50] sm:$0xff]  ;;  %v1097_v42 = vld [vmem:[%s10238_s1 + $0x1c88] sm:$0xff]  ;;  %v1152_v30 = vld [vmem:[%s10238_s1 + $0x1e40] sm:$0xff] }
  0xd3   :  { %4778 = vmatpush1.bf16.msra.mxu1 %v4777_v43  ;;  %4524 = vmatprep.subr.bf16.mxu0 %v4523_v44  ;;  %v1105_v43 = vld [vmem:[%s10238_s1 + $0x1cc8] sm:$0xff]  ;;  %v1099_v44 = vld [vmem:[%s10238_s1 + $0x1c98] sm:$0xff]  ;;  %v4797_v49 = vpack.c.bf16 %v1090_v41, %v1082_v39  ;;  %v4557_v39 = vpack.c.bf16 %v1152_v30, %v1144_v29  ;;  %v206_v30 = vld [vmem:[%s10238_s1 + $0xb0] sm:$0xff] }
  0xd4   :  { %4780 = vmatprep.subr.bf16.mxu1 %v4779_v48  ;;  %1570 = vmatprep.mubr.f32.mxu0 %v125_v54  ;;  %v156_v48 = vld [vmem:[%s10239_s0 + $0x220] sm:$0xff]  ;;  %v4543_v50 = vpack.c.bf16 %v1105_v43, %v1097_v42 }
  0xd5   :  { %2118 = vmatprep.mubr.f32.mxu1 %v125_v54  ;;  %1571 = vmatmul.mubr.f32.gmra.mrb[8].mxu0 %v124_v56  ;;  %v4799_v54 = vpack.c.bf16 %v1107_v45, %v1099_v44  ;;  %v1160_v42 = vld [vmem:[%s10238_s1 + $0x1e80] sm:$0xff]  ;;  %v1162_v44 = vld [vmem:[%s10238_s1 + $0x1e90] sm:$0xff] }
  0xd6   :  { %4526 = vmatpush1.bf16.msra.mxu0 %v4525_v55  ;;  %2119 = vmatmul.mubr.f32.gmra.mrb[8].mxu1 %v124_v56  ;;  %v1106_v55 = vld [vmem:[%s10238_s1 + $0x1cd0] sm:$0xff]  ;;  %v1113_v56 = vld [vmem:[%s10238_s1 + $0x1d08] sm:$0xff]  ;;  %v1168_v43 = vld [vmem:[%s10238_s1 + $0x1ec0] sm:$0xff] }
  0xd7   :  { %4782 = vmatpush1.bf16.msra.mxu1 %v4781_v57  ;;  %4528 = vmatprep.subr.bf16.mxu0 %v4527_v58  ;;  %v1121_v57 = vld [vmem:[%s10238_s1 + $0x1d48] sm:$0xff]  ;;  %v1115_v58 = vld [vmem:[%s10238_s1 + $0x1d18] sm:$0xff]  ;;  %v4801_v63 = vpack.c.bf16 %v1106_v55, %v1098_v53  ;;  %v4561_v51 = vpack.c.bf16 %v1168_v43, %v1160_v42  ;;  %v1184_v55 = vld [vmem:[%s10238_s1 + $0x1f40] sm:$0xff] }
  0xd8   :  { %4784 = vmatprep.subr.bf16.mxu1 %v4783_v62  ;;  %1576 = vmatprep.mubr.f32.mxu0 %v133_v4  ;;  %v164_v62 = vld [vmem:[%s10239_s0 + $0x260] sm:$0xff]  ;;  %v4547_v0 = vpack.c.bf16 %v1121_v57, %v1113_v56  ;;  %v1178_v56 = vld [vmem:[%s10238_s1 + $0x1f10] sm:$0xff]  ;;  %v111_v42 = vld [vmem:[%s10239_s0 + $0xb8] sm:$0xff] }
  0xd9   :  { %2124 = vmatprep.mubr.f32.mxu1 %v133_v4  ;;  %1577 = vmatmul.mubr.f32.gmra.mrb[10].mxu0 %v132_v6  ;;  %v4803_v4 = vpack.c.bf16 %v1123_v59, %v1115_v58  ;;  %v1186_v58 = vld [vmem:[%s10238_s1 + $0x1f50] sm:$0xff]  ;;  %v1193_v59 = vld [vmem:[%s10238_s1 + $0x1f88] sm:$0xff] }
  0xda   :  { %4530 = vmatpush1.bf16.msra.mxu0 %v4529_v5  ;;  %2125 = vmatmul.mubr.f32.gmra.mrb[10].mxu1 %v132_v6  ;;  %v1122_v5 = vld [vmem:[%s10238_s1 + $0x1d50] sm:$0xff]  ;;  %v1129_v6 = vld [vmem:[%s10238_s1 + $0x1d88] sm:$0xff] }
  0xdb   :  { %4786 = vmatpush1.bf16.msra.mxu1 %v4785_v7  ;;  %4532 = vmatprep.subr.bf16.mxu0 %v4531_v8  ;;  %v1137_v7 = vld [vmem:[%s10238_s1 + $0x1dc8] sm:$0xff]  ;;  %v1131_v8 = vld [vmem:[%s10238_s1 + $0x1d98] sm:$0xff]  ;;  %v4805_v13 = vpack.c.bf16 %v1122_v5, %v1114_v3  ;;  %v1200_v3 = vld [vmem:[%s10238_s1 + $0x1fc0] sm:$0xff] }
  0xdc   :  { %4788 = vmatprep.subr.bf16.mxu1 %v4787_v12  ;;  %1582 = vmatprep.mubr.f32.mxu0 %v141_v18  ;;  %v172_v12 = vld [vmem:[%s10239_s0 + $0x2a0] sm:$0xff]  ;;  %v4551_v14 = vpack.c.bf16 %v1137_v7, %v1129_v6  ;;  %v1202_v6 = vld [vmem:[%s10238_s1 + $0x1fd0] sm:$0xff]  ;;  %v189_v7 = vld [vmem:[%s10238_s1 + $0x28] sm:$0xff] }
  0xdd   :  { %2130 = vmatprep.mubr.f32.mxu1 %v141_v18  ;;  %1583 = vmatmul.mubr.f32.gmra.mrb[12].mxu0 %v140_v20  ;;  %v4807_v18 = vpack.c.bf16 %v1139_v9, %v1131_v8  ;;  %v197_v8 = vld [vmem:[%s10238_s1 + $0x68] sm:$0xff]  ;;  %v191_v9 = vld [vmem:[%s10238_s1 + $0x38] sm:$0xff] }
  0xde   :  { %4534 = vmatpush1.bf16.msra.mxu0 %v4533_v19  ;;  %2131 = vmatmul.mubr.f32.gmra.mrb[12].mxu1 %v140_v20  ;;  %v1138_v19 = vld [vmem:[%s10238_s1 + $0x1dd0] sm:$0xff]  ;;  %v1145_v20 = vld [vmem:[%s10238_s1 + $0x1e08] sm:$0xff] }
  0xdf   :  { %4790 = vmatpush1.bf16.msra.mxu1 %v4789_v21  ;;  %4536 = vmatprep.subr.bf16.mxu0 %v4535_v22  ;;  %v1153_v21 = vld [vmem:[%s10238_s1 + $0x1e48] sm:$0xff]  ;;  %v1147_v22 = vld [vmem:[%s10238_s1 + $0x1e18] sm:$0xff]  ;;  %v4809_v27 = vpack.c.bf16 %v1138_v19, %v1130_v17  ;;  %v190_v17 = vld [vmem:[%s10238_s1 + $0x30] sm:$0xff] }
  0xe0   :  { %4792 = vmatprep.subr.bf16.mxu1 %v4791_v26  ;;  %1588 = vmatprep.mubr.f32.mxu0 %v149_v32  ;;  %v180_v26 = vld [vmem:[%s10239_s0 + $0x2e0] sm:$0xff]  ;;  %v4555_v28 = vpack.c.bf16 %v1153_v21, %v1145_v20  ;;  %v205_v19 = vld [vmem:[%s10238_s1 + $0xa8] sm:$0xff]  ;;  %v94_v21 = vld [vmem:[%s10239_s0 + $0x30] sm:$0xff] }
  0xe1   :  { %2136 = vmatprep.mubr.f32.mxu1 %v149_v32  ;;  %1589 = vmatmul.mubr.f32.gmra.mrb[14].mxu0 %v148_v34  ;;  %v4811_v32 = vpack.c.bf16 %v1155_v23, %v1147_v22  ;;  %v213_v20 = vld [vmem:[%s10238_s1 + $0xe8] sm:$0xff]  ;;  %v207_v23 = vld [vmem:[%s10238_s1 + $0xb8] sm:$0xff] }
  0xe2   :  { %4538 = vmatpush1.bf16.msra.mxu0 %v4537_v33  ;;  %2137 = vmatmul.mubr.f32.gmra.mrb[14].mxu1 %v148_v34  ;;  %v1154_v33 = vld [vmem:[%s10238_s1 + $0x1e50] sm:$0xff]  ;;  %v1161_v34 = vld [vmem:[%s10238_s1 + $0x1e88] sm:$0xff]  ;;  %v4831_v29 = vpack.c.bf16 %v213_v20, %v205_v19  ;;  %v276_v19 = vld [vmem:[%s10238_s1 + $0x2e0] sm:$0xff] }
  0xe3   :  { %4794 = vmatpush1.bf16.msra.mxu1 %v4793_v35  ;;  %4540 = vmatprep.subr.bf16.mxu0 %v4539_v36  ;;  %v1169_v35 = vld [vmem:[%s10238_s1 + $0x1ec8] sm:$0xff]  ;;  %v1163_v36 = vld [vmem:[%s10238_s1 + $0x1e98] sm:$0xff] }
  0xe4   :  { %4796 = vmatprep.subr.bf16.mxu1 %v4795_v40  ;;  %1594 = vmatprep.mubr.f32.mxu0 %v157_v46  ;;  %v4813_v40 = vpack.c.bf16 %v1154_v33, %v1146_v31  ;;  %v4559_v41 = vpack.c.bf16 %v1169_v35, %v1161_v34  ;;  %v4815_v45 = vpack.c.bf16 %v1171_v37, %v1163_v36  ;;  %v214_v31 = vld [vmem:[%s10238_s1 + $0xf0] sm:$0xff]  ;;  %v221_v33 = vld [vmem:[%s10238_s1 + $0x128] sm:$0xff]  ;;  %v223_v37 = vld [vmem:[%s10238_s1 + $0x138] sm:$0xff] }
  0xe5   :  { %2142 = vmatprep.mubr.f32.mxu1 %v157_v46  ;;  %1595 = vmatmul.mubr.f32.gmra.mrb[16].mxu0 %v156_v48  ;;  %v1170_v46 = vld [vmem:[%s10238_s1 + $0x1ed0] sm:$0xff]  ;;  %v229_v34 = vld [vmem:[%s10238_s1 + $0x168] sm:$0xff]  ;;  %v135_v20 = vld [vmem:[%s10239_s0 + $0x178] sm:$0xff] }
  0xe6   :  { %4542 = vmatpush1.bf16.msra.mxu0 %v4541_v47  ;;  %2143 = vmatmul.mubr.f32.gmra.mrb[16].mxu1 %v156_v48  ;;  %v1177_v47 = vld [vmem:[%s10238_s1 + $0x1f08] sm:$0xff]  ;;  %v4817_v52 = vpack.c.bf16 %v1170_v46, %v1162_v44  ;;  %v102_v35 = vld [vmem:[%s10239_s0 + $0x70] sm:$0xff]  ;;  %v4835_v43 = vpack.c.bf16 %v229_v34, %v221_v33  ;;  %v292_v33 = vld [vmem:[%s10238_s1 + $0x360] sm:$0xff] }
  0xe7   :  { %4798 = vmatpush1.bf16.msra.mxu1 %v4797_v49  ;;  %4544 = vmatprep.subr.bf16.mxu0 %v4543_v50  ;;  %v1185_v48 = vld [vmem:[%s10238_s1 + $0x1f48] sm:$0xff]  ;;  %v1179_v49 = vld [vmem:[%s10238_s1 + $0x1f18] sm:$0xff]  ;;  %v222_v44 = vld [vmem:[%s10238_s1 + $0x130] sm:$0xff] }
  0xe8   :  { %4800 = vmatprep.subr.bf16.mxu1 %v4799_v54  ;;  %1600 = vmatprep.mubr.f32.mxu0 %v165_v60  ;;  %v1187_v50 = vld [vmem:[%s10238_s1 + $0x1f58] sm:$0xff]  ;;  %v4563_v53 = vpack.c.bf16 %v1185_v48, %v1177_v47  ;;  %v1176_v54 = vld [vmem:[%s10238_s1 + $0x1f00] sm:$0xff]  ;;  %v237_v47 = vld [vmem:[%s10238_s1 + $0x1a8] sm:$0xff] }
  0xe9   :  { %2148 = vmatprep.mubr.f32.mxu1 %v165_v60  ;;  %1601 = vmatmul.mubr.f32.gmra.mrb[18].mxu0 %v164_v62  ;;  %v4819_v57 = vpack.c.bf16 %v1187_v50, %v1179_v49  ;;  %v1201_v60 = vld [vmem:[%s10238_s1 + $0x1fc8] sm:$0xff]  ;;  %v110_v49 = vld [vmem:[%s10239_s0 + $0xb0] sm:$0xff]  ;;  %v143_v34 = vld [vmem:[%s10239_s0 + $0x1b8] sm:$0xff] }
  0xea   :  { %4546 = vmatpush1.bf16.msra.mxu0 %v4545_v61  ;;  %2149 = vmatmul.mubr.f32.gmra.mrb[18].mxu1 %v164_v62  ;;  %v1195_v61 = vld [vmem:[%s10238_s1 + $0x1f98] sm:$0xff]  ;;  %v4567_v1 = vpack.c.bf16 %v1201_v60, %v1193_v59  ;;  %v245_v48 = vld [vmem:[%s10238_s1 + $0x1e8] sm:$0xff]  ;;  %v246_v59 = vld [vmem:[%s10238_s1 + $0x1f0] sm:$0xff] }
  0xeb   :  { %4802 = vmatpush1.bf16.msra.mxu1 %v4801_v63  ;;  %4548 = vmatprep.subr.bf16.mxu0 %v4547_v0  ;;  %v1203_v62 = vld [vmem:[%s10238_s1 + $0x1fd8] sm:$0xff]  ;;  %v4565_v63 = vpack.c.bf16 %v1184_v55, %v1176_v54  ;;  %v4821_v0 = vpack.c.bf16 %v1186_v58, %v1178_v56  ;;  %v236_v54 = vld [vmem:[%s10238_s1 + $0x1a0] sm:$0xff]  ;;  %v238_v58 = vld [vmem:[%s10238_s1 + $0x1b0] sm:$0xff] }
  0xec   :  { %4804 = vmatprep.subr.bf16.mxu1 %v4803_v4  ;;  %1606 = vmatprep.mubr.f32.mxu0 %v173_v10  ;;  %v1194_v4 = vld [vmem:[%s10238_s1 + $0x1f90] sm:$0xff]  ;;  %v4823_v5 = vpack.c.bf16 %v1203_v62, %v1195_v61  ;;  %v244_v55 = vld [vmem:[%s10238_s1 + $0x1e0] sm:$0xff]  ;;  %v119_v56 = vld [vmem:[%s10239_s0 + $0xf8] sm:$0xff] }
  0xed   :  { %2154 = vmatprep.mubr.f32.mxu1 %v173_v10  ;;  %1607 = vmatmul.mubr.f32.gmra.mrb[20].mxu0 %v172_v12  ;;  %v199_v10 = vld [vmem:[%s10238_s1 + $0x78] sm:$0xff]  ;;  %v253_v61 = vld [vmem:[%s10238_s1 + $0x228] sm:$0xff] }
  0xee   :  { %4550 = vmatpush1.bf16.msra.mxu0 %v4549_v11  ;;  %2155 = vmatmul.mubr.f32.gmra.mrb[20].mxu1 %v172_v12  ;;  %v4569_v11 = vpack.c.bf16 %v1200_v3, %v1192_v2  ;;  %v4825_v12 = vpack.c.bf16 %v1202_v6, %v1194_v4  ;;  %v5083_v16 = vpack.c.bf16 %v199_v10, %v191_v9  ;;  %v261_v62 = vld [vmem:[%s10238_s1 + $0x268] sm:$0xff]  ;;  %v263_v2 = vld [vmem:[%s10238_s1 + $0x278] sm:$0xff]  ;;  %v252_v4 = vld [vmem:[%s10238_s1 + $0x220] sm:$0xff] }
  0xef   :  { %4806 = vmatpush1.bf16.msra.mxu1 %v4805_v13  ;;  %4552 = vmatprep.subr.bf16.mxu0 %v4551_v14  ;;  %v4827_v13 = vpack.c.bf16 %v197_v8, %v189_v7  ;;  %v188_v14 = vld [vmem:[%s10238_s1 + $0x20] sm:$0xff]  ;;  %v5097_v3 = vpack.c.bf16 %v246_v59, %v238_v58  ;;  %v127_v6 = vld [vmem:[%s10239_s0 + $0x138] sm:$0xff]  ;;  %v4843_v7 = vpack.c.bf16 %v261_v62, %v253_v61  ;;  %v254_v8 = vld [vmem:[%s10238_s1 + $0x230] sm:$0xff] }
  0xf0   :  { %4808 = vmatprep.subr.bf16.mxu1 %v4807_v18  ;;  %1612 = vmatprep.mubr.f32.mxu0 %v181_v24  ;;  %v198_v18 = vld [vmem:[%s10238_s1 + $0x70] sm:$0xff]  ;;  %v4829_v22 = vpack.c.bf16 %v196_v15, %v188_v14  ;;  %v271_v15 = vld [vmem:[%s10238_s1 + $0x2b8] sm:$0xff]  ;;  %v324_v61 = vld [vmem:[%s10238_s1 + $0x460] sm:$0xff] }
  0xf1   :  { %2160 = vmatprep.mubr.f32.mxu1 %v181_v24  ;;  %1613 = vmatmul.mubr.f32.gmra.mrb[22].mxu0 %v180_v26  ;;  %v215_v24 = vld [vmem:[%s10238_s1 + $0xf8] sm:$0xff]  ;;  %v262_v9 = vld [vmem:[%s10238_s1 + $0x270] sm:$0xff] }
  0xf2   :  { %4554 = vmatpush1.bf16.msra.mxu0 %v4553_v25  ;;  %2161 = vmatmul.mubr.f32.gmra.mrb[22].mxu1 %v180_v26  ;;  %v5085_v25 = vpack.c.bf16 %v198_v18, %v190_v17  ;;  %v204_v26 = vld [vmem:[%s10238_s1 + $0xa0] sm:$0xff]  ;;  %v5101_v17 = vpack.c.bf16 %v262_v9, %v254_v8  ;;  %v327_v58 = vld [vmem:[%s10238_s1 + $0x478] sm:$0xff] }
  0xf3   :  { %4810 = vmatpush1.bf16.msra.mxu1 %v4809_v27  ;;  %4556 = vmatprep.subr.bf16.mxu0 %v4555_v28  ;;  %v212_v27 = vld [vmem:[%s10238_s1 + $0xe0] sm:$0xff]  ;;  %v103_v28 = vld [vmem:[%s10239_s0 + $0x78] sm:$0xff] }
  0xf4   :  { %4812 = vmatprep.subr.bf16.mxu1 %v4811_v32  ;;  %1683 = vmatprep.mubr.f32.mxu0 %v95_v38  ;;  %v5087_v32 = vpack.c.bf16 %v215_v24, %v207_v23  ;;  %v4833_v36 = vpack.c.bf16 %v212_v27, %v204_v26  ;;  %v268_v18 = vld [vmem:[%s10238_s1 + $0x2a0] sm:$0xff]  ;;  %v278_v23 = vld [vmem:[%s10238_s1 + $0x2f0] sm:$0xff]  ;;  %v293_v26 = vld [vmem:[%s10238_s1 + $0x368] sm:$0xff] }
  0xf5   :  { %2231 = vmatprep.mubr.f32.mxu1 %v95_v38  ;;  %v231_v38 = vld [vmem:[%s10238_s1 + $0x178] sm:$0xff]  ;;  %v134_v27 = vld [vmem:[%s10239_s0 + $0x170] sm:$0xff] }
  0xf6   :  { %4558 = vmatpush1.bf16.msra.mxu0 %v4557_v39  ;;  %v5089_v39 = vpack.c.bf16 %v214_v31, %v206_v30  ;;  %v5091_v46 = vpack.c.bf16 %v231_v38, %v223_v37  ;;  %v295_v30 = vld [vmem:[%s10238_s1 + $0x378] sm:$0xff]  ;;  %v294_v37 = vld [vmem:[%s10238_s1 + $0x370] sm:$0xff] }
  0xf7   :  { %4814 = vmatpush1.bf16.msra.mxu1 %v4813_v40  ;;  %4560 = vmatprep.subr.bf16.mxu0 %v4559_v41  ;;  %v220_v40 = vld [vmem:[%s10238_s1 + $0x120] sm:$0xff]  ;;  %v159_v62 = vld [vmem:[%s10239_s0 + $0x238] sm:$0xff] }
  0xf8   :  { %4816 = vmatprep.subr.bf16.mxu1 %v4815_v45  ;;  %v228_v41 = vld [vmem:[%s10238_s1 + $0x160] sm:$0xff]  ;;  %v230_v45 = vld [vmem:[%s10238_s1 + $0x170] sm:$0xff]  ;;  %v343_v8 = vld [vmem:[%s10238_s1 + $0x4f8] sm:$0xff] }
  0xf9   :  { %v4837_v50 = vpack.c.bf16 %v228_v41, %v220_v40  ;;  %v309_v40 = vld [vmem:[%s10238_s1 + $0x3e8] sm:$0xff]  ;;  %v142_v41 = vld [vmem:[%s10239_s0 + $0x1b0] sm:$0xff] }
  0xfa   :  { %4562 = vmatpush1.bf16.msra.mxu0 %v4561_v51  ;;  %v239_v51 = vld [vmem:[%s10238_s1 + $0x1b8] sm:$0xff] }
  0xfb   :  { %4818 = vmatpush1.bf16.msra.mxu1 %v4817_v52  ;;  %4564 = vmatprep.subr.bf16.mxu0 %v4563_v53  ;;  %v247_v52 = vld [vmem:[%s10238_s1 + $0x1f8] sm:$0xff]  ;;  %v5093_v53 = vpack.c.bf16 %v230_v45, %v222_v44 }
  0xfc   :  { %4820 = vmatprep.subr.bf16.mxu1 %v4819_v57  ;;  %v4839_v57 = vpack.c.bf16 %v245_v48, %v237_v47  ;;  %v5095_v60 = vpack.c.bf16 %v247_v52, %v239_v51  ;;  %v311_v44 = vld [vmem:[%s10238_s1 + $0x3f8] sm:$0xff]  ;;  %v308_v47 = vld [vmem:[%s10238_s1 + $0x3e0] sm:$0xff]  ;;  %v310_v51 = vld [vmem:[%s10238_s1 + $0x3f0] sm:$0xff] }
  0xfd   :  { %v151_v48 = vld [vmem:[%s10239_s0 + $0x1f8] sm:$0xff] }
  0xfe   :  { %4566 = vmatpush1.bf16.msra.mxu0 %v4565_v63  ;;  %v118_v63 = vld [vmem:[%s10239_s0 + $0xf0] sm:$0xff] }
  0xff   :  { %4822 = vmatpush1.bf16.msra.mxu1 %v4821_v0  ;;  %4568 = vmatprep.subr.bf16.mxu0 %v4567_v1  ;;  %v4841_v0 = vpack.c.bf16 %v244_v55, %v236_v54  ;;  %v255_v1 = vld [vmem:[%s10238_s1 + $0x238] sm:$0xff]  ;;  %v325_v54 = vld [vmem:[%s10238_s1 + $0x468] sm:$0xff]  ;;  %v150_v55 = vld [vmem:[%s10239_s0 + $0x1f0] sm:$0xff] }
 0x100   :  { %4824 = vmatprep.subr.bf16.mxu1 %v4823_v5  ;;  %v260_v5 = vld [vmem:[%s10238_s1 + $0x260] sm:$0xff]  ;;  %v5099_v10 = vpack.c.bf16 %v263_v2, %v255_v1  ;;  %v326_v1 = vld [vmem:[%s10238_s1 + $0x470] sm:$0xff] }
 0x101   :  { %v4845_v14 = vpack.c.bf16 %v260_v5, %v252_v4  ;;  %v341_v4 = vld [vmem:[%s10238_s1 + $0x4e8] sm:$0xff]  ;;  %v158_v5 = vld [vmem:[%s10239_s0 + $0x230] sm:$0xff] }
 0x102   :  { %4570 = vmatpush1.bf16.msra.mxu0 %v4569_v11  ;;  %v269_v11 = vld [vmem:[%s10238_s1 + $0x2a8] sm:$0xff] }
 0x103   :  { %4826 = vmatpush1.bf16.msra.mxu1 %v4825_v12  ;;  %4828 = vmatprep.subr.bf16.mxu0 %v4827_v13  ;;  %v277_v12 = vld [vmem:[%s10238_s1 + $0x2e8] sm:$0xff]  ;;  %v126_v13 = vld [vmem:[%s10239_s0 + $0x130] sm:$0xff] }
 0x104   :  { %5084 = vmatprep.subr.bf16.mxu1 %v5083_v16  ;;  %v279_v16 = vld [vmem:[%s10238_s1 + $0x2f8] sm:$0xff] }
 0x105   :  { %1684 = vmatmul.mubr.f32.vlgmr.msra.gmra.mrb[0].mxu0 %v94_v21  ;;  %v5103_v24 = vpack.c.bf16 %v279_v16, %v271_v15  ;;  %v342_v15 = vld [vmem:[%s10238_s1 + $0x4f0] sm:$0xff] }
 0x106   :  { %2232 = vmatmul.mubr.f32.vlgmr.msra.gmra.mrb[0].mxu1 %v94_v21  ;;  %4830 = vmatpush1.bf16.msra.mxu0 %v4829_v22  ;;  %v4847_v21 = vpack.c.bf16 %v277_v12, %v269_v11  ;;  %v270_v22 = vld [vmem:[%s10238_s1 + $0x2b0] sm:$0xff]  ;;  %v340_v11 = vld [vmem:[%s10238_s1 + $0x4e0] sm:$0xff]  ;;  %v167_v12 = vld [vmem:[%s10239_s0 + $0x278] sm:$0xff] }
 0x107   :  { %5086 = vmatpush1.bf16.msra.mxu1 %v5085_v25  ;;  %1689 = vmatprep.mubr.f32.mxu0 %v103_v28  ;;  %v285_v25 = vld [vmem:[%s10238_s1 + $0x328] sm:$0xff]  ;;  %v5105_v31 = vpack.c.bf16 %v278_v23, %v270_v22  ;;  %v359_v22 = vld [vmem:[%s10238_s1 + $0x578] sm:$0xff] }
 0x108   :  { %2237 = vmatprep.mubr.f32.mxu1 %v103_v28  ;;  %4832 = vmatprep.subr.bf16.mxu0 %v4831_v29  ;;  %v4849_v28 = vpack.c.bf16 %v276_v19, %v268_v18  ;;  %v287_v29 = vld [vmem:[%s10238_s1 + $0x338] sm:$0xff]  ;;  %v357_v18 = vld [vmem:[%s10238_s1 + $0x568] sm:$0xff]  ;;  %v166_v19 = vld [vmem:[%s10239_s0 + $0x270] sm:$0xff] }
 0x109   :  { %1690 = vmatmul.mubr.f32.gmra.mrb[2].mxu0 %v102_v35  ;;  %5088 = vmatprep.subr.bf16.mxu1 %v5087_v32  ;;  %v284_v32 = vld [vmem:[%s10238_s1 + $0x320] sm:$0xff]  ;;  %v5107_v38 = vpack.c.bf16 %v295_v30, %v287_v29  ;;  %v358_v29 = vld [vmem:[%s10238_s1 + $0x570] sm:$0xff] }
 0x10a   :  { %2238 = vmatmul.mubr.f32.gmra.mrb[2].mxu1 %v102_v35  ;;  %4834 = vmatpush1.bf16.msra.mxu0 %v4833_v36  ;;  %v4851_v35 = vpack.c.bf16 %v293_v26, %v285_v25  ;;  %v286_v36 = vld [vmem:[%s10238_s1 + $0x330] sm:$0xff]  ;;  %v356_v25 = vld [vmem:[%s10238_s1 + $0x560] sm:$0xff]  ;;  %v175_v26 = vld [vmem:[%s10239_s0 + $0x2b8] sm:$0xff] }
 0x10b   :  { %5090 = vmatpush1.bf16.msra.mxu1 %v5089_v39  ;;  %1695 = vmatprep.mubr.f32.mxu0 %v111_v42  ;;  %v301_v39 = vld [vmem:[%s10238_s1 + $0x3a8] sm:$0xff]  ;;  %v5109_v45 = vpack.c.bf16 %v294_v37, %v286_v36  ;;  %v174_v30 = vld [vmem:[%s10239_s0 + $0x2b0] sm:$0xff]  ;;  %v367_v36 = vld [vmem:[%s10238_s1 + $0x5b8] sm:$0xff] }
 0x10c   :  { %2243 = vmatprep.mubr.f32.mxu1 %v111_v42  ;;  %4836 = vmatprep.subr.bf16.mxu0 %v4835_v43  ;;  %v4853_v42 = vpack.c.bf16 %v292_v33, %v284_v32  ;;  %v303_v43 = vld [vmem:[%s10238_s1 + $0x3b8] sm:$0xff]  ;;  %v365_v32 = vld [vmem:[%s10238_s1 + $0x5a8] sm:$0xff] }
 0x10d   :  { %1696 = vmatmul.mubr.f32.gmra.mrb[4].mxu0 %v110_v49  ;;  %5092 = vmatprep.subr.bf16.mxu1 %v5091_v46  ;;  %v300_v46 = vld [vmem:[%s10238_s1 + $0x3a0] sm:$0xff]  ;;  %v5111_v52 = vpack.c.bf16 %v311_v44, %v303_v43  ;;  %v373_v33 = vld [vmem:[%s10238_s1 + $0x5e8] sm:$0xff]  ;;  %v375_v37 = vld [vmem:[%s10238_s1 + $0x5f8] sm:$0xff] }
 0x10e   :  { %2244 = vmatmul.mubr.f32.gmra.mrb[4].mxu1 %v110_v49  ;;  %4838 = vmatpush1.bf16.msra.mxu0 %v4837_v50  ;;  %v4855_v49 = vpack.c.bf16 %v309_v40, %v301_v39  ;;  %v302_v50 = vld [vmem:[%s10238_s1 + $0x3b0] sm:$0xff]  ;;  %v364_v39 = vld [vmem:[%s10238_s1 + $0x5a0] sm:$0xff]  ;;  %v381_v44 = vld [vmem:[%s10238_s1 + $0x628] sm:$0xff] }
 0x10f   :  { %5094 = vmatpush1.bf16.msra.mxu1 %v5093_v53  ;;  %1701 = vmatprep.mubr.f32.mxu0 %v119_v56  ;;  %v317_v53 = vld [vmem:[%s10238_s1 + $0x428] sm:$0xff]  ;;  %v5113_v59 = vpack.c.bf16 %v310_v51, %v302_v50  ;;  %v372_v40 = vld [vmem:[%s10238_s1 + $0x5e0] sm:$0xff]  ;;  %v374_v43 = vld [vmem:[%s10238_s1 + $0x5f0] sm:$0xff] }
 0x110   :  { %2249 = vmatprep.mubr.f32.mxu1 %v119_v56  ;;  %4840 = vmatprep.subr.bf16.mxu0 %v4839_v57  ;;  %v4857_v56 = vpack.c.bf16 %v308_v47, %v300_v46  ;;  %v319_v57 = vld [vmem:[%s10238_s1 + $0x438] sm:$0xff]  ;;  %v5127_v46 = vpack.c.bf16 %v375_v37, %v367_v36  ;;  %v4873_v50 = vpack.c.bf16 %v372_v40, %v364_v39  ;;  %v452_v39 = vld [vmem:[%s10238_s1 + $0x860] sm:$0xff]  ;;  %v446_v40 = vld [vmem:[%s10238_s1 + $0x830] sm:$0xff] }
 0x111   :  { %1702 = vmatmul.mubr.f32.gmra.mrb[6].mxu0 %v118_v63  ;;  %5096 = vmatprep.subr.bf16.mxu1 %v5095_v60  ;;  %v316_v60 = vld [vmem:[%s10238_s1 + $0x420] sm:$0xff]  ;;  %v5115_v2 = vpack.c.bf16 %v327_v58, %v319_v57  ;;  %v383_v47 = vld [vmem:[%s10238_s1 + $0x638] sm:$0xff]  ;;  %v390_v57 = vld [vmem:[%s10238_s1 + $0x670] sm:$0xff] }
 0x112   :  { %2250 = vmatmul.mubr.f32.gmra.mrb[6].mxu1 %v118_v63  ;;  %4842 = vmatpush1.bf16.msra.mxu0 %v4841_v0  ;;  %v4859_v63 = vpack.c.bf16 %v325_v54, %v317_v53  ;;  %v318_v0 = vld [vmem:[%s10238_s1 + $0x430] sm:$0xff]  ;;  %v380_v53 = vld [vmem:[%s10238_s1 + $0x620] sm:$0xff]  ;;  %v397_v58 = vld [vmem:[%s10238_s1 + $0x6a8] sm:$0xff] }
 0x113   :  { %5098 = vmatpush1.bf16.msra.mxu1 %v5097_v3  ;;  %1707 = vmatprep.mubr.f32.mxu0 %v127_v6  ;;  %v333_v3 = vld [vmem:[%s10238_s1 + $0x4a8] sm:$0xff]  ;;  %v5117_v9 = vpack.c.bf16 %v326_v1, %v318_v0  ;;  %v388_v54 = vld [vmem:[%s10238_s1 + $0x660] sm:$0xff] }
 0x114   :  { %2255 = vmatprep.mubr.f32.mxu1 %v127_v6  ;;  %4844 = vmatprep.subr.bf16.mxu0 %v4843_v7  ;;  %v4861_v6 = vpack.c.bf16 %v324_v61, %v316_v60  ;;  %v335_v7 = vld [vmem:[%s10238_s1 + $0x4b8] sm:$0xff]  ;;  %v396_v1 = vld [vmem:[%s10238_s1 + $0x6a0] sm:$0xff] }
 0x115   :  { %1708 = vmatmul.mubr.f32.gmra.mrb[8].mxu0 %v126_v13  ;;  %5100 = vmatprep.subr.bf16.mxu1 %v5099_v10  ;;  %v332_v10 = vld [vmem:[%s10238_s1 + $0x4a0] sm:$0xff]  ;;  %v5119_v16 = vpack.c.bf16 %v343_v8, %v335_v7  ;;  %v399_v60 = vld [vmem:[%s10238_s1 + $0x6b8] sm:$0xff]  ;;  %v421_v7 = vld [vmem:[%s10238_s1 + $0x768] sm:$0xff] }
 0x116   :  { %2256 = vmatmul.mubr.f32.gmra.mrb[8].mxu1 %v126_v13  ;;  %4846 = vmatpush1.bf16.msra.mxu0 %v4845_v14  ;;  %v4863_v13 = vpack.c.bf16 %v341_v4, %v333_v3  ;;  %v334_v14 = vld [vmem:[%s10238_s1 + $0x4b0] sm:$0xff]  ;;  %v407_v61 = vld [vmem:[%s10238_s1 + $0x6f8] sm:$0xff]  ;;  %v5748_v8 = vld [vmem:[%s10239_s0 + $0x8] sm:$0xff] }
 0x117   :  { %5102 = vmatpush1.bf16.msra.mxu1 %v5101_v17  ;;  %1713 = vmatprep.mubr.f32.mxu0 %v135_v20  ;;  %v349_v17 = vld [vmem:[%s10238_s1 + $0x528] sm:$0xff]  ;;  %v5121_v23 = vpack.c.bf16 %v342_v15, %v334_v14  ;;  %v398_v3 = vld [vmem:[%s10238_s1 + $0x6b0] sm:$0xff]  ;;  %v5135_v4 = vpack.c.bf16 %v407_v61, %v399_v60  ;;  %v412_v14 = vld [vmem:[%s10238_s1 + $0x720] sm:$0xff] }
 0x118   :  { %2261 = vmatprep.mubr.f32.mxu1 %v135_v20  ;;  %4848 = vmatprep.subr.bf16.mxu0 %v4847_v21  ;;  %v4865_v20 = vpack.c.bf16 %v340_v11, %v332_v10  ;;  %v351_v21 = vld [vmem:[%s10238_s1 + $0x538] sm:$0xff]  ;;  %v420_v15 = vld [vmem:[%s10238_s1 + $0x760] sm:$0xff] }
 0x119   :  { %1714 = vmatmul.mubr.f32.gmra.mrb[10].mxu0 %v134_v27  ;;  %5104 = vmatprep.subr.bf16.mxu1 %v5103_v24  ;;  %v348_v24 = vld [vmem:[%s10238_s1 + $0x520] sm:$0xff]  ;;  %v423_v10 = vld [vmem:[%s10238_s1 + $0x778] sm:$0xff] }
 0x11a   :  { %2262 = vmatmul.mubr.f32.gmra.mrb[10].mxu1 %v134_v27  ;;  %4850 = vmatpush1.bf16.msra.mxu0 %v4849_v28  ;;  %v4867_v27 = vpack.c.bf16 %v357_v18, %v349_v17  ;;  %v350_v28 = vld [vmem:[%s10238_s1 + $0x530] sm:$0xff] }
 0x11b   :  { %5106 = vmatpush1.bf16.msra.mxu1 %v5105_v31  ;;  %1719 = vmatprep.mubr.f32.mxu0 %v143_v34  ;;  %v5123_v31 = vpack.c.bf16 %v359_v22, %v351_v21  ;;  %v422_v18 = vld [vmem:[%s10238_s1 + $0x770] sm:$0xff]  ;;  %v431_v21 = vld [vmem:[%s10238_s1 + $0x7b8] sm:$0xff] }
 0x11c   :  { %2267 = vmatprep.mubr.f32.mxu1 %v143_v34  ;;  %4852 = vmatprep.subr.bf16.mxu0 %v4851_v35  ;;  %v4869_v34 = vpack.c.bf16 %v356_v25, %v348_v24  ;;  %v183_v35 = vld [vmem:[%s10239_s0 + $0x2f8] sm:$0xff] }
 0x11d   :  { %1720 = vmatmul.mubr.f32.gmra.mrb[12].mxu0 %v142_v41  ;;  %5108 = vmatprep.subr.bf16.mxu1 %v5107_v38  ;;  %v5125_v38 = vpack.c.bf16 %v358_v29, %v350_v28  ;;  %v439_v22 = vld [vmem:[%s10238_s1 + $0x7f8] sm:$0xff]  ;;  %v430_v28 = vld [vmem:[%s10238_s1 + $0x7b0] sm:$0xff] }
 0x11e   :  { %2268 = vmatmul.mubr.f32.gmra.mrb[12].mxu1 %v142_v41  ;;  %4854 = vmatpush1.bf16.msra.mxu0 %v4853_v42  ;;  %v366_v41 = vld [vmem:[%s10238_s1 + $0x5b0] sm:$0xff]  ;;  %v4871_v42 = vpack.c.bf16 %v373_v33, %v365_v32  ;;  %v5143_v29 = vpack.c.bf16 %v439_v22, %v431_v21  ;;  %v453_v32 = vld [vmem:[%s10238_s1 + $0x868] sm:$0xff]  ;;  %v447_v33 = vld [vmem:[%s10238_s1 + $0x838] sm:$0xff] }
 0x11f   :  { %5110 = vmatpush1.bf16.msra.mxu1 %v5109_v45  ;;  %1725 = vmatprep.mubr.f32.mxu0 %v151_v48  ;;  %v389_v45 = vld [vmem:[%s10238_s1 + $0x668] sm:$0xff]  ;;  %v5129_v51 = vpack.c.bf16 %v374_v43, %v366_v41  ;;  %v511_v21 = vld [vmem:[%s10238_s1 + $0xa38] sm:$0xff] }
 0x120   :  { %2273 = vmatprep.mubr.f32.mxu1 %v151_v48  ;;  %4856 = vmatprep.subr.bf16.mxu0 %v4855_v49  ;;  %v391_v48 = vld [vmem:[%s10238_s1 + $0x678] sm:$0xff]  ;;  %v182_v49 = vld [vmem:[%s10239_s0 + $0x2f0] sm:$0xff]  ;;  %v461_v43 = vld [vmem:[%s10238_s1 + $0x8a8] sm:$0xff] }
 0x121   :  { %1726 = vmatmul.mubr.f32.gmra.mrb[14].mxu0 %v150_v55  ;;  %5112 = vmatprep.subr.bf16.mxu1 %v5111_v52  ;;  %v4875_v52 = vpack.c.bf16 %v389_v45, %v381_v44  ;;  %v469_v44 = vld [vmem:[%s10238_s1 + $0x8e8] sm:$0xff]  ;;  %v463_v45 = vld [vmem:[%s10238_s1 + $0x8b8] sm:$0xff] }
 0x122   :  { %2274 = vmatmul.mubr.f32.gmra.mrb[14].mxu1 %v150_v55  ;;  %4858 = vmatpush1.bf16.msra.mxu0 %v4857_v56  ;;  %v382_v55 = vld [vmem:[%s10238_s1 + $0x630] sm:$0xff]  ;;  %v5131_v56 = vpack.c.bf16 %v391_v48, %v383_v47  ;;  %v519_v22 = vld [vmem:[%s10238_s1 + $0xa78] sm:$0xff] }
 0x123   :  { %5114 = vmatpush1.bf16.msra.mxu1 %v5113_v59  ;;  %1731 = vmatprep.mubr.f32.mxu0 %v159_v62  ;;  %v405_v59 = vld [vmem:[%s10238_s1 + $0x6e8] sm:$0xff] }
 0x124   :  { %2279 = vmatprep.mubr.f32.mxu1 %v159_v62  ;;  %4860 = vmatprep.subr.bf16.mxu0 %v4859_v63  ;;  %v4877_v62 = vpack.c.bf16 %v388_v54, %v380_v53  ;;  %v5133_v63 = vpack.c.bf16 %v390_v57, %v382_v55  ;;  %v4879_v0 = vpack.c.bf16 %v405_v59, %v397_v58  ;;  %v470_v54 = vld [vmem:[%s10238_s1 + $0x8f0] sm:$0xff]  ;;  %v477_v55 = vld [vmem:[%s10238_s1 + $0x928] sm:$0xff]  ;;  %v5749_v57 = vld [vmem:[%s10239_s0] sm:$0xff] }
 0x125   :  { %1732 = vmatmul.mubr.f32.gmra.mrb[16].mxu0 %v158_v5  ;;  %5116 = vmatprep.subr.bf16.mxu1 %v5115_v2  ;;  %v404_v2 = vld [vmem:[%s10238_s1 + $0x6e0] sm:$0xff]  ;;  %v479_v58 = vld [vmem:[%s10238_s1 + $0x938] sm:$0xff] }
 0x126   :  { %2280 = vmatmul.mubr.f32.gmra.mrb[16].mxu1 %v158_v5  ;;  %4862 = vmatpush1.bf16.msra.mxu0 %v4861_v6  ;;  %v406_v5 = vld [vmem:[%s10238_s1 + $0x6f0] sm:$0xff]  ;;  %v413_v6 = vld [vmem:[%s10238_s1 + $0x728] sm:$0xff]  ;;  %v4881_v11 = vpack.c.bf16 %v404_v2, %v396_v1  ;;  %v487_v59 = vld [vmem:[%s10238_s1 + $0x978] sm:$0xff] }
 0x127   :  { %5118 = vmatpush1.bf16.msra.mxu1 %v5117_v9  ;;  %1737 = vmatprep.mubr.f32.mxu0 %v167_v12  ;;  %v415_v9 = vld [vmem:[%s10238_s1 + $0x738] sm:$0xff]  ;;  %v478_v1 = vld [vmem:[%s10238_s1 + $0x930] sm:$0xff]  ;;  %v5155_v2 = vpack.c.bf16 %v487_v59, %v479_v58 }
 0x128   :  { %2285 = vmatprep.mubr.f32.mxu1 %v167_v12  ;;  %4864 = vmatprep.subr.bf16.mxu0 %v4863_v13  ;;  %v5137_v12 = vpack.c.bf16 %v406_v5, %v398_v3  ;;  %v4883_v13 = vpack.c.bf16 %v421_v7, %v413_v6  ;;  %v5139_v17 = vpack.c.bf16 %v423_v10, %v415_v9  ;;  %v486_v3 = vld [vmem:[%s10238_s1 + $0x970] sm:$0xff]  ;;  %v501_v5 = vld [vmem:[%s10238_s1 + $0x9e8] sm:$0xff]  ;;  %v495_v7 = vld [vmem:[%s10238_s1 + $0x9b8] sm:$0xff] }
 0x129   :  { %1738 = vmatmul.mubr.f32.gmra.mrb[18].mxu0 %v166_v19  ;;  %5120 = vmatprep.subr.bf16.mxu1 %v5119_v16  ;;  %v414_v16 = vld [vmem:[%s10238_s1 + $0x730] sm:$0xff]  ;;  %v5750_v6 = vld [vmem:[%s10239_s0 + $0x48] sm:$0xff]  ;;  %v5751_v9 = vld [vmem:[%s10239_s0 + $0x40] sm:$0xff] }
 0x12a   :  { %2286 = vmatmul.mubr.f32.gmra.mrb[18].mxu1 %v166_v19  ;;  %4866 = vmatpush1.bf16.msra.mxu0 %v4865_v20  ;;  %v429_v19 = vld [vmem:[%s10238_s1 + $0x7a8] sm:$0xff]  ;;  %v5141_v24 = vpack.c.bf16 %v422_v18, %v414_v16  ;;  %v550_v59 = vld [vmem:[%s10238_s1 + $0xb70] sm:$0xff] }
 0x12b   :  { %5122 = vmatpush1.bf16.msra.mxu1 %v5121_v23  ;;  %1743 = vmatprep.mubr.f32.mxu0 %v175_v26  ;;  %v437_v20 = vld [vmem:[%s10238_s1 + $0x7e8] sm:$0xff]  ;;  %v4885_v23 = vpack.c.bf16 %v420_v15, %v412_v14  ;;  %v500_v14 = vld [vmem:[%s10238_s1 + $0x9e0] sm:$0xff]  ;;  %v494_v15 = vld [vmem:[%s10238_s1 + $0x9b0] sm:$0xff] }
 0x12c   :  { %2291 = vmatprep.mubr.f32.mxu1 %v175_v26  ;;  %4868 = vmatprep.subr.bf16.mxu0 %v4867_v27  ;;  %v4887_v25 = vpack.c.bf16 %v437_v20, %v429_v19  ;;  %v428_v26 = vld [vmem:[%s10238_s1 + $0x7a0] sm:$0xff]  ;;  %v509_v18 = vld [vmem:[%s10238_s1 + $0xa28] sm:$0xff] }
 0x12d   :  { %1744 = vmatmul.mubr.f32.gmra.mrb[20].mxu0 %v174_v30  ;;  %5124 = vmatprep.subr.bf16.mxu1 %v5123_v31  ;;  %v436_v27 = vld [vmem:[%s10238_s1 + $0x7e0] sm:$0xff]  ;;  %v445_v31 = vld [vmem:[%s10238_s1 + $0x828] sm:$0xff] }
 0x12e   :  { %2292 = vmatmul.mubr.f32.gmra.mrb[20].mxu1 %v174_v30  ;;  %4870 = vmatpush1.bf16.msra.mxu0 %v4869_v34  ;;  %v438_v30 = vld [vmem:[%s10238_s1 + $0x7f0] sm:$0xff]  ;;  %v455_v34 = vld [vmem:[%s10238_s1 + $0x878] sm:$0xff]  ;;  %v4891_v37 = vpack.c.bf16 %v453_v32, %v445_v31  ;;  %v517_v19 = vld [vmem:[%s10238_s1 + $0xa68] sm:$0xff] }
 0x12f   :  { %5126 = vmatpush1.bf16.msra.mxu1 %v5125_v38  ;;  %1749 = vmatprep.mubr.f32.mxu0 %v183_v35  ;;  %v5145_v36 = vpack.c.bf16 %v438_v30, %v430_v28  ;;  %v444_v38 = vld [vmem:[%s10238_s1 + $0x820] sm:$0xff]  ;;  %v5147_v41 = vpack.c.bf16 %v455_v34, %v447_v33  ;;  %v5752_v20 = vld [vmem:[%s10239_s0 + $0x88] sm:$0xff]  ;;  %v5163_v30 = vpack.c.bf16 %v519_v22, %v511_v21  ;;  %v518_v31 = vld [vmem:[%s10238_s1 + $0xa70] sm:$0xff] }
 0x130   :  { %2297 = vmatprep.mubr.f32.mxu1 %v183_v35  ;;  %4872 = vmatprep.subr.bf16.mxu0 %v4871_v42  ;;  %v4889_v35 = vpack.c.bf16 %v436_v27, %v428_v26  ;;  %v454_v42 = vld [vmem:[%s10238_s1 + $0x870] sm:$0xff]  ;;  %v4893_v47 = vpack.c.bf16 %v452_v39, %v444_v38  ;;  %v4907_v26 = vpack.c.bf16 %v517_v19, %v509_v18  ;;  %v508_v27 = vld [vmem:[%s10238_s1 + $0xa20] sm:$0xff]  ;;  %v525_v32 = vld [vmem:[%s10238_s1 + $0xaa8] sm:$0xff] }
 0x131   :  { %1750 = vmatmul.mubr.f32.gmra.mrb[22].mxu0 %v182_v49  ;;  %5128 = vmatprep.subr.bf16.mxu1 %v5127_v46  ;;  %v471_v46 = vld [vmem:[%s10238_s1 + $0x8f8] sm:$0xff]  ;;  %v5149_v48 = vpack.c.bf16 %v454_v42, %v446_v40  ;;  %v516_v28 = vld [vmem:[%s10238_s1 + $0xa60] sm:$0xff]  ;;  %v533_v33 = vld [vmem:[%s10238_s1 + $0xae8] sm:$0xff] }
 0x132   :  { %2298 = vmatmul.mubr.f32.gmra.mrb[22].mxu1 %v182_v49  ;;  %4874 = vmatpush1.bf16.msra.mxu0 %v4873_v50  ;;  %v4895_v49 = vpack.c.bf16 %v469_v44, %v461_v43  ;;  %v460_v50 = vld [vmem:[%s10238_s1 + $0x8a0] sm:$0xff]  ;;  %v5151_v53 = vpack.c.bf16 %v471_v46, %v463_v45  ;;  %v5754_v34 = vld [vmem:[%s10239_s0 + $0xc8] sm:$0xff]  ;;  %v4909_v38 = vpack.c.bf16 %v516_v28, %v508_v27  ;;  %v526_v43 = vld [vmem:[%s10238_s1 + $0xab0] sm:$0xff] }
 0x133   :  { %5130 = vmatpush1.bf16.msra.mxu1 %v5129_v51  ;;  %4876 = vmatprep.subr.bf16.mxu0 %v4875_v52  ;;  %v468_v51 = vld [vmem:[%s10238_s1 + $0x8e0] sm:$0xff]  ;;  %v462_v52 = vld [vmem:[%s10238_s1 + $0x8b0] sm:$0xff]  ;;  %v4911_v40 = vpack.c.bf16 %v533_v33, %v525_v32  ;;  %v541_v46 = vld [vmem:[%s10238_s1 + $0xb28] sm:$0xff] }
 0x134   :  { %5132 = vmatprep.subr.bf16.mxu1 %v5131_v56  ;;  %2368 = vmatprep.mubr.f32.mxu0 %v5748_v8  ;;  %v485_v56 = vld [vmem:[%s10238_s1 + $0x968] sm:$0xff]  ;;  %v4897_v60 = vpack.c.bf16 %v468_v51, %v460_v50  ;;  %v5153_v61 = vpack.c.bf16 %v470_v54, %v462_v52  ;;  %v532_v42 = vld [vmem:[%s10238_s1 + $0xae0] sm:$0xff]  ;;  %v534_v45 = vld [vmem:[%s10238_s1 + $0xaf0] sm:$0xff] }
 0x135   :  { %2916 = vmatprep.mubr.f32.mxu1 %v5748_v8  ;;  %v503_v8 = vld [vmem:[%s10238_s1 + $0x9f8] sm:$0xff]  ;;  %v5757_v51 = vld [vmem:[%s10239_s0 + $0x100] sm:$0xff]  ;;  %v574_v21 = vld [vmem:[%s10238_s1 + $0xc30] sm:$0xff] }
 0x136   :  { %4878 = vmatpush1.bf16.msra.mxu0 %v4877_v62  ;;  %v4899_v62 = vpack.c.bf16 %v485_v56, %v477_v55  ;;  %v5159_v16 = vpack.c.bf16 %v503_v8, %v495_v7  ;;  %v551_v50 = vld [vmem:[%s10238_s1 + $0xb78] sm:$0xff]  ;;  %v540_v55 = vld [vmem:[%s10238_s1 + $0xb20] sm:$0xff]  ;;  %v558_v7 = vld [vmem:[%s10238_s1 + $0xbb0] sm:$0xff] }
 0x137   :  { %5134 = vmatpush1.bf16.msra.mxu1 %v5133_v63  ;;  %4880 = vmatprep.subr.bf16.mxu0 %v4879_v0  ;;  %v476_v63 = vld [vmem:[%s10238_s1 + $0x920] sm:$0xff]  ;;  %v591_v27 = vld [vmem:[%s10238_s1 + $0xcb8] sm:$0xff] }
 0x138   :  { %5136 = vmatprep.subr.bf16.mxu1 %v5135_v4  ;;  %v484_v0 = vld [vmem:[%s10238_s1 + $0x960] sm:$0xff]  ;;  %v493_v4 = vld [vmem:[%s10238_s1 + $0x9a8] sm:$0xff]  ;;  %v599_v28 = vld [vmem:[%s10238_s1 + $0xcf8] sm:$0xff] }
 0x139   :  { %v4901_v10 = vpack.c.bf16 %v484_v0, %v476_v63  ;;  %v548_v56 = vld [vmem:[%s10238_s1 + $0xb60] sm:$0xff]  ;;  %v559_v63 = vld [vmem:[%s10238_s1 + $0xbb8] sm:$0xff] }
 0x13a   :  { %4882 = vmatpush1.bf16.msra.mxu0 %v4881_v11  ;;  %v5157_v11 = vpack.c.bf16 %v486_v3, %v478_v1  ;;  %v567_v0 = vld [vmem:[%s10238_s1 + $0xbf8] sm:$0xff]  ;;  %v5759_v1 = vld [vmem:[%s10239_s0 + $0x140] sm:$0xff] }
 0x13b   :  { %5138 = vmatpush1.bf16.msra.mxu1 %v5137_v12  ;;  %4884 = vmatprep.subr.bf16.mxu0 %v4883_v13  ;;  %v4903_v12 = vpack.c.bf16 %v501_v5, %v493_v4  ;;  %v492_v13 = vld [vmem:[%s10238_s1 + $0x9a0] sm:$0xff]  ;;  %v5175_v8 = vpack.c.bf16 %v567_v0, %v559_v63  ;;  %v622_v63 = vld [vmem:[%s10238_s1 + $0xdb0] sm:$0xff] }
 0x13c   :  { %5140 = vmatprep.subr.bf16.mxu1 %v5139_v17  ;;  %v502_v17 = vld [vmem:[%s10238_s1 + $0x9f0] sm:$0xff]  ;;  %v556_v5 = vld [vmem:[%s10238_s1 + $0xba0] sm:$0xff] }
 0x13d   :  { %v572_v19 = vld [vmem:[%s10238_s1 + $0xc20] sm:$0xff] }
 0x13e   :  { %4886 = vmatpush1.bf16.msra.mxu0 %v4885_v23  ;;  %v5753_v23 = vld [vmem:[%s10239_s0 + $0x80] sm:$0xff] }
 0x13f   :  { %5142 = vmatpush1.bf16.msra.mxu1 %v5141_v24  ;;  %4888 = vmatprep.subr.bf16.mxu0 %v4887_v25  ;;  %v4905_v24 = vpack.c.bf16 %v500_v14, %v492_v13  ;;  %v5161_v25 = vpack.c.bf16 %v502_v17, %v494_v15  ;;  %v575_v13 = vld [vmem:[%s10238_s1 + $0xc38] sm:$0xff]  ;;  %v5761_v15 = vld [vmem:[%s10239_s0 + $0x180] sm:$0xff] }
 0x140   :  { %5144 = vmatprep.subr.bf16.mxu1 %v5143_v29  ;;  %v510_v29 = vld [vmem:[%s10238_s1 + $0xa30] sm:$0xff]  ;;  %v583_v14 = vld [vmem:[%s10238_s1 + $0xc78] sm:$0xff]  ;;  %v588_v33 = vld [vmem:[%s10238_s1 + $0xca0] sm:$0xff] }
 0x141   :  { %v5165_v39 = vpack.c.bf16 %v518_v31, %v510_v29  ;;  %v5179_v22 = vpack.c.bf16 %v583_v14, %v575_v13  ;;  %v5763_v29 = vld [vmem:[%s10239_s0 + $0x1c0] sm:$0xff]  ;;  %v638_v13 = vld [vmem:[%s10238_s1 + $0xe30] sm:$0xff] }
 0x142   :  { %4890 = vmatpush1.bf16.msra.mxu0 %v4889_v35  ;;  %v527_v35 = vld [vmem:[%s10238_s1 + $0xab8] sm:$0xff] }
 0x143   :  { %5146 = vmatpush1.bf16.msra.mxu1 %v5145_v36  ;;  %4892 = vmatprep.subr.bf16.mxu0 %v4891_v37  ;;  %v535_v36 = vld [vmem:[%s10238_s1 + $0xaf8] sm:$0xff]  ;;  %v5755_v37 = vld [vmem:[%s10239_s0 + $0xc0] sm:$0xff] }
 0x144   :  { %5148 = vmatprep.subr.bf16.mxu1 %v5147_v41  ;;  %v524_v41 = vld [vmem:[%s10238_s1 + $0xaa0] sm:$0xff]  ;;  %v5167_v44 = vpack.c.bf16 %v535_v36, %v527_v35  ;;  %v590_v35 = vld [vmem:[%s10238_s1 + $0xcb0] sm:$0xff]  ;;  %v5183_v36 = vpack.c.bf16 %v599_v28, %v591_v27 }
 0x145   :  { %2369 = vmatmul.mubr.f32.vlgmr.msra.gmra.mrb[24].mxu0 %v5749_v57  ;;  %v4913_v52 = vpack.c.bf16 %v532_v42, %v524_v41  ;;  %v607_v41 = vld [vmem:[%s10238_s1 + $0xd38] sm:$0xff]  ;;  %v654_v27 = vld [vmem:[%s10238_s1 + $0xeb0] sm:$0xff] }
 0x146   :  { %4894 = vmatpush1.bf16.msra.mxu0 %v4893_v47  ;;  %2917 = vmatmul.mubr.f32.vlgmr.msra.gmra.mrb[24].mxu1 %v5749_v57  ;;  %v549_v47 = vld [vmem:[%s10238_s1 + $0xb68] sm:$0xff]  ;;  %v542_v57 = vld [vmem:[%s10238_s1 + $0xb30] sm:$0xff]  ;;  %v615_v42 = vld [vmem:[%s10238_s1 + $0xd78] sm:$0xff] }
 0x147   :  { %5150 = vmatpush1.bf16.msra.mxu1 %v5149_v48  ;;  %4896 = vmatprep.subr.bf16.mxu0 %v4895_v49  ;;  %v5756_v48 = vld [vmem:[%s10239_s0 + $0x108] sm:$0xff]  ;;  %v543_v49 = vld [vmem:[%s10238_s1 + $0xb38] sm:$0xff]  ;;  %v4915_v54 = vpack.c.bf16 %v549_v47, %v541_v46  ;;  %v5173_v3 = vpack.c.bf16 %v550_v59, %v542_v57  ;;  %v604_v47 = vld [vmem:[%s10238_s1 + $0xd20] sm:$0xff] }
 0x148   :  { %5152 = vmatprep.subr.bf16.mxu1 %v5151_v53  ;;  %2374 = vmatprep.mubr.f32.mxu0 %v5750_v6  ;;  %v5169_v53 = vpack.c.bf16 %v534_v45, %v526_v43  ;;  %v5171_v58 = vpack.c.bf16 %v551_v50, %v543_v49  ;;  %v5765_v43 = vld [vmem:[%s10239_s0 + $0x200] sm:$0xff]  ;;  %v606_v49 = vld [vmem:[%s10238_s1 + $0xd30] sm:$0xff]  ;;  %v5187_v50 = vpack.c.bf16 %v615_v42, %v607_v41 }
 0x149   :  { %2922 = vmatprep.mubr.f32.mxu1 %v5750_v6  ;;  %2375 = vmatmul.mubr.f32.gmra.mrb[26].mxu0 %v5751_v9  ;;  %v564_v6 = vld [vmem:[%s10238_s1 + $0xbe0] sm:$0xff]  ;;  %v678_v42 = vld [vmem:[%s10238_s1 + $0xf70] sm:$0xff] }
 0x14a   :  { %4898 = vmatpush1.bf16.msra.mxu0 %v4897_v60  ;;  %2923 = vmatmul.mubr.f32.gmra.mrb[26].mxu1 %v5751_v9  ;;  %v557_v60 = vld [vmem:[%s10238_s1 + $0xba8] sm:$0xff]  ;;  %v566_v9 = vld [vmem:[%s10238_s1 + $0xbf0] sm:$0xff]  ;;  %v5767_v57 = vld [vmem:[%s10239_s0 + $0x240] sm:$0xff] }
 0x14b   :  { %5154 = vmatpush1.bf16.msra.mxu1 %v5153_v61  ;;  %4900 = vmatprep.subr.bf16.mxu0 %v4899_v62  ;;  %v565_v61 = vld [vmem:[%s10238_s1 + $0xbe8] sm:$0xff]  ;;  %v5177_v17 = vpack.c.bf16 %v566_v9, %v558_v7  ;;  %v5769_v7 = vld [vmem:[%s10239_s0 + $0x280] sm:$0xff] }
 0x14c   :  { %5156 = vmatprep.subr.bf16.mxu1 %v5155_v2  ;;  %2380 = vmatprep.mubr.f32.mxu0 %v5752_v20  ;;  %v5758_v62 = vld [vmem:[%s10239_s0 + $0x148] sm:$0xff]  ;;  %v4917_v2 = vpack.c.bf16 %v548_v56, %v540_v55  ;;  %v4919_v4 = vpack.c.bf16 %v565_v61, %v557_v60  ;;  %v623_v55 = vld [vmem:[%s10238_s1 + $0xdb8] sm:$0xff]  ;;  %v620_v61 = vld [vmem:[%s10238_s1 + $0xda0] sm:$0xff] }
 0x14d   :  { %2928 = vmatprep.mubr.f32.mxu1 %v5752_v20  ;;  %2381 = vmatmul.mubr.f32.gmra.mrb[28].mxu0 %v5753_v23  ;;  %v580_v20 = vld [vmem:[%s10238_s1 + $0xc60] sm:$0xff]  ;;  %v631_v56 = vld [vmem:[%s10238_s1 + $0xdf8] sm:$0xff] }
 0x14e   :  { %4902 = vmatpush1.bf16.msra.mxu0 %v4901_v10  ;;  %2929 = vmatmul.mubr.f32.gmra.mrb[28].mxu1 %v5753_v23  ;;  %v573_v10 = vld [vmem:[%s10238_s1 + $0xc28] sm:$0xff]  ;;  %v582_v23 = vld [vmem:[%s10238_s1 + $0xc70] sm:$0xff]  ;;  %v5191_v0 = vpack.c.bf16 %v631_v56, %v623_v55 }
 0x14f   :  { %5158 = vmatpush1.bf16.msra.mxu1 %v5157_v11  ;;  %4904 = vmatprep.subr.bf16.mxu0 %v4903_v12  ;;  %v581_v11 = vld [vmem:[%s10238_s1 + $0xc68] sm:$0xff]  ;;  %v5181_v31 = vpack.c.bf16 %v582_v23, %v574_v21  ;;  %v5771_v21 = vld [vmem:[%s10239_s0 + $0x2c0] sm:$0xff] }
 0x150   :  { %5160 = vmatprep.subr.bf16.mxu1 %v5159_v16  ;;  %2386 = vmatprep.mubr.f32.mxu0 %v5754_v34  ;;  %v5760_v12 = vld [vmem:[%s10239_s0 + $0x188] sm:$0xff]  ;;  %v4921_v16 = vpack.c.bf16 %v564_v6, %v556_v5  ;;  %v4923_v18 = vpack.c.bf16 %v581_v11, %v573_v10  ;;  %v639_v5 = vld [vmem:[%s10238_s1 + $0xe38] sm:$0xff]  ;;  %v636_v11 = vld [vmem:[%s10238_s1 + $0xe20] sm:$0xff] }
 0x151   :  { %2934 = vmatprep.mubr.f32.mxu1 %v5754_v34  ;;  %2387 = vmatmul.mubr.f32.gmra.mrb[30].mxu0 %v5755_v37  ;;  %v596_v34 = vld [vmem:[%s10238_s1 + $0xce0] sm:$0xff]  ;;  %v647_v6 = vld [vmem:[%s10238_s1 + $0xe78] sm:$0xff]  ;;  %v701_v55 = vld [vmem:[%s10238_s1 + $0x1028] sm:$0xff] }
 0x152   :  { %4906 = vmatpush1.bf16.msra.mxu0 %v4905_v24  ;;  %2935 = vmatmul.mubr.f32.gmra.mrb[30].mxu1 %v5755_v37  ;;  %v589_v24 = vld [vmem:[%s10238_s1 + $0xca8] sm:$0xff]  ;;  %v598_v37 = vld [vmem:[%s10238_s1 + $0xcf0] sm:$0xff]  ;;  %v5195_v14 = vpack.c.bf16 %v647_v6, %v639_v5  ;;  %v719_v5 = vld [vmem:[%s10238_s1 + $0x10b8] sm:$0xff] }
 0x153   :  { %5162 = vmatpush1.bf16.msra.mxu1 %v5161_v25  ;;  %4908 = vmatprep.subr.bf16.mxu0 %v4907_v26  ;;  %v597_v25 = vld [vmem:[%s10238_s1 + $0xce8] sm:$0xff]  ;;  %v5185_v45 = vpack.c.bf16 %v598_v37, %v590_v35  ;;  %v727_v6 = vld [vmem:[%s10238_s1 + $0x10f8] sm:$0xff] }
 0x154   :  { %5164 = vmatprep.subr.bf16.mxu1 %v5163_v30  ;;  %2392 = vmatprep.mubr.f32.mxu0 %v5756_v48  ;;  %v5762_v26 = vld [vmem:[%s10239_s0 + $0x1c8] sm:$0xff]  ;;  %v4925_v30 = vpack.c.bf16 %v580_v20, %v572_v19  ;;  %v4927_v32 = vpack.c.bf16 %v597_v25, %v589_v24  ;;  %v655_v19 = vld [vmem:[%s10238_s1 + $0xeb8] sm:$0xff]  ;;  %v652_v25 = vld [vmem:[%s10238_s1 + $0xea0] sm:$0xff] }
 0x155   :  { %2940 = vmatprep.mubr.f32.mxu1 %v5756_v48  ;;  %2393 = vmatmul.mubr.f32.gmra.mrb[32].mxu0 %v5757_v51  ;;  %v612_v48 = vld [vmem:[%s10238_s1 + $0xd60] sm:$0xff]  ;;  %v663_v20 = vld [vmem:[%s10238_s1 + $0xef8] sm:$0xff]  ;;  %v709_v56 = vld [vmem:[%s10238_s1 + $0x1068] sm:$0xff] }
 0x156   :  { %4910 = vmatpush1.bf16.msra.mxu0 %v4909_v38  ;;  %2941 = vmatmul.mubr.f32.gmra.mrb[32].mxu1 %v5757_v51  ;;  %v605_v38 = vld [vmem:[%s10238_s1 + $0xd28] sm:$0xff]  ;;  %v614_v51 = vld [vmem:[%s10238_s1 + $0xd70] sm:$0xff]  ;;  %v5199_v28 = vpack.c.bf16 %v663_v20, %v655_v19  ;;  %v743_v19 = vld [vmem:[%s10238_s1 + $0x1178] sm:$0xff] }
 0x157   :  { %5166 = vmatpush1.bf16.msra.mxu1 %v5165_v39  ;;  %4912 = vmatprep.subr.bf16.mxu0 %v4911_v40  ;;  %v613_v39 = vld [vmem:[%s10238_s1 + $0xd68] sm:$0xff]  ;;  %v5189_v59 = vpack.c.bf16 %v614_v51, %v606_v49  ;;  %v692_v51 = vld [vmem:[%s10238_s1 + $0xfe0] sm:$0xff] }
 0x158   :  { %5168 = vmatprep.subr.bf16.mxu1 %v5167_v44  ;;  %2398 = vmatprep.mubr.f32.mxu0 %v5758_v62  ;;  %v5764_v40 = vld [vmem:[%s10239_s0 + $0x208] sm:$0xff]  ;;  %v4929_v44 = vpack.c.bf16 %v596_v34, %v588_v33  ;;  %v4931_v46 = vpack.c.bf16 %v613_v39, %v605_v38  ;;  %v671_v33 = vld [vmem:[%s10238_s1 + $0xf38] sm:$0xff]  ;;  %v668_v38 = vld [vmem:[%s10238_s1 + $0xf20] sm:$0xff] }
 0x159   :  { %2946 = vmatprep.mubr.f32.mxu1 %v5758_v62  ;;  %2399 = vmatmul.mubr.f32.gmra.mrb[34].mxu0 %v5759_v1  ;;  %v628_v62 = vld [vmem:[%s10238_s1 + $0xde0] sm:$0xff]  ;;  %v679_v34 = vld [vmem:[%s10238_s1 + $0xf78] sm:$0xff] }
 0x15a   :  { %4914 = vmatpush1.bf16.msra.mxu0 %v4913_v52  ;;  %2947 = vmatmul.mubr.f32.gmra.mrb[34].mxu1 %v5759_v1  ;;  %v621_v52 = vld [vmem:[%s10238_s1 + $0xda8] sm:$0xff]  ;;  %v630_v1 = vld [vmem:[%s10238_s1 + $0xdf0] sm:$0xff]  ;;  %v676_v39 = vld [vmem:[%s10238_s1 + $0xf60] sm:$0xff]  ;;  %v5203_v41 = vpack.c.bf16 %v679_v34, %v671_v33 }
 0x15b   :  { %5170 = vmatpush1.bf16.msra.mxu1 %v5169_v53  ;;  %4916 = vmatprep.subr.bf16.mxu0 %v4915_v54  ;;  %v629_v53 = vld [vmem:[%s10238_s1 + $0xde8] sm:$0xff]  ;;  %v5193_v9 = vpack.c.bf16 %v630_v1, %v622_v63  ;;  %v708_v63 = vld [vmem:[%s10238_s1 + $0x1060] sm:$0xff]  ;;  %v5775_v33 = vld [vmem:[%s10239_s0 + $0x50] sm:$0xff] }
 0x15c   :  { %5172 = vmatprep.subr.bf16.mxu1 %v5171_v58  ;;  %2404 = vmatprep.mubr.f32.mxu0 %v5760_v12  ;;  %v5766_v54 = vld [vmem:[%s10239_s0 + $0x248] sm:$0xff]  ;;  %v4933_v58 = vpack.c.bf16 %v612_v48, %v604_v47  ;;  %v4935_v60 = vpack.c.bf16 %v629_v53, %v621_v52  ;;  %v4949_v47 = vpack.c.bf16 %v676_v39, %v668_v38  ;;  %v686_v52 = vld [vmem:[%s10238_s1 + $0xfb0] sm:$0xff]  ;;  %v756_v38 = vld [vmem:[%s10238_s1 + $0x11e0] sm:$0xff] }
 0x15d   :  { %2952 = vmatprep.mubr.f32.mxu1 %v5760_v12  ;;  %2405 = vmatmul.mubr.f32.gmra.mrb[36].mxu0 %v5761_v15  ;;  %v644_v12 = vld [vmem:[%s10238_s1 + $0xe60] sm:$0xff]  ;;  %v750_v39 = vld [vmem:[%s10238_s1 + $0x11b0] sm:$0xff] }
 0x15e   :  { %4918 = vmatpush1.bf16.msra.mxu0 %v4917_v2  ;;  %2953 = vmatmul.mubr.f32.gmra.mrb[36].mxu1 %v5761_v15  ;;  %v637_v2 = vld [vmem:[%s10238_s1 + $0xe28] sm:$0xff]  ;;  %v646_v15 = vld [vmem:[%s10238_s1 + $0xe70] sm:$0xff] }
 0x15f   :  { %5174 = vmatpush1.bf16.msra.mxu1 %v5173_v3  ;;  %4920 = vmatprep.subr.bf16.mxu0 %v4919_v4  ;;  %v645_v3 = vld [vmem:[%s10238_s1 + $0xe68] sm:$0xff]  ;;  %v5197_v23 = vpack.c.bf16 %v646_v15, %v638_v13  ;;  %v5215_v13 = vpack.c.bf16 %v727_v6, %v719_v5  ;;  %v790_v5 = vld [vmem:[%s10238_s1 + $0x12f0] sm:$0xff] }
 0x160   :  { %5176 = vmatprep.subr.bf16.mxu1 %v5175_v8  ;;  %2410 = vmatprep.mubr.f32.mxu0 %v5762_v26  ;;  %v5768_v4 = vld [vmem:[%s10239_s0 + $0x288] sm:$0xff]  ;;  %v4937_v8 = vpack.c.bf16 %v628_v62, %v620_v61  ;;  %v4939_v10 = vpack.c.bf16 %v645_v3, %v637_v2  ;;  %v4955_v61 = vpack.c.bf16 %v709_v56, %v701_v55  ;;  %v700_v62 = vld [vmem:[%s10238_s1 + $0x1020] sm:$0xff]  ;;  %v710_v2 = vld [vmem:[%s10238_s1 + $0x1070] sm:$0xff] }
 0x161   :  { %2958 = vmatprep.mubr.f32.mxu1 %v5762_v26  ;;  %2411 = vmatmul.mubr.f32.gmra.mrb[38].mxu0 %v5763_v29  ;;  %v660_v26 = vld [vmem:[%s10238_s1 + $0xee0] sm:$0xff]  ;;  %v717_v3 = vld [vmem:[%s10238_s1 + $0x10a8] sm:$0xff]  ;;  %v774_v55 = vld [vmem:[%s10238_s1 + $0x1270] sm:$0xff] }
 0x162   :  { %4922 = vmatpush1.bf16.msra.mxu0 %v4921_v16  ;;  %2959 = vmatmul.mubr.f32.gmra.mrb[38].mxu1 %v5763_v29  ;;  %v653_v16 = vld [vmem:[%s10238_s1 + $0xea8] sm:$0xff]  ;;  %v662_v29 = vld [vmem:[%s10238_s1 + $0xef0] sm:$0xff]  ;;  %v4945_v35 = vpack.c.bf16 %v660_v26, %v652_v25 }
 0x163   :  { %5178 = vmatpush1.bf16.msra.mxu1 %v5177_v17  ;;  %4924 = vmatprep.subr.bf16.mxu0 %v4923_v18  ;;  %v661_v17 = vld [vmem:[%s10238_s1 + $0xee8] sm:$0xff]  ;;  %v734_v25 = vld [vmem:[%s10238_s1 + $0x1130] sm:$0xff] }
 0x164   :  { %5180 = vmatprep.subr.bf16.mxu1 %v5179_v22  ;;  %2416 = vmatprep.mubr.f32.mxu0 %v5764_v40  ;;  %v5770_v18 = vld [vmem:[%s10239_s0 + $0x2c8] sm:$0xff]  ;;  %v4941_v22 = vpack.c.bf16 %v644_v12, %v636_v11  ;;  %v4943_v24 = vpack.c.bf16 %v661_v17, %v653_v16  ;;  %v724_v11 = vld [vmem:[%s10238_s1 + $0x10e0] sm:$0xff]  ;;  %v718_v12 = vld [vmem:[%s10238_s1 + $0x10b0] sm:$0xff] }
 0x165   :  { %2964 = vmatprep.mubr.f32.mxu1 %v5764_v40  ;;  %2417 = vmatmul.mubr.f32.gmra.mrb[40].mxu0 %v5765_v43  ;;  %v670_v40 = vld [vmem:[%s10238_s1 + $0xf30] sm:$0xff]  ;;  %v733_v15 = vld [vmem:[%s10238_s1 + $0x1128] sm:$0xff] }
 0x166   :  { %4926 = vmatpush1.bf16.msra.mxu0 %v4925_v30  ;;  %2965 = vmatmul.mubr.f32.gmra.mrb[40].mxu1 %v5765_v43  ;;  %v669_v30 = vld [vmem:[%s10238_s1 + $0xf28] sm:$0xff]  ;;  %v5205_v48 = vpack.c.bf16 %v678_v42, %v670_v40  ;;  %v5773_v17 = vld [vmem:[%s10239_s0 + $0x10] sm:$0xff] }
 0x167   :  { %5182 = vmatpush1.bf16.msra.mxu1 %v5181_v31  ;;  %4928 = vmatprep.subr.bf16.mxu0 %v4927_v32  ;;  %v677_v31 = vld [vmem:[%s10238_s1 + $0xf68] sm:$0xff]  ;;  %v5772_v32 = vld [vmem:[%s10239_s0 + $0x18] sm:$0xff] }
 0x168   :  { %5184 = vmatprep.subr.bf16.mxu1 %v5183_v36  ;;  %2422 = vmatprep.mubr.f32.mxu0 %v5766_v54  ;;  %v5201_v36 = vpack.c.bf16 %v662_v29, %v654_v27  ;;  %v4947_v37 = vpack.c.bf16 %v677_v31, %v669_v30  ;;  %v685_v43 = vld [vmem:[%s10238_s1 + $0xfa8] sm:$0xff]  ;;  %v742_v27 = vld [vmem:[%s10238_s1 + $0x1170] sm:$0xff]  ;;  %v5774_v30 = vld [vmem:[%s10239_s0 + $0x58] sm:$0xff] }
 0x169   :  { %2970 = vmatprep.mubr.f32.mxu1 %v5766_v54  ;;  %2423 = vmatmul.mubr.f32.gmra.mrb[42].mxu0 %v5767_v57  ;;  %v694_v54 = vld [vmem:[%s10238_s1 + $0xff0] sm:$0xff]  ;;  %v741_v16 = vld [vmem:[%s10238_s1 + $0x1168] sm:$0xff]  ;;  %v751_v31 = vld [vmem:[%s10238_s1 + $0x11b8] sm:$0xff] }
 0x16a   :  { %4930 = vmatpush1.bf16.msra.mxu0 %v4929_v44  ;;  %2971 = vmatmul.mubr.f32.gmra.mrb[42].mxu1 %v5767_v57  ;;  %v693_v44 = vld [vmem:[%s10238_s1 + $0xfe8] sm:$0xff]  ;;  %v703_v57 = vld [vmem:[%s10238_s1 + $0x1038] sm:$0xff] }
 0x16b   :  { %5186 = vmatpush1.bf16.msra.mxu1 %v5185_v45  ;;  %4932 = vmatprep.subr.bf16.mxu0 %v4931_v46  ;;  %v687_v45 = vld [vmem:[%s10238_s1 + $0xfb8] sm:$0xff]  ;;  %v4951_v49 = vpack.c.bf16 %v693_v44, %v685_v43  ;;  %v757_v29 = vld [vmem:[%s10238_s1 + $0x11e8] sm:$0xff] }
 0x16c   :  { %5188 = vmatprep.subr.bf16.mxu1 %v5187_v50  ;;  %2428 = vmatprep.mubr.f32.mxu0 %v5768_v4  ;;  %v695_v46 = vld [vmem:[%s10238_s1 + $0xff8] sm:$0xff]  ;;  %v684_v50 = vld [vmem:[%s10238_s1 + $0xfa0] sm:$0xff]  ;;  %v765_v42 = vld [vmem:[%s10238_s1 + $0x1228] sm:$0xff] }
 0x16d   :  { %2976 = vmatprep.mubr.f32.mxu1 %v5768_v4  ;;  %2429 = vmatmul.mubr.f32.gmra.mrb[44].mxu0 %v5769_v7  ;;  %v5207_v53 = vpack.c.bf16 %v695_v46, %v687_v45  ;;  %v725_v4 = vld [vmem:[%s10238_s1 + $0x10e8] sm:$0xff]  ;;  %v5776_v44 = vld [vmem:[%s10239_s0 + $0x98] sm:$0xff] }
 0x16e   :  { %4934 = vmatpush1.bf16.msra.mxu0 %v4933_v58  ;;  %2977 = vmatmul.mubr.f32.gmra.mrb[44].mxu1 %v5769_v7  ;;  %v711_v58 = vld [vmem:[%s10238_s1 + $0x1078] sm:$0xff]  ;;  %v4957_v7 = vpack.c.bf16 %v708_v63, %v700_v62  ;;  %v773_v43 = vld [vmem:[%s10238_s1 + $0x1268] sm:$0xff] }
 0x16f   :  { %5190 = vmatpush1.bf16.msra.mxu1 %v5189_v59  ;;  %4936 = vmatprep.subr.bf16.mxu0 %v4935_v60  ;;  %v4953_v59 = vpack.c.bf16 %v692_v51, %v684_v50  ;;  %v5209_v60 = vpack.c.bf16 %v694_v54, %v686_v52  ;;  %v5211_v1 = vpack.c.bf16 %v711_v58, %v703_v57  ;;  %v767_v45 = vld [vmem:[%s10238_s1 + $0x1238] sm:$0xff]  ;;  %v764_v51 = vld [vmem:[%s10238_s1 + $0x1220] sm:$0xff]  ;;  %v781_v56 = vld [vmem:[%s10238_s1 + $0x12a8] sm:$0xff] }
 0x170   :  { %5192 = vmatprep.subr.bf16.mxu1 %v5191_v0  ;;  %2434 = vmatprep.mubr.f32.mxu0 %v5770_v18  ;;  %v702_v0 = vld [vmem:[%s10238_s1 + $0x1030] sm:$0xff]  ;;  %v775_v46 = vld [vmem:[%s10238_s1 + $0x1278] sm:$0xff]  ;;  %v4971_v50 = vpack.c.bf16 %v773_v43, %v765_v42  ;;  %v772_v52 = vld [vmem:[%s10238_s1 + $0x1260] sm:$0xff] }
 0x171   :  { %2982 = vmatprep.mubr.f32.mxu1 %v5770_v18  ;;  %2435 = vmatmul.mubr.f32.gmra.mrb[46].mxu0 %v5771_v21  ;;  %v735_v18 = vld [vmem:[%s10238_s1 + $0x1138] sm:$0xff]  ;;  %v5227_v54 = vpack.c.bf16 %v775_v46, %v767_v45  ;;  %v789_v57 = vld [vmem:[%s10238_s1 + $0x12e8] sm:$0xff]  ;;  %v4973_v62 = vpack.c.bf16 %v772_v52, %v764_v51  ;;  %v828_v43 = vld [vmem:[%s10238_s1 + $0x1420] sm:$0xff] }
 0x172   :  { %4938 = vmatpush1.bf16.msra.mxu0 %v4937_v8  ;;  %2983 = vmatmul.mubr.f32.gmra.mrb[46].mxu1 %v5771_v21  ;;  %v5213_v8 = vpack.c.bf16 %v710_v2, %v702_v0  ;;  %v5219_v26 = vpack.c.bf16 %v743_v19, %v735_v18  ;;  %v5778_v58 = vld [vmem:[%s10239_s0 + $0xd8] sm:$0xff]  ;;  %v4975_v0 = vpack.c.bf16 %v789_v57, %v781_v56  ;;  %v788_v2 = vld [vmem:[%s10238_s1 + $0x12e0] sm:$0xff]  ;;  %v797_v6 = vld [vmem:[%s10238_s1 + $0x1328] sm:$0xff] }
 0x173   :  { %5194 = vmatpush1.bf16.msra.mxu1 %v5193_v9  ;;  %4940 = vmatprep.subr.bf16.mxu0 %v4939_v10  ;;  %v4959_v9 = vpack.c.bf16 %v725_v4, %v717_v3  ;;  %v716_v10 = vld [vmem:[%s10238_s1 + $0x10a0] sm:$0xff]  ;;  %v782_v3 = vld [vmem:[%s10238_s1 + $0x12b0] sm:$0xff]  ;;  %v847_v51 = vld [vmem:[%s10238_s1 + $0x14b8] sm:$0xff] }
 0x174   :  { %5196 = vmatprep.subr.bf16.mxu1 %v5195_v14  ;;  %2505 = vmatprep.mubr.f32.mxu0 %v5772_v32  ;;  %v726_v14 = vld [vmem:[%s10238_s1 + $0x10f0] sm:$0xff]  ;;  %v4961_v20 = vpack.c.bf16 %v724_v11, %v716_v10  ;;  %v807_v10 = vld [vmem:[%s10238_s1 + $0x1378] sm:$0xff]  ;;  %v844_v57 = vld [vmem:[%s10238_s1 + $0x14a0] sm:$0xff] }
 0x175   :  { %3053 = vmatprep.mubr.f32.mxu1 %v5772_v32  ;;  %v5217_v21 = vpack.c.bf16 %v726_v14, %v718_v12  ;;  %v759_v32 = vld [vmem:[%s10238_s1 + $0x11f8] sm:$0xff]  ;;  %v5781_v11 = vld [vmem:[%s10239_s0 + $0x110] sm:$0xff] }
 0x176   :  { %4942 = vmatpush1.bf16.msra.mxu0 %v4941_v22  ;;  %v4963_v22 = vpack.c.bf16 %v741_v16, %v733_v15  ;;  %v5223_v40 = vpack.c.bf16 %v759_v32, %v751_v31  ;;  %v796_v15 = vld [vmem:[%s10238_s1 + $0x1320] sm:$0xff]  ;;  %v806_v19 = vld [vmem:[%s10238_s1 + $0x1370] sm:$0xff]  ;;  %v855_v52 = vld [vmem:[%s10238_s1 + $0x14f8] sm:$0xff] }
 0x177   :  { %5198 = vmatpush1.bf16.msra.mxu1 %v5197_v23  ;;  %4944 = vmatprep.subr.bf16.mxu0 %v4943_v24  ;;  %v732_v23 = vld [vmem:[%s10238_s1 + $0x1120] sm:$0xff]  ;;  %v814_v31 = vld [vmem:[%s10238_s1 + $0x13b0] sm:$0xff] }
 0x178   :  { %5200 = vmatprep.subr.bf16.mxu1 %v5199_v28  ;;  %v740_v24 = vld [vmem:[%s10238_s1 + $0x1160] sm:$0xff]  ;;  %v749_v28 = vld [vmem:[%s10238_s1 + $0x11a8] sm:$0xff]  ;;  %v830_v45 = vld [vmem:[%s10238_s1 + $0x1430] sm:$0xff] }
 0x179   :  { %v4965_v34 = vpack.c.bf16 %v740_v24, %v732_v23  ;;  %v804_v16 = vld [vmem:[%s10238_s1 + $0x1360] sm:$0xff]  ;;  %v815_v23 = vld [vmem:[%s10238_s1 + $0x13b8] sm:$0xff] }
 0x17a   :  { %4946 = vmatpush1.bf16.msra.mxu0 %v4945_v35  ;;  %v5221_v35 = vpack.c.bf16 %v742_v27, %v734_v25  ;;  %v823_v24 = vld [vmem:[%s10238_s1 + $0x13f8] sm:$0xff]  ;;  %v5783_v25 = vld [vmem:[%s10239_s0 + $0x150] sm:$0xff] }
 0x17b   :  { %5202 = vmatpush1.bf16.msra.mxu1 %v5201_v36  ;;  %4948 = vmatprep.subr.bf16.mxu0 %v4947_v37  ;;  %v4967_v36 = vpack.c.bf16 %v757_v29, %v749_v28  ;;  %v748_v37 = vld [vmem:[%s10238_s1 + $0x11a0] sm:$0xff]  ;;  %v5239_v32 = vpack.c.bf16 %v823_v24, %v815_v23  ;;  %v878_v23 = vld [vmem:[%s10238_s1 + $0x15b0] sm:$0xff] }
 0x17c   :  { %5204 = vmatprep.subr.bf16.mxu1 %v5203_v41  ;;  %v758_v41 = vld [vmem:[%s10238_s1 + $0x11f0] sm:$0xff]  ;;  %v812_v29 = vld [vmem:[%s10238_s1 + $0x13a0] sm:$0xff] }
 0x17e   :  { %4950 = vmatpush1.bf16.msra.mxu0 %v4949_v47  ;;  %v5777_v47 = vld [vmem:[%s10239_s0 + $0x90] sm:$0xff] }
 0x17f   :  { %5206 = vmatpush1.bf16.msra.mxu1 %v5205_v48  ;;  %4952 = vmatprep.subr.bf16.mxu0 %v4951_v49  ;;  %v4969_v48 = vpack.c.bf16 %v756_v38, %v748_v37  ;;  %v5225_v49 = vpack.c.bf16 %v758_v41, %v750_v39  ;;  %v831_v37 = vld [vmem:[%s10238_s1 + $0x1438] sm:$0xff]  ;;  %v5785_v39 = vld [vmem:[%s10239_s0 + $0x190] sm:$0xff] }
 0x180   :  { %5208 = vmatprep.subr.bf16.mxu1 %v5207_v53  ;;  %v766_v53 = vld [vmem:[%s10238_s1 + $0x1230] sm:$0xff]  ;;  %v839_v38 = vld [vmem:[%s10238_s1 + $0x1478] sm:$0xff] }
 0x181   :  { %v5229_v63 = vpack.c.bf16 %v774_v55, %v766_v53  ;;  %v5243_v46 = vpack.c.bf16 %v839_v38, %v831_v37  ;;  %v5787_v53 = vld [vmem:[%s10239_s0 + $0x1d0] sm:$0xff] }
 0x182   :  { %4954 = vmatpush1.bf16.msra.mxu0 %v4953_v59  ;;  %v783_v59 = vld [vmem:[%s10238_s1 + $0x12b8] sm:$0xff]  ;;  %v894_v37 = vld [vmem:[%s10238_s1 + $0x1630] sm:$0xff] }
 0x183   :  { %5210 = vmatpush1.bf16.msra.mxu1 %v5209_v60  ;;  %4956 = vmatprep.subr.bf16.mxu0 %v4955_v61  ;;  %v791_v60 = vld [vmem:[%s10238_s1 + $0x12f8] sm:$0xff]  ;;  %v5779_v61 = vld [vmem:[%s10239_s0 + $0xd0] sm:$0xff] }
 0x184   :  { %5212 = vmatprep.subr.bf16.mxu1 %v5211_v1  ;;  %v780_v1 = vld [vmem:[%s10238_s1 + $0x12a0] sm:$0xff]  ;;  %v5231_v4 = vpack.c.bf16 %v791_v60, %v783_v59  ;;  %v846_v59 = vld [vmem:[%s10238_s1 + $0x14b0] sm:$0xff]  ;;  %v5247_v60 = vpack.c.bf16 %v855_v52, %v847_v51 }
 0x185   :  { %2506 = vmatmul.mubr.f32.vlgmr.msra.gmra.mrb[24].mxu0 %v5773_v17  ;;  %v4977_v12 = vpack.c.bf16 %v788_v2, %v780_v1  ;;  %v863_v1 = vld [vmem:[%s10238_s1 + $0x1538] sm:$0xff]  ;;  %v910_v51 = vld [vmem:[%s10238_s1 + $0x16b0] sm:$0xff] }
 0x186   :  { %4958 = vmatpush1.bf16.msra.mxu0 %v4957_v7  ;;  %3054 = vmatmul.mubr.f32.vlgmr.msra.gmra.mrb[24].mxu1 %v5773_v17  ;;  %v805_v7 = vld [vmem:[%s10238_s1 + $0x1368] sm:$0xff]  ;;  %v798_v17 = vld [vmem:[%s10238_s1 + $0x1330] sm:$0xff]  ;;  %v871_v2 = vld [vmem:[%s10238_s1 + $0x1578] sm:$0xff] }
 0x187   :  { %5214 = vmatpush1.bf16.msra.mxu1 %v5213_v8  ;;  %4960 = vmatprep.subr.bf16.mxu0 %v4959_v9  ;;  %v5780_v8 = vld [vmem:[%s10239_s0 + $0x118] sm:$0xff]  ;;  %v4979_v14 = vpack.c.bf16 %v805_v7, %v797_v6  ;;  %v5237_v27 = vpack.c.bf16 %v806_v19, %v798_v17  ;;  %v860_v7 = vld [vmem:[%s10238_s1 + $0x1520] sm:$0xff]  ;;  %v5791_v17 = vld [vmem:[%s10239_s0 + $0x250] sm:$0xff] }
 0x188   :  { %5216 = vmatprep.subr.bf16.mxu1 %v5215_v13  ;;  %2511 = vmatprep.mubr.f32.mxu0 %v5774_v30  ;;  %v799_v9 = vld [vmem:[%s10238_s1 + $0x1338] sm:$0xff]  ;;  %v5233_v13 = vpack.c.bf16 %v790_v5, %v782_v3  ;;  %v5789_v3 = vld [vmem:[%s10239_s0 + $0x210] sm:$0xff] }
 0x189   :  { %3059 = vmatprep.mubr.f32.mxu1 %v5774_v30  ;;  %2512 = vmatmul.mubr.f32.gmra.mrb[26].mxu0 %v5775_v33  ;;  %v5235_v18 = vpack.c.bf16 %v807_v10, %v799_v9  ;;  %v820_v30 = vld [vmem:[%s10238_s1 + $0x13e0] sm:$0xff]  ;;  %v862_v9 = vld [vmem:[%s10238_s1 + $0x1530] sm:$0xff]  ;;  %v5251_v10 = vpack.c.bf16 %v871_v2, %v863_v1 }
 0x18a   :  { %4962 = vmatpush1.bf16.msra.mxu0 %v4961_v20  ;;  %3060 = vmatmul.mubr.f32.gmra.mrb[26].mxu1 %v5775_v33  ;;  %v813_v20 = vld [vmem:[%s10238_s1 + $0x13a8] sm:$0xff]  ;;  %v822_v33 = vld [vmem:[%s10238_s1 + $0x13f0] sm:$0xff] }
 0x18b   :  { %5218 = vmatpush1.bf16.msra.mxu1 %v5217_v21  ;;  %4964 = vmatprep.subr.bf16.mxu0 %v4963_v22  ;;  %v821_v21 = vld [vmem:[%s10238_s1 + $0x13e8] sm:$0xff]  ;;  %v5782_v22 = vld [vmem:[%s10239_s0 + $0x158] sm:$0xff]  ;;  %v5241_v41 = vpack.c.bf16 %v822_v33, %v814_v31  ;;  %v5793_v31 = vld [vmem:[%s10239_s0 + $0x290] sm:$0xff] }
 0x18c   :  { %5220 = vmatprep.subr.bf16.mxu1 %v5219_v26  ;;  %2517 = vmatprep.mubr.f32.mxu0 %v5776_v44  ;;  %v4981_v26 = vpack.c.bf16 %v804_v16, %v796_v15  ;;  %v4983_v28 = vpack.c.bf16 %v821_v21, %v813_v20  ;;  %v879_v15 = vld [vmem:[%s10238_s1 + $0x15b8] sm:$0xff]  ;;  %v876_v21 = vld [vmem:[%s10238_s1 + $0x15a0] sm:$0xff]  ;;  %v934_v2 = vld [vmem:[%s10238_s1 + $0x1770] sm:$0xff] }
 0x18d   :  { %3065 = vmatprep.mubr.f32.mxu1 %v5776_v44  ;;  %2518 = vmatmul.mubr.f32.gmra.mrb[28].mxu0 %v5777_v47  ;;  %v836_v44 = vld [vmem:[%s10238_s1 + $0x1460] sm:$0xff]  ;;  %v887_v16 = vld [vmem:[%s10238_s1 + $0x15f8] sm:$0xff] }
 0x18e   :  { %4966 = vmatpush1.bf16.msra.mxu0 %v4965_v34  ;;  %3066 = vmatmul.mubr.f32.gmra.mrb[28].mxu1 %v5777_v47  ;;  %v829_v34 = vld [vmem:[%s10238_s1 + $0x1428] sm:$0xff]  ;;  %v838_v47 = vld [vmem:[%s10238_s1 + $0x1470] sm:$0xff]  ;;  %v5255_v24 = vpack.c.bf16 %v887_v16, %v879_v15 }
 0x18f   :  { %5222 = vmatpush1.bf16.msra.mxu1 %v5221_v35  ;;  %4968 = vmatprep.subr.bf16.mxu0 %v4967_v36  ;;  %v837_v35 = vld [vmem:[%s10238_s1 + $0x1468] sm:$0xff]  ;;  %v5784_v36 = vld [vmem:[%s10239_s0 + $0x198] sm:$0xff]  ;;  %v5245_v55 = vpack.c.bf16 %v838_v47, %v830_v45  ;;  %v5795_v45 = vld [vmem:[%s10239_s0 + $0x2d0] sm:$0xff] }
 0x190   :  { %5224 = vmatprep.subr.bf16.mxu1 %v5223_v40  ;;  %2523 = vmatprep.mubr.f32.mxu0 %v5778_v58  ;;  %v4985_v40 = vpack.c.bf16 %v820_v30, %v812_v29  ;;  %v4987_v42 = vpack.c.bf16 %v837_v35, %v829_v34  ;;  %v895_v29 = vld [vmem:[%s10238_s1 + $0x1638] sm:$0xff]  ;;  %v892_v35 = vld [vmem:[%s10238_s1 + $0x1620] sm:$0xff]  ;;  %v957_v15 = vld [vmem:[%s10238_s1 + $0x1828] sm:$0xff] }
 0x191   :  { %3071 = vmatprep.mubr.f32.mxu1 %v5778_v58  ;;  %2524 = vmatmul.mubr.f32.gmra.mrb[30].mxu0 %v5779_v61  ;;  %v852_v58 = vld [vmem:[%s10238_s1 + $0x14e0] sm:$0xff]  ;;  %v903_v30 = vld [vmem:[%s10238_s1 + $0x1678] sm:$0xff]  ;;  %v965_v16 = vld [vmem:[%s10238_s1 + $0x1868] sm:$0xff] }
 0x192   :  { %4970 = vmatpush1.bf16.msra.mxu0 %v4969_v48  ;;  %3072 = vmatmul.mubr.f32.gmra.mrb[30].mxu1 %v5779_v61  ;;  %v845_v48 = vld [vmem:[%s10238_s1 + $0x14a8] sm:$0xff]  ;;  %v854_v61 = vld [vmem:[%s10238_s1 + $0x14f0] sm:$0xff]  ;;  %v5259_v38 = vpack.c.bf16 %v903_v30, %v895_v29  ;;  %v975_v29 = vld [vmem:[%s10238_s1 + $0x18b8] sm:$0xff] }
 0x193   :  { %5226 = vmatpush1.bf16.msra.mxu1 %v5225_v49  ;;  %4972 = vmatprep.subr.bf16.mxu0 %v4971_v50  ;;  %v853_v49 = vld [vmem:[%s10238_s1 + $0x14e8] sm:$0xff]  ;;  %v5786_v50 = vld [vmem:[%s10239_s0 + $0x1d8] sm:$0xff]  ;;  %v5249_v5 = vpack.c.bf16 %v854_v61, %v846_v59 }
 0x194   :  { %5228 = vmatprep.subr.bf16.mxu1 %v5227_v54  ;;  %2529 = vmatprep.mubr.f32.mxu0 %v5780_v8  ;;  %v4989_v54 = vpack.c.bf16 %v836_v44, %v828_v43  ;;  %v4991_v56 = vpack.c.bf16 %v853_v49, %v845_v48  ;;  %v911_v43 = vld [vmem:[%s10238_s1 + $0x16b8] sm:$0xff]  ;;  %v908_v49 = vld [vmem:[%s10238_s1 + $0x16a0] sm:$0xff] }
 0x195   :  { %3077 = vmatprep.mubr.f32.mxu1 %v5780_v8  ;;  %2530 = vmatmul.mubr.f32.gmra.mrb[32].mxu0 %v5781_v11  ;;  %v868_v8 = vld [vmem:[%s10238_s1 + $0x1560] sm:$0xff]  ;;  %v919_v44 = vld [vmem:[%s10238_s1 + $0x16f8] sm:$0xff] }
 0x196   :  { %4974 = vmatpush1.bf16.msra.mxu0 %v4973_v62  ;;  %3078 = vmatmul.mubr.f32.gmra.mrb[32].mxu1 %v5781_v11  ;;  %v861_v62 = vld [vmem:[%s10238_s1 + $0x1528] sm:$0xff]  ;;  %v870_v11 = vld [vmem:[%s10238_s1 + $0x1570] sm:$0xff]  ;;  %v5263_v52 = vpack.c.bf16 %v919_v44, %v911_v43  ;;  %v983_v30 = vld [vmem:[%s10238_s1 + $0x18f8] sm:$0xff] }
 0x197   :  { %5230 = vmatpush1.bf16.msra.mxu1 %v5229_v63  ;;  %4976 = vmatprep.subr.bf16.mxu0 %v4975_v0  ;;  %v869_v63 = vld [vmem:[%s10238_s1 + $0x1568] sm:$0xff]  ;;  %v5788_v0 = vld [vmem:[%s10239_s0 + $0x218] sm:$0xff]  ;;  %v5253_v19 = vpack.c.bf16 %v870_v11, %v862_v9  ;;  %v948_v11 = vld [vmem:[%s10238_s1 + $0x17e0] sm:$0xff] }
 0x198   :  { %5232 = vmatprep.subr.bf16.mxu1 %v5231_v4  ;;  %2535 = vmatprep.mubr.f32.mxu0 %v5782_v22  ;;  %v4993_v4 = vpack.c.bf16 %v852_v58, %v844_v57  ;;  %v4995_v6 = vpack.c.bf16 %v869_v63, %v861_v62  ;;  %v927_v57 = vld [vmem:[%s10238_s1 + $0x1738] sm:$0xff]  ;;  %v924_v62 = vld [vmem:[%s10238_s1 + $0x1720] sm:$0xff] }
 0x199   :  { %3083 = vmatprep.mubr.f32.mxu1 %v5782_v22  ;;  %2536 = vmatmul.mubr.f32.gmra.mrb[34].mxu0 %v5783_v25  ;;  %v884_v22 = vld [vmem:[%s10238_s1 + $0x15e0] sm:$0xff]  ;;  %v935_v58 = vld [vmem:[%s10238_s1 + $0x1778] sm:$0xff] }
 0x19a   :  { %4978 = vmatpush1.bf16.msra.mxu0 %v4977_v12  ;;  %3084 = vmatmul.mubr.f32.gmra.mrb[34].mxu1 %v5783_v25  ;;  %v877_v12 = vld [vmem:[%s10238_s1 + $0x15a8] sm:$0xff]  ;;  %v886_v25 = vld [vmem:[%s10238_s1 + $0x15f0] sm:$0xff]  ;;  %v932_v63 = vld [vmem:[%s10238_s1 + $0x1760] sm:$0xff]  ;;  %v5267_v1 = vpack.c.bf16 %v935_v58, %v927_v57 }
 0x19b   :  { %5234 = vmatpush1.bf16.msra.mxu1 %v5233_v13  ;;  %4980 = vmatprep.subr.bf16.mxu0 %v4979_v14  ;;  %v885_v13 = vld [vmem:[%s10238_s1 + $0x15e8] sm:$0xff]  ;;  %v5790_v14 = vld [vmem:[%s10239_s0 + $0x258] sm:$0xff]  ;;  %v5257_v33 = vpack.c.bf16 %v886_v25, %v878_v23  ;;  %v964_v23 = vld [vmem:[%s10238_s1 + $0x1860] sm:$0xff] }
 0x19c   :  { %5236 = vmatprep.subr.bf16.mxu1 %v5235_v18  ;;  %2541 = vmatprep.mubr.f32.mxu0 %v5784_v36  ;;  %v4997_v18 = vpack.c.bf16 %v868_v8, %v860_v7  ;;  %v4999_v20 = vpack.c.bf16 %v885_v13, %v877_v12  ;;  %v5013_v7 = vpack.c.bf16 %v932_v63, %v924_v62  ;;  %v942_v12 = vld [vmem:[%s10238_s1 + $0x17b0] sm:$0xff]  ;;  %v999_v43 = vld [vmem:[%s10238_s1 + $0x1978] sm:$0xff]  ;;  %v5799_v57 = vld [vmem:[%s10239_s0 + $0x60] sm:$0xff] }
 0x19d   :  { %3089 = vmatprep.mubr.f32.mxu1 %v5784_v36  ;;  %2542 = vmatmul.mubr.f32.gmra.mrb[36].mxu0 %v5785_v39  ;;  %v900_v36 = vld [vmem:[%s10238_s1 + $0x1660] sm:$0xff]  ;;  %v1006_v63 = vld [vmem:[%s10238_s1 + $0x19b0] sm:$0xff] }
 0x19e   :  { %4982 = vmatpush1.bf16.msra.mxu0 %v4981_v26  ;;  %3090 = vmatmul.mubr.f32.gmra.mrb[36].mxu1 %v5785_v39  ;;  %v893_v26 = vld [vmem:[%s10238_s1 + $0x1628] sm:$0xff]  ;;  %v902_v39 = vld [vmem:[%s10238_s1 + $0x1670] sm:$0xff]  ;;  %v1012_v62 = vld [vmem:[%s10238_s1 + $0x19e0] sm:$0xff] }
 0x19f   :  { %5238 = vmatpush1.bf16.msra.mxu1 %v5237_v27  ;;  %4984 = vmatprep.subr.bf16.mxu0 %v4983_v28  ;;  %v901_v27 = vld [vmem:[%s10238_s1 + $0x1668] sm:$0xff]  ;;  %v5792_v28 = vld [vmem:[%s10239_s0 + $0x298] sm:$0xff]  ;;  %v5261_v47 = vpack.c.bf16 %v902_v39, %v894_v37  ;;  %v5279_v37 = vpack.c.bf16 %v983_v30, %v975_v29  ;;  %v1046_v29 = vld [vmem:[%s10238_s1 + $0x1af0] sm:$0xff] }
 0x1a0   :  { %5240 = vmatprep.subr.bf16.mxu1 %v5239_v32  ;;  %2547 = vmatprep.mubr.f32.mxu0 %v5786_v50  ;;  %v5001_v32 = vpack.c.bf16 %v884_v22, %v876_v21  ;;  %v5003_v34 = vpack.c.bf16 %v901_v27, %v893_v26  ;;  %v5019_v21 = vpack.c.bf16 %v965_v16, %v957_v15  ;;  %v956_v22 = vld [vmem:[%s10238_s1 + $0x1820] sm:$0xff]  ;;  %v966_v26 = vld [vmem:[%s10238_s1 + $0x1870] sm:$0xff]  ;;  %v973_v27 = vld [vmem:[%s10238_s1 + $0x18a8] sm:$0xff] }
 0x1a1   :  { %3095 = vmatprep.mubr.f32.mxu1 %v5786_v50  ;;  %2548 = vmatmul.mubr.f32.gmra.mrb[38].mxu0 %v5787_v53  ;;  %v916_v50 = vld [vmem:[%s10238_s1 + $0x16e0] sm:$0xff]  ;;  %v989_v39 = vld [vmem:[%s10238_s1 + $0x1928] sm:$0xff]  ;;  %v1030_v15 = vld [vmem:[%s10238_s1 + $0x1a70] sm:$0xff] }
 0x1a2   :  { %4986 = vmatpush1.bf16.msra.mxu0 %v4985_v40  ;;  %3096 = vmatmul.mubr.f32.gmra.mrb[38].mxu1 %v5787_v53  ;;  %v909_v40 = vld [vmem:[%s10238_s1 + $0x16a8] sm:$0xff]  ;;  %v918_v53 = vld [vmem:[%s10238_s1 + $0x16f0] sm:$0xff]  ;;  %v5009_v59 = vpack.c.bf16 %v916_v50, %v908_v49 }
 0x1a3   :  { %5242 = vmatpush1.bf16.msra.mxu1 %v5241_v41  ;;  %4988 = vmatprep.subr.bf16.mxu0 %v4987_v42  ;;  %v917_v41 = vld [vmem:[%s10238_s1 + $0x16e8] sm:$0xff]  ;;  %v5794_v42 = vld [vmem:[%s10239_s0 + $0x2d8] sm:$0xff]  ;;  %v990_v49 = vld [vmem:[%s10238_s1 + $0x1930] sm:$0xff] }
 0x1a4   :  { %5244 = vmatprep.subr.bf16.mxu1 %v5243_v46  ;;  %2553 = vmatprep.mubr.f32.mxu0 %v5788_v0  ;;  %v5005_v46 = vpack.c.bf16 %v900_v36, %v892_v35  ;;  %v5007_v48 = vpack.c.bf16 %v917_v41, %v909_v40  ;;  %v980_v35 = vld [vmem:[%s10238_s1 + $0x18e0] sm:$0xff]  ;;  %v974_v36 = vld [vmem:[%s10238_s1 + $0x18b0] sm:$0xff]  ;;  %v997_v40 = vld [vmem:[%s10238_s1 + $0x1968] sm:$0xff] }
 0x1a5   :  { %3101 = vmatprep.mubr.f32.mxu1 %v5788_v0  ;;  %2554 = vmatmul.mubr.f32.gmra.mrb[40].mxu0 %v5789_v3  ;;  %v926_v0 = vld [vmem:[%s10238_s1 + $0x1730] sm:$0xff]  ;;  %v5797_v41 = vld [vmem:[%s10239_s0 + $0x20] sm:$0xff]  ;;  %v1037_v16 = vld [vmem:[%s10238_s1 + $0x1aa8] sm:$0xff] }
 0x1a6   :  { %4990 = vmatpush1.bf16.msra.mxu0 %v4989_v54  ;;  %3102 = vmatmul.mubr.f32.gmra.mrb[40].mxu1 %v5789_v3  ;;  %v925_v54 = vld [vmem:[%s10238_s1 + $0x1728] sm:$0xff]  ;;  %v5269_v8 = vpack.c.bf16 %v934_v2, %v926_v0 }
 0x1a7   :  { %5246 = vmatpush1.bf16.msra.mxu1 %v5245_v55  ;;  %4992 = vmatprep.subr.bf16.mxu0 %v4991_v56  ;;  %v933_v55 = vld [vmem:[%s10238_s1 + $0x1768] sm:$0xff] }
 0x1a8   :  { %5248 = vmatprep.subr.bf16.mxu1 %v5247_v60  ;;  %2559 = vmatprep.mubr.f32.mxu0 %v5790_v14  ;;  %v5796_v56 = vld [vmem:[%s10239_s0 + $0x28] sm:$0xff]  ;;  %v5265_v60 = vpack.c.bf16 %v918_v53, %v910_v51  ;;  %v5011_v61 = vpack.c.bf16 %v933_v55, %v925_v54  ;;  %v998_v51 = vld [vmem:[%s10238_s1 + $0x1970] sm:$0xff]  ;;  %v1007_v55 = vld [vmem:[%s10238_s1 + $0x19b8] sm:$0xff] }
 0x1a9   :  { %3107 = vmatprep.mubr.f32.mxu1 %v5790_v14  ;;  %2560 = vmatmul.mubr.f32.gmra.mrb[42].mxu0 %v5791_v17  ;;  %v941_v3 = vld [vmem:[%s10238_s1 + $0x17a8] sm:$0xff]  ;;  %v950_v14 = vld [vmem:[%s10238_s1 + $0x17f0] sm:$0xff] }
 0x1aa   :  { %4994 = vmatpush1.bf16.msra.mxu0 %v4993_v4  ;;  %3108 = vmatmul.mubr.f32.gmra.mrb[42].mxu1 %v5791_v17  ;;  %v949_v4 = vld [vmem:[%s10238_s1 + $0x17e8] sm:$0xff]  ;;  %v959_v17 = vld [vmem:[%s10238_s1 + $0x1838] sm:$0xff] }
 0x1ab   :  { %5250 = vmatpush1.bf16.msra.mxu1 %v5249_v5  ;;  %4996 = vmatprep.subr.bf16.mxu0 %v4995_v6  ;;  %v943_v5 = vld [vmem:[%s10238_s1 + $0x17b8] sm:$0xff]  ;;  %v5015_v9 = vpack.c.bf16 %v949_v4, %v941_v3  ;;  %v1013_v53 = vld [vmem:[%s10238_s1 + $0x19e8] sm:$0xff] }
 0x1ac   :  { %5252 = vmatprep.subr.bf16.mxu1 %v5251_v10  ;;  %2565 = vmatprep.mubr.f32.mxu0 %v5792_v28  ;;  %v951_v6 = vld [vmem:[%s10238_s1 + $0x17f8] sm:$0xff]  ;;  %v940_v10 = vld [vmem:[%s10238_s1 + $0x17a0] sm:$0xff]  ;;  %v5798_v54 = vld [vmem:[%s10239_s0 + $0x68] sm:$0xff] }
 0x1ad   :  { %3113 = vmatprep.mubr.f32.mxu1 %v5792_v28  ;;  %2566 = vmatmul.mubr.f32.gmra.mrb[44].mxu0 %v5793_v31  ;;  %v5271_v13 = vpack.c.bf16 %v951_v6, %v943_v5  ;;  %v981_v28 = vld [vmem:[%s10238_s1 + $0x18e8] sm:$0xff]  ;;  %v1023_v5 = vld [vmem:[%s10238_s1 + $0x1a38] sm:$0xff] }
 0x1ae   :  { %4998 = vmatpush1.bf16.msra.mxu0 %v4997_v18  ;;  %3114 = vmatmul.mubr.f32.gmra.mrb[44].mxu1 %v5793_v31  ;;  %v967_v18 = vld [vmem:[%s10238_s1 + $0x1878] sm:$0xff]  ;;  %v5021_v31 = vpack.c.bf16 %v964_v23, %v956_v22  ;;  %v1021_v2 = vld [vmem:[%s10238_s1 + $0x1a28] sm:$0xff] }
 0x1af   :  { %5254 = vmatpush1.bf16.msra.mxu1 %v5253_v19  ;;  %5000 = vmatprep.subr.bf16.mxu0 %v4999_v20  ;;  %v5017_v19 = vpack.c.bf16 %v948_v11, %v940_v10  ;;  %v5273_v20 = vpack.c.bf16 %v950_v14, %v942_v12  ;;  %v5275_v25 = vpack.c.bf16 %v967_v18, %v959_v17  ;;  %v1029_v3 = vld [vmem:[%s10238_s1 + $0x1a68] sm:$0xff]  ;;  %v1031_v6 = vld [vmem:[%s10238_s1 + $0x1a78] sm:$0xff]  ;;  %v1020_v11 = vld [vmem:[%s10238_s1 + $0x1a20] sm:$0xff] }
 0x1b0   :  { %5256 = vmatprep.subr.bf16.mxu1 %v5255_v24  ;;  %2571 = vmatprep.mubr.f32.mxu0 %v5794_v42  ;;  %v958_v24 = vld [vmem:[%s10238_s1 + $0x1830] sm:$0xff]  ;;  %v5800_v4 = vld [vmem:[%s10239_s0 + $0xa8] sm:$0xff]  ;;  %v5035_v10 = vpack.c.bf16 %v1029_v3, %v1021_v2  ;;  %v1028_v12 = vld [vmem:[%s10238_s1 + $0x1a60] sm:$0xff]  ;;  %v5291_v14 = vpack.c.bf16 %v1031_v6, %v1023_v5 }
 0x1b1   :  { %3119 = vmatprep.mubr.f32.mxu1 %v5794_v42  ;;  %2572 = vmatmul.mubr.f32.gmra.mrb[46].mxu0 %v5795_v45  ;;  %v991_v42 = vld [vmem:[%s10238_s1 + $0x1938] sm:$0xff]  ;;  %v1045_v17 = vld [vmem:[%s10238_s1 + $0x1ae8] sm:$0xff]  ;;  %v5037_v22 = vpack.c.bf16 %v1028_v12, %v1020_v11  ;;  %v5809_v6 = vld [vmem:[%s10239_s0 + $0x1a0] sm:$0xff] }
 0x1b2   :  { %5002 = vmatpush1.bf16.msra.mxu0 %v5001_v32  ;;  %3120 = vmatmul.mubr.f32.gmra.mrb[46].mxu1 %v5795_v45  ;;  %v5277_v32 = vpack.c.bf16 %v966_v26, %v958_v24  ;;  %v5283_v50 = vpack.c.bf16 %v999_v43, %v991_v42  ;;  %v5802_v18 = vld [vmem:[%s10239_s0 + $0xe8] sm:$0xff]  ;;  %v5039_v24 = vpack.c.bf16 %v1045_v17, %v1037_v16  ;;  %v1044_v26 = vld [vmem:[%s10238_s1 + $0x1ae0] sm:$0xff]  ;;  %v1095_v5 = vld [vmem:[%s10238_s1 + $0x1c78] sm:$0xff] }
 0x1b3   :  { %5258 = vmatpush1.bf16.msra.mxu1 %v5257_v33  ;;  %5004 = vmatprep.subr.bf16.mxu0 %v5003_v34  ;;  %v5023_v33 = vpack.c.bf16 %v981_v28, %v973_v27  ;;  %v972_v34 = vld [vmem:[%s10238_s1 + $0x18a0] sm:$0xff]  ;;  %v1038_v27 = vld [vmem:[%s10238_s1 + $0x1ab0] sm:$0xff]  ;;  %v1053_v30 = vld [vmem:[%s10238_s1 + $0x1b28] sm:$0xff] }
 0x1b4   :  { %5260 = vmatprep.subr.bf16.mxu1 %v5259_v38  ;;  %2642 = vmatprep.mubr.f32.mxu0 %v5796_v56  ;;  %v982_v38 = vld [vmem:[%s10238_s1 + $0x18f0] sm:$0xff]  ;;  %v5025_v44 = vpack.c.bf16 %v980_v35, %v972_v34  ;;  %v1063_v34 = vld [vmem:[%s10238_s1 + $0x1b78] sm:$0xff]  ;;  %v5805_v35 = vld [vmem:[%s10239_s0 + $0x120] sm:$0xff] }
 0x1b5   :  { %3190 = vmatprep.mubr.f32.mxu1 %v5796_v56  ;;  %v5281_v45 = vpack.c.bf16 %v982_v38, %v974_v36  ;;  %v1015_v56 = vld [vmem:[%s10238_s1 + $0x19f8] sm:$0xff]  ;;  %v1084_v11 = vld [vmem:[%s10238_s1 + $0x1c20] sm:$0xff]  ;;  %v1094_v16 = vld [vmem:[%s10238_s1 + $0x1c70] sm:$0xff] }
 0x1b6   :  { %5006 = vmatpush1.bf16.msra.mxu0 %v5005_v46  ;;  %v5027_v46 = vpack.c.bf16 %v997_v40, %v989_v39  ;;  %v5287_v0 = vpack.c.bf16 %v1015_v56, %v1007_v55  ;;  %v1052_v39 = vld [vmem:[%s10238_s1 + $0x1b20] sm:$0xff]  ;;  %v1101_v17 = vld [vmem:[%s10238_s1 + $0x1ca8] sm:$0xff] }
 0x1b7   :  { %5262 = vmatpush1.bf16.msra.mxu1 %v5261_v47  ;;  %5008 = vmatprep.subr.bf16.mxu0 %v5007_v48  ;;  %v988_v47 = vld [vmem:[%s10238_s1 + $0x1920] sm:$0xff] }
 0x1b8   :  { %5264 = vmatprep.subr.bf16.mxu1 %v5263_v52  ;;  %v996_v48 = vld [vmem:[%s10238_s1 + $0x1960] sm:$0xff]  ;;  %v1005_v52 = vld [vmem:[%s10238_s1 + $0x19a8] sm:$0xff] }
 0x1b9   :  { %v5029_v58 = vpack.c.bf16 %v996_v48, %v988_v47  ;;  %v1060_v40 = vld [vmem:[%s10238_s1 + $0x1b60] sm:$0xff]  ;;  %v5806_v47 = vld [vmem:[%s10239_s0 + $0x168] sm:$0xff] }
 0x1ba   :  { %5010 = vmatpush1.bf16.msra.mxu0 %v5009_v59  ;;  %v5285_v59 = vpack.c.bf16 %v998_v51, %v990_v49  ;;  %v1079_v51 = vld [vmem:[%s10238_s1 + $0x1bf8] sm:$0xff]  ;;  %v1092_v12 = vld [vmem:[%s10238_s1 + $0x1c60] sm:$0xff] }
 0x1bb   :  { %5266 = vmatpush1.bf16.msra.mxu1 %v5265_v60  ;;  %5012 = vmatprep.subr.bf16.mxu0 %v5011_v61  ;;  %v5031_v60 = vpack.c.bf16 %v1013_v53, %v1005_v52  ;;  %v1004_v61 = vld [vmem:[%s10238_s1 + $0x19a0] sm:$0xff] }
 0x1bc   :  { %5268 = vmatprep.subr.bf16.mxu1 %v5267_v1  ;;  %v1014_v1 = vld [vmem:[%s10238_s1 + $0x19f0] sm:$0xff]  ;;  %v5807_v52 = vld [vmem:[%s10239_s0 + $0x160] sm:$0xff] }
 0x1be   :  { %5014 = vmatpush1.bf16.msra.mxu0 %v5013_v7  ;;  %v5801_v7 = vld [vmem:[%s10239_s0 + $0xa0] sm:$0xff] }
 0x1bf   :  { %5270 = vmatpush1.bf16.msra.mxu1 %v5269_v8  ;;  %5016 = vmatprep.subr.bf16.mxu0 %v5015_v9  ;;  %v5033_v8 = vpack.c.bf16 %v1012_v62, %v1004_v61  ;;  %v5289_v9 = vpack.c.bf16 %v1014_v1, %v1006_v63  ;;  %v1078_v62 = vld [vmem:[%s10238_s1 + $0x1bf0] sm:$0xff]  ;;  %v1085_v63 = vld [vmem:[%s10238_s1 + $0x1c28] sm:$0xff] }
 0x1c0   :  { %5272 = vmatprep.subr.bf16.mxu1 %v5271_v13  ;;  %v1022_v13 = vld [vmem:[%s10238_s1 + $0x1a30] sm:$0xff]  ;;  %v5808_v1 = vld [vmem:[%s10239_s0 + $0x1a8] sm:$0xff] }
 0x1c1   :  { %v5293_v23 = vpack.c.bf16 %v1030_v15, %v1022_v13  ;;  %v1086_v13 = vld [vmem:[%s10238_s1 + $0x1c30] sm:$0xff] }
 0x1c2   :  { %5018 = vmatpush1.bf16.msra.mxu0 %v5017_v19  ;;  %v1039_v19 = vld [vmem:[%s10238_s1 + $0x1ab8] sm:$0xff] }
 0x1c3   :  { %5274 = vmatpush1.bf16.msra.mxu1 %v5273_v20  ;;  %5020 = vmatprep.subr.bf16.mxu0 %v5019_v21  ;;  %v1047_v20 = vld [vmem:[%s10238_s1 + $0x1af8] sm:$0xff]  ;;  %v5803_v21 = vld [vmem:[%s10239_s0 + $0xe0] sm:$0xff] }
 0x1c4   :  { %5276 = vmatprep.subr.bf16.mxu1 %v5275_v25  ;;  %v1036_v25 = vld [vmem:[%s10238_s1 + $0x1aa0] sm:$0xff]  ;;  %v5295_v28 = vpack.c.bf16 %v1047_v20, %v1039_v19  ;;  %v5810_v19 = vld [vmem:[%s10239_s0 + $0x1e8] sm:$0xff] }
 0x1c5   :  { %2643 = vmatmul.mubr.f32.vlgmr.msra.gmra.mrb[24].mxu0 %v5797_v41  ;;  %v5041_v36 = vpack.c.bf16 %v1044_v26, %v1036_v25  ;;  %v5053_v26 = vpack.c.bf16 %v1092_v12, %v1084_v11  ;;  %v1134_v11 = vld [vmem:[%s10238_s1 + $0x1db0] sm:$0xff] }
 0x1c6   :  { %5022 = vmatpush1.bf16.msra.mxu0 %v5021_v31  ;;  %3191 = vmatmul.mubr.f32.vlgmr.msra.gmra.mrb[24].mxu1 %v5797_v41  ;;  %v1061_v31 = vld [vmem:[%s10238_s1 + $0x1b68] sm:$0xff]  ;;  %v1054_v41 = vld [vmem:[%s10238_s1 + $0x1b30] sm:$0xff] }
 0x1c7   :  { %5278 = vmatpush1.bf16.msra.mxu1 %v5277_v32  ;;  %5024 = vmatprep.subr.bf16.mxu0 %v5023_v33  ;;  %v5804_v32 = vld [vmem:[%s10239_s0 + $0x128] sm:$0xff]  ;;  %v1055_v33 = vld [vmem:[%s10238_s1 + $0x1b38] sm:$0xff]  ;;  %v5043_v38 = vpack.c.bf16 %v1061_v31, %v1053_v30  ;;  %v1108_v30 = vld [vmem:[%s10238_s1 + $0x1ce0] sm:$0xff] }
 0x1c8   :  { %5280 = vmatprep.subr.bf16.mxu1 %v5279_v37  ;;  %2648 = vmatprep.mubr.f32.mxu0 %v5798_v54  ;;  %v5297_v37 = vpack.c.bf16 %v1046_v29, %v1038_v27  ;;  %v5299_v43 = vpack.c.bf16 %v1063_v34, %v1055_v33  ;;  %v5309_v27 = vpack.c.bf16 %v1094_v16, %v1086_v13  ;;  %v1100_v29 = vld [vmem:[%s10238_s1 + $0x1ca0] sm:$0xff]  ;;  %v1102_v31 = vld [vmem:[%s10238_s1 + $0x1cb0] sm:$0xff]  ;;  %v1149_v16 = vld [vmem:[%s10238_s1 + $0x1e28] sm:$0xff] }
 0x1c9   :  { %3196 = vmatprep.mubr.f32.mxu1 %v5798_v54  ;;  %2649 = vmatmul.mubr.f32.gmra.mrb[26].mxu0 %v5799_v57  ;;  %v5045_v54 = vpack.c.bf16 %v1060_v40, %v1052_v39  ;;  %v1110_v34 = vld [vmem:[%s10238_s1 + $0x1cf0] sm:$0xff]  ;;  %v1119_v40 = vld [vmem:[%s10238_s1 + $0x1d38] sm:$0xff] }
 0x1ca   :  { %5026 = vmatpush1.bf16.msra.mxu0 %v5025_v44  ;;  %3197 = vmatmul.mubr.f32.gmra.mrb[26].mxu1 %v5799_v57  ;;  %v1062_v44 = vld [vmem:[%s10238_s1 + $0x1b70] sm:$0xff]  ;;  %v1068_v57 = vld [vmem:[%s10238_s1 + $0x1ba0] sm:$0xff] }
 0x1cb   :  { %5282 = vmatpush1.bf16.msra.mxu1 %v5281_v45  ;;  %5028 = vmatprep.subr.bf16.mxu0 %v5027_v46  ;;  %v1069_v45 = vld [vmem:[%s10238_s1 + $0x1ba8] sm:$0xff]  ;;  %v5301_v55 = vpack.c.bf16 %v1062_v44, %v1054_v41  ;;  %v1127_v41 = vld [vmem:[%s10238_s1 + $0x1d78] sm:$0xff] }
 0x1cc   :  { %5284 = vmatprep.subr.bf16.mxu1 %v5283_v50  ;;  %2654 = vmatprep.mubr.f32.mxu0 %v5800_v4  ;;  %v1077_v46 = vld [vmem:[%s10238_s1 + $0x1be8] sm:$0xff]  ;;  %v1071_v50 = vld [vmem:[%s10238_s1 + $0x1bb8] sm:$0xff] }
 0x1cd   :  { %3202 = vmatprep.mubr.f32.mxu1 %v5800_v4  ;;  %2655 = vmatmul.mubr.f32.gmra.mrb[28].mxu0 %v5801_v7  ;;  %v5047_v56 = vpack.c.bf16 %v1077_v46, %v1069_v45  ;;  %v5303_v61 = vpack.c.bf16 %v1079_v51, %v1071_v50  ;;  %v1087_v4 = vld [vmem:[%s10238_s1 + $0x1c38] sm:$0xff]  ;;  %v5057_v45 = vpack.c.bf16 %v1108_v30, %v1100_v29  ;;  %v1116_v50 = vld [vmem:[%s10238_s1 + $0x1d20] sm:$0xff] }
 0x1ce   :  { %5030 = vmatpush1.bf16.msra.mxu0 %v5029_v58  ;;  %3203 = vmatmul.mubr.f32.gmra.mrb[28].mxu1 %v5801_v7  ;;  %v1076_v58 = vld [vmem:[%s10238_s1 + $0x1be0] sm:$0xff]  ;;  %v5307_v15 = vpack.c.bf16 %v1095_v5, %v1087_v4  ;;  %v5313_v46 = vpack.c.bf16 %v1110_v34, %v1102_v31  ;;  %v1150_v34 = vld [vmem:[%s10238_s1 + $0x1e30] sm:$0xff] }
 0x1cf   :  { %5286 = vmatpush1.bf16.msra.mxu1 %v5285_v59  ;;  %5032 = vmatprep.subr.bf16.mxu0 %v5031_v60  ;;  %v1070_v59 = vld [vmem:[%s10238_s1 + $0x1bb0] sm:$0xff]  ;;  %v1124_v51 = vld [vmem:[%s10238_s1 + $0x1d60] sm:$0xff] }
 0x1d0   :  { %5288 = vmatprep.subr.bf16.mxu1 %v5287_v0  ;;  %2660 = vmatprep.mubr.f32.mxu0 %v5802_v18  ;;  %v1093_v0 = vld [vmem:[%s10238_s1 + $0x1c68] sm:$0xff]  ;;  %v5061_v5 = vpack.c.bf16 %v1124_v51, %v1116_v50  ;;  %v1148_v31 = vld [vmem:[%s10238_s1 + $0x1e20] sm:$0xff]  ;;  %v1175_v50 = vld [vmem:[%s10238_s1 + $0x1ef8] sm:$0xff] }
 0x1d1   :  { %3208 = vmatprep.mubr.f32.mxu1 %v5802_v18  ;;  %2661 = vmatmul.mubr.f32.gmra.mrb[30].mxu0 %v5803_v21  ;;  %v1109_v18 = vld [vmem:[%s10238_s1 + $0x1ce8] sm:$0xff]  ;;  %v5819_v51 = vld [vmem:[%s10239_s0 + $0x2e0] sm:$0xff] }
 0x1d2   :  { %5034 = vmatpush1.bf16.msra.mxu0 %v5033_v8  ;;  %3209 = vmatmul.mubr.f32.gmra.mrb[30].mxu1 %v5803_v21  ;;  %v5049_v8 = vpack.c.bf16 %v1076_v58, %v1068_v57  ;;  %v1133_v57 = vld [vmem:[%s10238_s1 + $0x1da8] sm:$0xff] }
 0x1d3   :  { %5290 = vmatpush1.bf16.msra.mxu1 %v5289_v9  ;;  %5036 = vmatprep.subr.bf16.mxu0 %v5035_v10  ;;  %v5305_v9 = vpack.c.bf16 %v1078_v62, %v1070_v59  ;;  %v5051_v10 = vpack.c.bf16 %v1093_v0, %v1085_v63  ;;  %v1141_v58 = vld [vmem:[%s10238_s1 + $0x1de8] sm:$0xff]  ;;  %v1135_v63 = vld [vmem:[%s10238_s1 + $0x1db8] sm:$0xff] }
 0x1d4   :  { %5292 = vmatprep.subr.bf16.mxu1 %v5291_v14  ;;  %2666 = vmatprep.mubr.f32.mxu0 %v5804_v32  ;;  %v5814_v59 = vld [vmem:[%s10239_s0 + $0x268] sm:$0xff]  ;;  %v1143_v0 = vld [vmem:[%s10238_s1 + $0x1df8] sm:$0xff] }
 0x1d5   :  { %3214 = vmatprep.mubr.f32.mxu1 %v5804_v32  ;;  %2667 = vmatmul.mubr.f32.gmra.mrb[32].mxu0 %v5805_v35  ;;  %v5319_v13 = vpack.c.bf16 %v1143_v0, %v1135_v63  ;;  %v1166_v63 = vld [vmem:[%s10238_s1 + $0x1eb0] sm:$0xff] }
 0x1d6   :  { %5038 = vmatpush1.bf16.msra.mxu0 %v5037_v22  ;;  %3215 = vmatmul.mubr.f32.gmra.mrb[32].mxu1 %v5805_v35  ;;  %v1103_v22 = vld [vmem:[%s10238_s1 + $0x1cb8] sm:$0xff]  ;;  %v1117_v35 = vld [vmem:[%s10238_s1 + $0x1d28] sm:$0xff] }
 0x1d7   :  { %5294 = vmatpush1.bf16.msra.mxu1 %v5293_v23  ;;  %5040 = vmatprep.subr.bf16.mxu0 %v5039_v24  ;;  %v1111_v23 = vld [vmem:[%s10238_s1 + $0x1cf8] sm:$0xff]  ;;  %v5811_v24 = vld [vmem:[%s10239_s0 + $0x1e0] sm:$0xff] }
 0x1d8   :  { %v9176_v42 = vpop.f32.mrb[0].mxu0  ;;  %5296 = vmatprep.subr.bf16.mxu1 %v5295_v28  ;;  %2672 = vmatprep.mubr.f32.mxu0 %v5806_v47  ;;  %v5055_v28 = vpack.c.bf16 %v1109_v18, %v1101_v17  ;;  %v5311_v33 = vpack.c.bf16 %v1111_v23, %v1103_v22  ;;  %v1157_v17 = vld [vmem:[%s10238_s1 + $0x1e68] sm:$0xff]  ;;  %v1151_v23 = vld [vmem:[%s10238_s1 + $0x1e38] sm:$0xff] }
 0x1d9   :  { %v9190_v48 = vpop.f32.mrb[0].mxu1  ;;  %v9192_v49 = vpop.f32.mrb[1].mxu0  ;;  %3220 = vmatprep.mubr.f32.mxu1 %v5806_v47  ;;  %2673 = vmatmul.mubr.f32.gmra.mrb[34].mxu0 %v5807_v52  ;;  %v5816_v18 = vld [vmem:[%s10239_s0 + $0x2a8] sm:$0xff]  ;;  %v5067_v30 = vpack.c.bf16 %v1157_v17, %v1149_v16 }
 0x1da   :  { %v9203_v53 = vpop.f32.mrb[1].mxu1  ;;  %5042 = vmatpush1.bf16.msra.mxu0 %v5041_v36  ;;  %3221 = vmatmul.mubr.f32.gmra.mrb[34].mxu1 %v5807_v52  ;;  %v1125_v36 = vld [vmem:[%s10238_s1 + $0x1d68] sm:$0xff]  ;;  %v1118_v52 = vld [vmem:[%s10238_s1 + $0x1d30] sm:$0xff] }
 0x1db   :  { %5298 = vmatpush1.bf16.msra.mxu1 %v5297_v37  ;;  %5044 = vmatprep.subr.bf16.mxu0 %v5043_v38  ;;  %v5812_v37 = vld [vmem:[%s10239_s0 + $0x228] sm:$0xff]  ;;  %v5059_v47 = vpack.c.bf16 %v1125_v36, %v1117_v35 }
 0x1dc   :  { %v9214_v60 = vpop.f32.mrb[2].mxu0  ;;  %5300 = vmatprep.subr.bf16.mxu1 %v5299_v43  ;;  %2678 = vmatprep.mubr.f32.mxu0 %v5808_v1  ;;  %v5813_v43 = vld [vmem:[%s10239_s0 + $0x220] sm:$0xff] }
 0x1dd   :  { %v9228_v2 = vpop.f32.mrb[2].mxu1  ;;  %v9230_v3 = vpop.f32.mrb[3].mxu0  ;;  %3226 = vmatprep.mubr.f32.mxu1 %v5808_v1  ;;  %2679 = vmatmul.mubr.f32.gmra.mrb[36].mxu0 %v5809_v6  ;;  %v5815_v1 = vld [vmem:[%s10239_s0 + $0x260] sm:$0xff] }
 0x1de   :  { %v9241_v7 = vpop.f32.mrb[3].mxu1  ;;  %5046 = vmatpush1.bf16.msra.mxu0 %v5045_v54  ;;  %3227 = vmatmul.mubr.f32.gmra.mrb[36].mxu1 %v5809_v6 }
 0x1df   :  { %5302 = vmatpush1.bf16.msra.mxu1 %v5301_v55  ;;  %5048 = vmatprep.subr.bf16.mxu0 %v5047_v56  ;;  %v5315_v55 = vpack.c.bf16 %v1127_v41, %v1119_v40  ;;  %v1126_v56 = vld [vmem:[%s10238_s1 + $0x1d70] sm:$0xff]  ;;  %v1165_v40 = vld [vmem:[%s10238_s1 + $0x1ea8] sm:$0xff] }
 0x1e0   :  { %v9252_v14 = vpop.f32.mrb[4].mxu0  ;;  %5304 = vmatprep.subr.bf16.mxu1 %v5303_v61  ;;  %2684 = vmatprep.mubr.f32.mxu0 %v5810_v19  ;;  %v5317_v6 = vpack.c.bf16 %v1126_v56, %v1118_v52  ;;  %v1173_v41 = vld [vmem:[%s10238_s1 + $0x1ee8] sm:$0xff] }
 0x1e1   :  { %v9266_v20 = vpop.f32.mrb[4].mxu1  ;;  %v9268_v21 = vpop.f32.mrb[5].mxu0  ;;  %3232 = vmatprep.mubr.f32.mxu1 %v5810_v19  ;;  %2685 = vmatmul.mubr.f32.gmra.mrb[38].mxu0 %v5811_v24 }
 0x1e2   :  { %v9279_v25 = vpop.f32.mrb[5].mxu1  ;;  %5050 = vmatpush1.bf16.msra.mxu0 %v5049_v8  ;;  %3233 = vmatmul.mubr.f32.gmra.mrb[38].mxu1 %v5811_v24  ;;  %v5063_v8 = vpack.c.bf16 %v1141_v58, %v1133_v57  ;;  %v1159_v24 = vld [vmem:[%s10238_s1 + $0x1e78] sm:$0xff]  ;;  %v5071_v57 = vpack.c.bf16 %v1173_v41, %v1165_v40  ;;  %v1164_v58 = vld [vmem:[%s10238_s1 + $0x1ea0] sm:$0xff] }
 0x1e3   :  { %5306 = vmatpush1.bf16.msra.mxu1 %v5305_v9  ;;  %5052 = vmatprep.subr.bf16.mxu0 %v5051_v10  ;;  %v1132_v9 = vld [vmem:[%s10238_s1 + $0x1da0] sm:$0xff]  ;;  %v5323_v36 = vpack.c.bf16 %v1159_v24, %v1151_v23  ;;  %v1199_v40 = vld [vmem:[%s10238_s1 + $0x1fb8] sm:$0xff] }
 0x1e4   :  { %v9290_v32 = vpop.f32.mrb[6].mxu0  ;;  %5308 = vmatprep.subr.bf16.mxu1 %v5307_v15  ;;  %2690 = vmatprep.mubr.f32.mxu0 %v5812_v37  ;;  %v1140_v10 = vld [vmem:[%s10238_s1 + $0x1de0] sm:$0xff]  ;;  %v1142_v15 = vld [vmem:[%s10238_s1 + $0x1df0] sm:$0xff]  ;;  %v1207_v41 = vld [vmem:[%s10238_s1 + $0x1ff8] sm:$0xff] }
 0x1e5   :  { %v9304_v38 = vpop.f32.mrb[6].mxu1  ;;  %v9306_v39 = vpop.f32.mrb[7].mxu0  ;;  %3238 = vmatprep.mubr.f32.mxu1 %v5812_v37  ;;  %2691 = vmatmul.mubr.f32.gmra.mrb[40].mxu0 %v5813_v43  ;;  %v5321_v29 = vpack.c.bf16 %v1142_v15, %v1134_v11  ;;  %v1158_v37 = vld [vmem:[%s10238_s1 + $0x1e70] sm:$0xff]  ;;  %v1191_v15 = vld [vmem:[%s10238_s1 + $0x1f78] sm:$0xff]  ;;  %v1180_v24 = vld [vmem:[%s10238_s1 + $0x1f20] sm:$0xff] }
 0x1e6   :  { %v9317_v44 = vpop.f32.mrb[7].mxu1  ;;  %5054 = vmatpush1.bf16.msra.mxu0 %v5053_v26  ;;  %3239 = vmatmul.mubr.f32.gmra.mrb[40].mxu1 %v5813_v43  ;;  %v5817_v26 = vld [vmem:[%s10239_s0 + $0x2a0] sm:$0xff]  ;;  %v5818_v43 = vld [vmem:[%s10239_s0 + $0x2e8] sm:$0xff]  ;;  %v5325_v56 = vpack.c.bf16 %v1158_v37, %v1150_v34 }
 0x1e7   :  { %5310 = vmatpush1.bf16.msra.mxu1 %v5309_v27  ;;  %5056 = vmatprep.subr.bf16.mxu0 %v5055_v28  ;;  %v5065_v28 = vpack.c.bf16 %v1140_v10, %v1132_v9  ;;  %v5820_v9 = vld [vmem:[%s10239_s0 + $0x38] sm:$0xff]  ;;  %v1205_v34 = vld [vmem:[%s10238_s1 + $0x1fe8] sm:$0xff] }
 0x1e8   :  { %v9328_v54 = vpop.f32.mrb[8].mxu0  ;;  %5312 = vmatprep.subr.bf16.mxu1 %v5311_v33  ;;  %2696 = vmatprep.mubr.f32.mxu0 %v5814_v59  ;;  %v1156_v33 = vld [vmem:[%s10238_s1 + $0x1e60] sm:$0xff] }
 0x1e9   :  { %v9342_v61 = vpop.f32.mrb[8].mxu1  ;;  %v9344_v62 = vpop.f32.mrb[9].mxu0  ;;  %3244 = vmatprep.mubr.f32.mxu1 %v5814_v59  ;;  %2697 = vmatmul.mubr.f32.gmra.mrb[42].mxu0 %v5815_v1  ;;  %v1172_v59 = vld [vmem:[%s10238_s1 + $0x1ee0] sm:$0xff] }
 0x1ea   :  { %v9355_v4 = vpop.f32.mrb[9].mxu1  ;;  %5058 = vmatpush1.bf16.msra.mxu0 %v5057_v45  ;;  %3245 = vmatmul.mubr.f32.gmra.mrb[42].mxu1 %v5815_v1  ;;  %v5073_v17 = vpack.c.bf16 %v1172_v59, %v1164_v58  ;;  %v5335_v58 = vpack.c.bf16 %v1207_v41, %v1199_v40  ;;  %v1198_v59 = vld [vmem:[%s10238_s1 + $0x1fb0] sm:$0xff]  ;;  %v5826_v41 = vld [vmem:[%s10239_s0 + $0xf8] sm:$0xff] }
 0x1eb   :  { %5314 = vmatpush1.bf16.msra.mxu1 %v5313_v46  ;;  %5060 = vmatprep.subr.bf16.mxu0 %v5059_v47  ;;  %v1167_v47 = vld [vmem:[%s10238_s1 + $0x1eb8] sm:$0xff]  ;;  %v5825_v40 = vld [vmem:[%s10239_s0 + $0xb0] sm:$0xff] }
 0x1ec   :  { %v9366_v12 = vpop.f32.mrb[10].mxu0  ;;  %5316 = vmatprep.subr.bf16.mxu1 %v5315_v55  ;;  %2702 = vmatprep.mubr.f32.mxu0 %v5816_v18  ;;  %v5069_v55 = vpack.c.bf16 %v1156_v33, %v1148_v31  ;;  %v5327_v1 = vpack.c.bf16 %v1175_v50, %v1167_v47  ;;  %v1190_v31 = vld [vmem:[%s10238_s1 + $0x1f70] sm:$0xff]  ;;  %v1197_v33 = vld [vmem:[%s10238_s1 + $0x1fa8] sm:$0xff] }
 0x1ed   :  { %v9380_v19 = vpop.f32.mrb[10].mxu1  ;;  %v9382_v22 = vpop.f32.mrb[11].mxu0  ;;  %3250 = vmatprep.mubr.f32.mxu1 %v5816_v18  ;;  %2703 = vmatmul.mubr.f32.gmra.mrb[44].mxu0 %v5817_v26 }
 0x1ee   :  { %v9393_v27 = vpop.f32.mrb[11].mxu1  ;;  %5062 = vmatpush1.bf16.msra.mxu0 %v5061_v5  ;;  %3251 = vmatmul.mubr.f32.gmra.mrb[44].mxu1 %v5817_v26  ;;  %v1174_v5 = vld [vmem:[%s10238_s1 + $0x1ef0] sm:$0xff]  ;;  %v1188_v26 = vld [vmem:[%s10238_s1 + $0x1f60] sm:$0xff] }
 0x1ef   :  { %5318 = vmatpush1.bf16.msra.mxu1 %v5317_v6  ;;  %5064 = vmatprep.subr.bf16.mxu0 %v5063_v8  ;;  %v1181_v6 = vld [vmem:[%s10238_s1 + $0x1f28] sm:$0xff]  ;;  %v5329_v18 = vpack.c.bf16 %v1174_v5, %v1166_v63  ;;  %v5077_v47 = vpack.c.bf16 %v1188_v26, %v1180_v24  ;;  %v1206_v63 = vld [vmem:[%s10238_s1 + $0x1ff0] sm:$0xff] }
 0x1f0   :  { %v9404_v35 = vpop.f32.mrb[12].mxu0  ;;  %5320 = vmatprep.subr.bf16.mxu1 %v5319_v13  ;;  %2708 = vmatprep.mubr.f32.mxu0 %v5818_v43  ;;  %v1189_v8 = vld [vmem:[%s10238_s1 + $0x1f68] sm:$0xff]  ;;  %v1183_v13 = vld [vmem:[%s10238_s1 + $0x1f38] sm:$0xff] }
 0x1f1   :  { %v9418_v45 = vpop.f32.mrb[12].mxu1  ;;  %v9420_v46 = vpop.f32.mrb[13].mxu0  ;;  %3256 = vmatprep.mubr.f32.mxu1 %v5818_v43  ;;  %2709 = vmatmul.mubr.f32.gmra.mrb[46].mxu0 %v5819_v51  ;;  %v5075_v23 = vpack.c.bf16 %v1189_v8, %v1181_v6 }
 0x1f2   :  { %v9431_v52 = vpop.f32.mrb[13].mxu1  ;;  %5066 = vmatpush1.bf16.msra.mxu0 %v5065_v28  ;;  %3257 = vmatmul.mubr.f32.gmra.mrb[46].mxu1 %v5819_v51  ;;  %v1182_v28 = vld [vmem:[%s10238_s1 + $0x1f30] sm:$0xff]  ;;  %v5079_v51 = vpack.c.bf16 %v1205_v34, %v1197_v33  ;;  %v5824_v34 = vld [vmem:[%s10239_s0 + $0xb8] sm:$0xff] }
 0x1f3   :  { %5322 = vmatpush1.bf16.msra.mxu1 %v5321_v29  ;;  %5068 = vmatprep.subr.bf16.mxu0 %v5067_v30  ;;  %v5331_v30 = vpack.c.bf16 %v1191_v15, %v1183_v13  ;;  %v5333_v50 = vpack.c.bf16 %v1190_v31, %v1182_v28  ;;  %v5821_v28 = vld [vmem:[%s10239_s0 + $0x30] sm:$0xff]  ;;  %v5822_v31 = vld [vmem:[%s10239_s0 + $0x78] sm:$0xff] }
 0x1f4   :  { %v9442_v0 = vpop.f32.mrb[14].mxu0  ;;  %5324 = vmatprep.subr.bf16.mxu1 %v5323_v36  ;;  %2779 = vmatprep.mubr.f32.mxu0 %v5820_v9  ;;  %v5823_v33 = vld [vmem:[%s10239_s0 + $0x70] sm:$0xff] }
 0x1f5   :  { %v9456_v10 = vpop.f32.mrb[14].mxu1  ;;  %v9458_v11 = vpop.f32.mrb[15].mxu0  ;;  %3327 = vmatprep.mubr.f32.mxu1 %v5820_v9  ;;  %v5337_v9 = vpack.c.bf16 %v1206_v63, %v1198_v59  ;;  %v5833_v59 = vld [vmem:[%s10239_s0 + $0x1b0] sm:$0xff]  ;;  %v5834_v63 = vld [vmem:[%s10239_s0 + $0x1f8] sm:$0xff] }
 0x1f6   :  { %v9466_v16 = vpop.f32.mrb[15].mxu1  ;;  %5070 = vmatpush1.bf16.msra.mxu0 %v5069_v55  ;;  %v1196_v55 = vld [vmem:[%s10238_s1 + $0x1fa0] sm:$0xff] }
 0x1f7   :  { %5326 = vmatpush1.bf16.msra.mxu1 %v5325_v56  ;;  %5072 = vmatprep.subr.bf16.mxu0 %v5071_v57  ;;  %v1204_v56 = vld [vmem:[%s10238_s1 + $0x1fe0] sm:$0xff] }
 0x1f8   :  { %v9477_v29 = vpop.f32.mrb[16].mxu0  ;;  %5328 = vmatprep.subr.bf16.mxu1 %v5327_v1  ;;  %v5081_v8 = vpack.c.bf16 %v1204_v56, %v1196_v55  ;;  %v5830_v55 = vld [vmem:[%s10239_s0 + $0x178] sm:$0xff]  ;;  %v5831_v56 = vld [vmem:[%s10239_s0 + $0x170] sm:$0xff] }
 0x1f9   :  { %v9488_v36 = vpop.f32.mrb[16].mxu1  ;;  %v9490_v37 = vpop.f32.mrb[17].mxu0 }
 0x1fa   :  { %v9498_v43 = vpop.f32.mrb[17].mxu1  ;;  %5074 = vmatpush1.bf16.msra.mxu0 %v5073_v17 }
 0x1fb   :  { %5330 = vmatpush1.bf16.msra.mxu1 %v5329_v18  ;;  %5076 = vmatprep.subr.bf16.mxu0 %v5075_v23 }
 0x1fc   :  { %v9506_v57 = vpop.f32.mrb[18].mxu0  ;;  %5332 = vmatprep.subr.bf16.mxu1 %v5331_v30 }
 0x1fd   :  { %v9514_v1 = vpop.f32.mrb[18].mxu1  ;;  %v9516_v5 = vpop.f32.mrb[19].mxu0 }
 0x1fe   :  { %v9518_v6 = vpop.f32.mrb[19].mxu1  ;;  %5078 = vmatpush1.bf16.msra.mxu0 %v5077_v47  ;;  %v5827_v47 = vld [vmem:[%s10239_s0 + $0xf0] sm:$0xff] }
 0x1ff   :  { %5334 = vmatpush1.bf16.msra.mxu1 %v5333_v50  ;;  %5080 = vmatprep.subr.bf16.mxu0 %v5079_v51  ;;  %v5828_v50 = vld [vmem:[%s10239_s0 + $0x138] sm:$0xff]  ;;  %v5829_v51 = vld [vmem:[%s10239_s0 + $0x130] sm:$0xff] }
 0x200   :  { %v9520_v13 = vpop.f32.mrb[20].mxu0  ;;  %5336 = vmatprep.subr.bf16.mxu1 %v5335_v58  ;;  %v5832_v58 = vld [vmem:[%s10239_s0 + $0x1b8] sm:$0xff] }
 0x201   :  { %v9522_v15 = vpop.f32.mrb[20].mxu1  ;;  %v9524_v17 = vpop.f32.mrb[21].mxu0 }
 0x202   :  { %v9526_v18 = vpop.f32.mrb[21].mxu1  ;;  %5082 = vmatpush1.bf16.msra.mxu0 %v5081_v8  ;;  %v5835_v8 = vld [vmem:[%s10239_s0 + $0x1f0] sm:$0xff] }
 0x203   :  { %5338 = vmatpush1.bf16.msra.mxu1 %v5337_v9  ;;  %v5836_v9 = vld [vmem:[%s10239_s0 + $0x238] sm:$0xff] }
 0x204   :  { %v9528_v23 = vpop.f32.mrb[22].mxu0 }
 0x205   :  { %v9530_v24 = vpop.f32.mrb[22].mxu1  ;;  %v9532_v26 = vpop.f32.mrb[23].mxu0  ;;  %2780 = vmatmul.mubr.f32.vlgmr.msra.gmra.mrb[24].mxu0 %v5821_v28 }
 0x206   :  { %v9537_v30 = vpop.f32.mrb[23].mxu1  ;;  %3328 = vmatmul.mubr.f32.vlgmr.msra.gmra.mrb[24].mxu1 %v5821_v28  ;;  %2785 = vmatprep.mubr.f32.mxu0 %v5822_v31  ;;  %v5837_v28 = vld [vmem:[%s10239_s0 + $0x230] sm:$0xff] }
 0x207   :  { %3333 = vmatprep.mubr.f32.mxu1 %v5822_v31  ;;  %v5838_v31 = vld [vmem:[%s10239_s0 + $0x278] sm:$0xff] }
 0x209   :  { %2786 = vmatmul.mubr.f32.gmra.mrb[26].mxu0 %v5823_v33 }
 0x20a   :  { %3334 = vmatmul.mubr.f32.gmra.mrb[26].mxu1 %v5823_v33  ;;  %2791 = vmatprep.mubr.f32.mxu0 %v5824_v34  ;;  %v5839_v33 = vld [vmem:[%s10239_s0 + $0x270] sm:$0xff] }
 0x20b   :  { %3339 = vmatprep.mubr.f32.mxu1 %v5824_v34  ;;  %v5840_v34 = vld [vmem:[%s10239_s0 + $0x2b8] sm:$0xff] }
 0x20d   :  { %2792 = vmatmul.mubr.f32.gmra.mrb[28].mxu0 %v5825_v40 }
 0x20e   :  { %3340 = vmatmul.mubr.f32.gmra.mrb[28].mxu1 %v5825_v40  ;;  %2797 = vmatprep.mubr.f32.mxu0 %v5826_v41  ;;  %v5841_v40 = vld [vmem:[%s10239_s0 + $0x2b0] sm:$0xff] }
 0x20f   :  { %3345 = vmatprep.mubr.f32.mxu1 %v5826_v41  ;;  %v5842_v41 = vld [vmem:[%s10239_s0 + $0x2f8] sm:$0xff] }
 0x211   :  { %2798 = vmatmul.mubr.f32.gmra.mrb[30].mxu0 %v5827_v47 }
 0x212   :  { %3346 = vmatmul.mubr.f32.gmra.mrb[30].mxu1 %v5827_v47  ;;  %2803 = vmatprep.mubr.f32.mxu0 %v5828_v50  ;;  %v5843_v47 = vld [vmem:[%s10239_s0 + $0x2f0] sm:$0xff] }
 0x213   :  { %3351 = vmatprep.mubr.f32.mxu1 %v5828_v50  ;;  %v5845_v50 = vmov 0.0  }
 0x214   :  { %4262 = vst [vmem:[%s10240_s2 + $0x28] sm:$0xff] %v5845_v50  ;;  %4263 = vst [vmem:[%s10240_s2 + $0x30] sm:$0xff] %v5845_v50 }
 0x215   :  { %2804 = vmatmul.mubr.f32.gmra.mrb[32].mxu0 %v5829_v51  ;;  %4264 = vst [vmem:[%s10240_s2 + $0x38] sm:$0xff] %v5845_v50  ;;  %4270 = vst [vmem:[%s10240_s2 + $0x68] sm:$0xff] %v5845_v50 }
 0x216   :  { %3352 = vmatmul.mubr.f32.gmra.mrb[32].mxu1 %v5829_v51  ;;  %2809 = vmatprep.mubr.f32.mxu0 %v5830_v55  ;;  %4271 = vst [vmem:[%s10240_s2 + $0x70] sm:$0xff] %v5845_v50  ;;  %4272 = vst [vmem:[%s10240_s2 + $0x78] sm:$0xff] %v5845_v50  ;;  %v3496_v51 = vlaneseq }
 0x217   :  { %3357 = vmatprep.mubr.f32.mxu1 %v5830_v55  ;;  %4278 = vst [vmem:[%s10240_s2 + $0xa8] sm:$0xff] %v5845_v50  ;;  %4279 = vst [vmem:[%s10240_s2 + $0xb0] sm:$0xff] %v5845_v50  ;;  %v3400_v55 = vmul.f32 %v9176_v42, %v9176_v42  ;;  %v9677_v42 = vmul.f32 %v9230_v3, %v9230_v3  ;;  %v9701_v3 = vmul.f32 %v9290_v32, %v9290_v32 }
 0x218   :  { %4280 = vst [vmem:[%s10240_s2 + $0xb8] sm:$0xff] %v5845_v50  ;;  %4286 = vst [vmem:[%s10240_s2 + $0xe8] sm:$0xff] %v5845_v50  ;;  %v9723_v32 = vmul.f32 %v9342_v61, %v9342_v61  ;;  %v9743_v61 = vmul.f32 %v9382_v22, %v9382_v22  ;;  %v9763_v22 = vmul.f32 %v9431_v52, %v9431_v52 }
 0x219   :  { %2810 = vmatmul.mubr.f32.gmra.mrb[34].mxu0 %v5831_v56  ;;  %4287 = vst [vmem:[%s10240_s2 + $0xf0] sm:$0xff] %v5845_v50  ;;  %4288 = vst [vmem:[%s10240_s2 + $0xf8] sm:$0xff] %v5845_v50  ;;  %v9780_v52 = vmul.f32 %v9466_v16, %v9466_v16  ;;  %v9794_v16 = vmul.f32 %v9490_v37, %v9490_v37  ;;  %v9806_v37 = vmul.f32 %v9514_v1, %v9514_v1 }
 0x21a   :  { %3358 = vmatmul.mubr.f32.gmra.mrb[34].mxu1 %v5831_v56  ;;  %2815 = vmatprep.mubr.f32.mxu0 %v5832_v58  ;;  %4294 = vst [vmem:[%s10240_s2 + $0x128] sm:$0xff] %v5845_v50  ;;  %4295 = vst [vmem:[%s10240_s2 + $0x130] sm:$0xff] %v5845_v50  ;;  %v3402_v56 = vmul.f32 %v9190_v48, %v9190_v48  ;;  %v9681_v48 = vmul.f32 %v9241_v7, %v9241_v7  ;;  %v9703_v7 = vand.u32 127, %v3496_v51 }
 0x21b   :  { %3363 = vmatprep.mubr.f32.mxu1 %v5832_v58  ;;  %4296 = vst [vmem:[%s10240_s2 + $0x138] sm:$0xff] %v5845_v50  ;;  %4302 = vst [vmem:[%s10240_s2 + $0x168] sm:$0xff] %v5845_v50  ;;  %v3401_v58 = vmul.f32 %v9192_v49, %v9192_v49  ;;  %v9685_v49 = vmul.f32 %v9252_v14, %v9252_v14  ;;  %v9707_v14 = vmul.f32 %v9304_v38, %v9304_v38 }
 0x21c   :  { %4303 = vst [vmem:[%s10240_s2 + $0x170] sm:$0xff] %v5845_v50  ;;  %4304 = vst [vmem:[%s10240_s2 + $0x178] sm:$0xff] %v5845_v50  ;;  %v9727_v38 = vmul.f32 %v9344_v62, %v9344_v62  ;;  %v9747_v62 = vmul.f32 %v9393_v27, %v9393_v27  ;;  %vm3505_vm0 = vcmp.gt.s32.totalorder %v9703_v7, 0  ;;  %v9768_v27 = vmul.f32 %v9442_v0, %v9442_v0 }
 0x21d   :  { %2816 = vmatmul.mubr.f32.gmra.mrb[36].mxu0 %v5833_v59  ;;  %v9814_v1 = vmul.f32 %v9516_v5, %v9516_v5 }
 0x21e   :  { %3364 = vmatmul.mubr.f32.gmra.mrb[36].mxu1 %v5833_v59  ;;  %2821 = vmatprep.mubr.f32.mxu0 %v5834_v63  ;;  %v3403_v59 = vmul.f32 %v9203_v53, %v9203_v53  ;;  %v9689_v53 = vmul.f32 %v9266_v20, %v9266_v20  ;;  %v9711_v20 = vmul.f32 %v9306_v39, %v9306_v39 }
 0x21f   :  { %3369 = vmatprep.mubr.f32.mxu1 %v5834_v63  ;;  %v9669_v63 = vmul.f32 %v9214_v60, %v9214_v60  ;;  %v9693_v60 = vmul.f32 %v9268_v21, %v9268_v21  ;;  %v9715_v21 = vmul.f32 %v9317_v44, %v9317_v44  ;;  %v9731_v39 = vmul.f32 %v9355_v4, %v9355_v4 }
 0x220   :  { %v9735_v44 = vmul.f32 %v9366_v12, %v9366_v12  ;;  %v9751_v4 = vmul.f32 %v9404_v35, %v9404_v35  ;;  %v9755_v12 = vmul.f32 %v9418_v45, %v9418_v45  ;;  %v9772_v35 = vmul.f32 %v9456_v10, %v9456_v10 }
 0x221   :  { %2822 = vmatmul.mubr.f32.gmra.mrb[38].mxu0 %v5835_v8  ;;  %v9776_v45 = vmul.f32 %v9458_v11, %v9458_v11  ;;  %v9788_v10 = vmul.f32 %v9488_v36, %v9488_v36  ;;  %v9802_v36 = vmul.f32 %v9506_v57, %v9506_v57 }
 0x222   :  { %3370 = vmatmul.mubr.f32.gmra.mrb[38].mxu1 %v5835_v8  ;;  %2827 = vmatprep.mubr.f32.mxu0 %v5836_v9  ;;  %v9673_v8 = vmul.f32 %v9228_v2, %v9228_v2  ;;  %v9697_v2 = vmul.f32 %v9279_v25, %v9279_v25  ;;  %v9719_v25 = vmul.f32 %v9328_v54, %v9328_v54 }
 0x223   :  { %3375 = vmatprep.mubr.f32.mxu1 %v5836_v9  ;;  %v9739_v54 = vmul.f32 %v9380_v19, %v9380_v19  ;;  %v9759_v19 = vmul.f32 %v9420_v46, %v9420_v46  ;;  %10241 = vst [vmem:[#allocation2_spill] sm:$0xff] %v9788_v10  ;;  %10242 = vst [vmem:[#allocation3_spill] sm:$0xff] %v9802_v36 }
 0x225   :  { %2828 = vmatmul.mubr.f32.gmra.mrb[40].mxu0 %v5837_v28 }
 0x226   :  { %3376 = vmatmul.mubr.f32.gmra.mrb[40].mxu1 %v5837_v28  ;;  %2833 = vmatprep.mubr.f32.mxu0 %v5838_v31 }
 0x227   :  { %3381 = vmatprep.mubr.f32.mxu1 %v5838_v31 }
 0x229   :  { %2834 = vmatmul.mubr.f32.gmra.mrb[42].mxu0 %v5839_v33 }
 0x22a   :  { %3382 = vmatmul.mubr.f32.gmra.mrb[42].mxu1 %v5839_v33  ;;  %2839 = vmatprep.mubr.f32.mxu0 %v5840_v34  ;;  %v9784_v33 = vmul.f32 %v9477_v29, %v9477_v29 }
 0x22b   :  { %3387 = vmatprep.mubr.f32.mxu1 %v5840_v34 }
 0x22d   :  { %2840 = vmatmul.mubr.f32.gmra.mrb[44].mxu0 %v5841_v40 }
 0x22e   :  { %3388 = vmatmul.mubr.f32.gmra.mrb[44].mxu1 %v5841_v40  ;;  %2845 = vmatprep.mubr.f32.mxu0 %v5842_v41 }
 0x22f   :  { %3393 = vmatprep.mubr.f32.mxu1 %v5842_v41 }
 0x231   :  { %2846 = vmatmul.mubr.f32.gmra.mrb[46].mxu0 %v5843_v47 }
 0x232   :  { %3394 = vmatmul.mubr.f32.gmra.mrb[46].mxu1 %v5843_v47 }
 0x2d8   :  { %v2781_v9 = vpop.f32.mrb[24].mxu0 }
 0x2d9   :  { %v3404_v46 = vmul.f32 %v2781_v9, %v2781_v9  ;;  %v3329_v28 = vpop.f32.mrb[24].mxu1  ;;  %v2783_v31 = vpop.f32.mrb[25].mxu0 }
 0x2da   :  { %v3406_v0 = vmul.f32 %v3329_v28, %v3329_v28  ;;  %v3405_v34 = vmul.f32 %v2783_v31, %v2783_v31  ;;  %v3331_v40 = vpop.f32.mrb[25].mxu1  ;;  %v9798_v28 = vmul.f32 %v9498_v43, %v9498_v43 }
 0x2db   :  { %v3529_v11 = vsel %vm3505_vm0, %v3404_v46, 0.0  ;;  %v3725_v41 = vmax.f32 %v3404_v46, 1e-07  ;;  %v3407_v47 = vmul.f32 %v3331_v40, %v3331_v40 }
 0x2dc   :  { %v3625_v50 = vadd.f32 %v3529_v11, %v3400_v55  ;;  %v3627_v51 = vadd.f32 %v3406_v0, %v3402_v56  ;;  %v3626_v29 = vadd.f32 %v3405_v34, %v3401_v58  ;;  %v2787_v9 = vpop.f32.mrb[26].mxu0 }
 0x2dd   :  { %v3628_v31 = vadd.f32 %v3407_v47, %v3403_v59  ;;  %v3412_v10 = vmul.f32 %v2787_v9, %v2787_v9  ;;  %v3335_v46 = vpop.f32.mrb[26].mxu1  ;;  %v2789_v40 = vpop.f32.mrb[27].mxu0  ;;  %5628 = vlog2.f32 %v3725_v41 }
 0x2de   :  { %v3721_v55 = vmax.f32 %v3625_v50, 1e-07  ;;  %v3723_v56 = vmax.f32 %v3627_v51, 1e-07  ;;  %v3414_v58 = vmul.f32 %v3335_v46, %v3335_v46  ;;  %v3722_v0 = vmax.f32 %v3626_v29, 1e-07 }
 0x2df   :  { %v3537_v43 = vsel %vm3505_vm0, %v3412_v10, 0.0  ;;  %v3413_v34 = vmul.f32 %v2789_v40, %v2789_v40  ;;  %v3337_v11 = vpop.f32.mrb[27].mxu1  ;;  %v3724_v57 = vmax.f32 %v3628_v31, 1e-07  ;;  %v9819_v46 = vmul.f32 %v9518_v6, %v9518_v6 }
 0x2e0   :  { %v3633_v59 = vadd.f32 %v3537_v43, %v9669_v63  ;;  %v3635_v47 = vadd.f32 %v3414_v58, %v9673_v8  ;;  %v3415_v9 = vmul.f32 %v3337_v11, %v3337_v11  ;;  %v2793_v36 = vpop.f32.mrb[28].mxu0  ;;  %5630 = vlog2.f32 %v3721_v55 }
 0x2e1   :  { %v3634_v41 = vadd.f32 %v3413_v34, %v9677_v42  ;;  %v3420_v50 = vmul.f32 %v2793_v36, %v2793_v36  ;;  %v3341_v51 = vpop.f32.mrb[28].mxu1  ;;  %v2795_v29 = vpop.f32.mrb[29].mxu0  ;;  %5632 = vlog2.f32 %v3723_v56  ;;  %v9824_v40 = vmul.f32 %v9520_v13, %v9520_v13 }
 0x2e2   :  { %v3729_v63 = vmax.f32 %v3633_v59, 1e-07  ;;  %v3636_v8 = vadd.f32 %v3415_v9, %v9681_v48  ;;  %v3343_v31 = vpop.f32.mrb[29].mxu1  ;;  %5634 = vlog2.f32 %v3722_v0  ;;  %v3733_v5 = vmax.f32 %v3412_v10, 1e-07 }
 0x2e3   :  { %v3545_v42 = vsel %vm3505_vm0, %v3420_v50, 0.0  ;;  %5636 = vlog2.f32 %v3724_v57  ;;  %v3731_v36 = vmax.f32 %v3635_v47, 1e-07  ;;  %v3422_v6 = vmul.f32 %v3341_v51, %v3341_v51 }
 0x2e4   :  { %v3641_v55 = vadd.f32 %v3545_v42, %v9685_v49  ;;  %v2799_v58 = vpop.f32.mrb[30].mxu0  ;;  %v3730_v56 = vmax.f32 %v3634_v41, 1e-07  ;;  %v3421_v43 = vmul.f32 %v2795_v29, %v2795_v29  ;;  %v3423_v34 = vmul.f32 %v3343_v31, %v3343_v31 }
 0x2e5   :  { %v9829_v48 = vmul.f32 %v2799_v58, %v2799_v58  ;;  %v3347_v11 = vpop.f32.mrb[30].mxu1  ;;  %v2801_v59 = vpop.f32.mrb[31].mxu0  ;;  %5638 = vlog2.f32 %v3729_v63  ;;  %v3732_v13 = vmax.f32 %v3636_v8, 1e-07  ;;  %v3643_v10 = vadd.f32 %v3422_v6, %v9689_v53 }
 0x2e6   :  { %v3430_v0 = vmul.f32 %v3347_v11, %v3347_v11  ;;  %v3349_v9 = vpop.f32.mrb[31].mxu1  ;;  %5640 = vlog2.f32 %v3733_v5  ;;  %v3642_v57 = vadd.f32 %v3421_v43, %v9693_v60  ;;  %v3644_v49 = vadd.f32 %v3423_v34, %v9697_v2 }
 0x2e7   :  { %v3553_v47 = vsel %vm3505_vm0, %v9829_v48, 0.0  ;;  %v9839_v41 = vmul.f32 %v9522_v15, %v9522_v15  ;;  %5642 = vlog2.f32 %v3731_v36  ;;  %v3737_v51 = vmax.f32 %v3641_v55, 1e-07  ;;  %v5629_v63 = vpop.eup %5628 }
 0x2e8   :  { %v3649_v29 = vadd.f32 %v3553_v47, %v9701_v3  ;;  %v2805_v53 = vpop.f32.mrb[32].mxu0  ;;  %v9844_v8 = vmul.f32 %v9524_v17, %v9524_v17  ;;  %v9848_v60 = vmul.f32 %v9526_v18, %v9526_v18  ;;  %5644 = vlog2.f32 %v3730_v56 }
 0x2e9   :  { %v3741_v2 = vmax.f32 %v3420_v50, 1e-07  ;;  %5646 = vlog2.f32 %v3732_v13  ;;  %v3739_v31 = vmax.f32 %v3643_v10, 1e-07  ;;  %v9851_v15 = vadd.f32 %v3430_v0, %v9707_v14  ;;  %v3353_v42 = vpop.f32.mrb[32].mxu1  ;;  %v2807_v3 = vpop.f32.mrb[33].mxu0 }
 0x2ea   :  { %10243 = vst [vmem:[#allocation4_spill] sm:$0xff] %v9844_v8  ;;  %10244 = vst [vmem:[#allocation5_spill] sm:$0xff] %v9848_v60  ;;  %v3429_v5 = vmul.f32 %v2801_v59, %v2801_v59  ;;  %v5631_v36 = vpop.eup %5630  ;;  %v9855_v55 = vmul.f32 %v9528_v23, %v9528_v23  ;;  %v3738_v17 = vmax.f32 %v3642_v57, 1e-07  ;;  %v3431_v6 = vmul.f32 %v3349_v9, %v3349_v9  ;;  %v3355_v18 = vpop.f32.mrb[33].mxu1 }
 0x2eb   :  { %v9857_v58 = vmul.f32 %v2805_v53, %v2805_v53  ;;  %v5633_v56 = vpop.eup %5632  ;;  %v9861_v50 = vmul.f32 %v9530_v24, %v9530_v24  ;;  %5648 = vlog2.f32 %v3737_v51  ;;  %v3740_v14 = vmax.f32 %v3644_v49, 1e-07 }
 0x2ec   :  { %10245 = vst [vmem:[#allocation6_spill] sm:$0xff] %v9855_v55  ;;  %v3650_v43 = vadd.f32 %v3429_v5, %v9711_v20  ;;  %v2811_v34 = vpop.f32.mrb[34].mxu0  ;;  %v5635_v11 = vpop.eup %5634  ;;  %5650 = vlog2.f32 %v3741_v2  ;;  %v3745_v59 = vmax.f32 %v3649_v29, 1e-07  ;;  %v3652_v23 = vadd.f32 %v3431_v6, %v9715_v21 }
 0x2ed   :  { %10246 = vst [vmem:[#allocation7_spill] sm:$0xff] %v9861_v50  ;;  %v3561_v13 = vsel %vm3505_vm0, %v9857_v58, 0.0  ;;  %v3359_v10 = vpop.f32.mrb[34].mxu1  ;;  %v2813_v0 = vpop.f32.mrb[35].mxu0  ;;  %v9870_v24 = vmul.f32 %v9532_v26, %v9532_v26  ;;  %v9874_v20 = vmul.f32 %v9537_v30, %v9537_v30  ;;  %5652 = vlog2.f32 %v3739_v31 }
 0x2ee   :  { %v5637_v9 = vpop.eup %5636  ;;  %v3657_v57 = vadd.f32 %v3561_v13, %v9719_v25  ;;  %v3361_v49 = vpop.f32.mrb[35].mxu1  ;;  %v9877_v21 = vmul.f32 0.6931472, %v5629_v63  ;;  %5654 = vlog2.f32 %v3738_v17  ;;  %v3749_v47 = vmax.f32 %v9829_v48, 1e-07 }
 0x2ef   :  { %10247 = vst [vmem:[#allocation8_spill] sm:$0xff] %v9870_v24  ;;  %10248 = vst [vmem:[#allocation9_spill] sm:$0xff] %v9874_v20  ;;  %v9881_v51 = vadd.s32 512, %v9703_v7  ;;  %v5639_v29 = vpop.eup %5638  ;;  %v9883_v53 = vmul.f32 0.6931472, %v5631_v36  ;;  %5656 = vlog2.f32 %v3740_v14  ;;  %v3438_v30 = vmul.f32 %v3353_v42, %v3353_v42 }
 0x2f0   :  { %v9885_v26 = vmul.f32 0.6931472, %v5633_v56  ;;  %v2817_v2 = vpop.f32.mrb[36].mxu0  ;;  %v5641_v31 = vpop.eup %5640  ;;  %5658 = vlog2.f32 %v3745_v59  ;;  %v3747_v25 = vmax.f32 %v9851_v15, 1e-07  ;;  %v3437_v63 = vmul.f32 %v2807_v3, %v2807_v3 }
 0x2f1   :  { %v3439_v5 = vmul.f32 %v3355_v18, %v3355_v18  ;;  %v3365_v17 = vpop.f32.mrb[36].mxu1  ;;  %v9888_v6 = vpop.f32.mrb[37].mxu0  ;;  %v9890_v13 = vmul.f32 0.6931472, %v5635_v11  ;;  %v3746_v20 = vmax.f32 %v3650_v43, 1e-07  ;;  %v3659_v36 = vadd.f32 %v3438_v30, %v9723_v32 }
 0x2f2   :  { %v5643_v48 = vpop.eup %5642  ;;  %v9893_v56 = vmul.f32 %v2811_v34, %v2811_v34  ;;  %v9895_v14 = vpop.f32.mrb[37].mxu1  ;;  %v9897_v24 = vmul.f32 0.6931472, %v5637_v9  ;;  %v3748_v59 = vmax.f32 %v3652_v23, 1e-07  ;;  %v3658_v15 = vadd.f32 %v3437_v63, %v9727_v38 }
 0x2f3   :  { %v5645_v42 = vpop.eup %5644  ;;  %v3660_v3 = vadd.f32 %v3439_v5, %v9731_v39  ;;  %v9901_v50 = vmul.f32 0.6931472, %v5639_v29  ;;  %5660 = vlog2.f32 %v3749_v47  ;;  %v3753_v11 = vmax.f32 %v3657_v57, 1e-07 }
 0x2f4   :  { %v5647_v18 = vpop.eup %5646  ;;  %v3569_v32 = vsel %vm3505_vm0, %v9893_v56, 0.0  ;;  %v9906_v43 = vpop.f32.mrb[38].mxu0  ;;  %v9908_v34 = vmul.f32 0.6931472, %v5641_v31  ;;  %5662 = vlog2.f32 %v3747_v25  ;;  %v3757_v23 = vmax.f32 %v9857_v58, 1e-07 }
 0x2f5   :  { %v3665_v38 = vadd.f32 %v3569_v32, %v9735_v44  ;;  %v5649_v9 = vpop.eup %5648  ;;  %v9912_v39 = vmul.f32 0.6931472, %v5643_v48  ;;  %v9914_v29 = vmul.f32 0.6931472, %v5645_v42  ;;  %5664 = vlog2.f32 %v3746_v20  ;;  %v3371_v47 = vpop.f32.mrb[38].mxu1 }
 0x2f6   :  { %v3446_v57 = vmul.f32 %v3359_v10, %v3359_v10  ;;  %v9916_v30 = vpop.f32.mrb[39].mxu0  ;;  %v5651_v63 = vpop.eup %5650  ;;  %v9918_v5 = vmul.f32 0.6931472, %v5647_v18  ;;  %5666 = vlog2.f32 %v3748_v59  ;;  %v3755_v31 = vmax.f32 %v3659_v36, 1e-07 }
 0x2f7   :  { %v3445_v25 = vmul.f32 %v2813_v0, %v2813_v0  ;;  %v9920_v55 = vpop.f32.mrb[39].mxu1  ;;  %v5653_v58 = vpop.eup %5652  ;;  %5668 = vlog2.f32 %v3753_v11  ;;  %v3754_v44 = vmax.f32 %v3658_v15, 1e-07  ;;  %v3447_v42 = vmul.f32 %v3361_v49, %v3361_v49 }
 0x2f8   :  { %v3667_v48 = vadd.f32 %v3446_v57, %v9739_v54  ;;  %v9923_v32 = vpop.f32.mrb[40].mxu0  ;;  %v5655_v10 = vpop.eup %5654  ;;  %v9925_v20 = vmul.f32 0.6931472, %v5649_v9  ;;  %v3756_v60 = vmax.f32 %v3660_v3, 1e-07  ;;  %v3452_v59 = vmul.f32 %v2817_v2, %v2817_v2 }
 0x2f9   :  { %v9928_v18 = vadd.f32 %v3445_v25, %v9743_v61  ;;  %v9930_v36 = vpop.f32.mrb[40].mxu1  ;;  %v9932_v0 = vpop.f32.mrb[41].mxu0  ;;  %v9934_v11 = vmul.f32 0.6931472, %v5651_v63  ;;  %5670 = vlog2.f32 %v3757_v23  ;;  %v3761_v54 = vmax.f32 %v3665_v38, 1e-07 }
 0x2fa   :  { %v5657_v8 = vpop.eup %5656  ;;  %v9937_v49 = vadd.f32 %v3447_v42, %v9747_v62  ;;  %v9939_v15 = vpop.f32.mrb[41].mxu1  ;;  %v9941_v3 = vmul.f32 0.6931472, %v5653_v58  ;;  %5672 = vlog2.f32 %v3755_v31  ;;  %v3577_v61 = vsel %vm3505_vm0, %v3452_v59, 0.0 }
 0x2fb   :  { %v5659_v9 = vpop.eup %5658  ;;  %v3454_v2 = vmul.f32 %v3365_v17, %v3365_v17  ;;  %v9945_v57 = vmul.f32 0.6931472, %v5655_v10  ;;  %5674 = vlog2.f32 %v3754_v44  ;;  %v3765_v63 = vmax.f32 %v9893_v56, 1e-07 }
 0x2fc   :  { %v3673_v23 = vadd.f32 %v3577_v61, %v9751_v4  ;;  %v9949_v38 = vpop.f32.mrb[42].mxu0  ;;  %v9951_v62 = vmul.f32 0.6931472, %v5657_v8  ;;  %5676 = vlog2.f32 %v3756_v60  ;;  %v3773_v25 = vmax.f32 %v3452_v59, 1e-07 }
 0x2fd   :  { %v3675_v58 = vadd.f32 %v3454_v2, %v9755_v12  ;;  %v9954_v31 = vpop.f32.mrb[42].mxu1  ;;  %v9956_v42 = vpop.f32.mrb[43].mxu0  ;;  %v9958_v10 = vmul.f32 0.6931472, %v5659_v9  ;;  %5678 = vlog2.f32 %v3761_v54  ;;  %v3453_v4 = vmul.f32 %v9888_v6, %v9888_v6 }
 0x2fe   :  { %v5661_v17 = vpop.eup %5660  ;;  %v3769_v44 = vmax.f32 %v3673_v23, 1e-07  ;;  %v9962_v56 = vpop.f32.mrb[43].mxu1  ;;  %v3763_v61 = vmax.f32 %v3667_v48, 1e-07  ;;  %5680 = vlog2.f32 %v3773_v25  ;;  %v3455_v12 = vmul.f32 %v9895_v14, %v9895_v14 }
 0x2ff   :  { %10249 = vst [vmem:[#allocation10_spill] sm:$0xff] %v9958_v10  ;;  %v5663_v8 = vpop.eup %5662  ;;  %v3771_v60 = vmax.f32 %v3675_v58, 1e-07  ;;  %v3674_v2 = vadd.f32 %v3453_v4, %v9759_v19  ;;  %v3460_v54 = vmul.f32 %v9906_v43, %v9906_v43  ;;  %v3462_v9 = vmul.f32 %v3371_v47, %v3371_v47 }
 0x300   :  { %v5665_v59 = vpop.eup %5664  ;;  %5682 = vlog2.f32 %v3769_v44  ;;  %v9969_v23 = vpop.f32.mrb[44].mxu0  ;;  %v9971_v10 = vmul.f32 0.6931472, %v5661_v17  ;;  %v3676_v48 = vadd.f32 %v3455_v12, %v9763_v22  ;;  %v3461_v25 = vmul.f32 %v9916_v30, %v9916_v30 }
 0x301   :  { %v5667_v6 = vpop.eup %5666  ;;  %5684 = vlog2.f32 %v3771_v60  ;;  %v9976_v14 = vpop.f32.mrb[44].mxu1  ;;  %v3770_v43 = vmax.f32 %v3674_v2, 1e-07  ;;  %v3585_v47 = vsel %vm3505_vm0, %v3460_v54, 0.0  ;;  %v3683_v17 = vadd.f32 %v3462_v9, %v9772_v35 }
 0x302   :  { %10250 = vst [vmem:[#allocation11_spill] sm:$0xff] %v9971_v10  ;;  %v9978_v58 = vpop.f32.mrb[45].mxu0  ;;  %v9980_v19 = vpop.eup %5668  ;;  %5686 = vlog2.f32 %v3765_v63  ;;  %v3772_v22 = vmax.f32 %v3676_v48, 1e-07  ;;  %v3681_v4 = vadd.f32 %v3585_v47, %v9768_v27  ;;  %v3781_v30 = vmax.f32 %v3460_v54, 1e-07 }
 0x303   :  { %10251 = vst [vmem:[#allocation12_spill] sm:$0xff] %v9980_v19  ;;  %v9985_v44 = vpop.f32.mrb[45].mxu1  ;;  %5688 = vlog2.f32 %v3763_v61  ;;  %v9988_v60 = vpop.eup %5670  ;;  %v9990_v12 = vmul.f32 0.6931472, %v5663_v8  ;;  %v3779_v19 = vmax.f32 %v3683_v17, 1e-07  ;;  %v3682_v63 = vadd.f32 %v3461_v25, %v9776_v45 }
 0x304   :  { %5690 = vlog2.f32 %v3770_v43  ;;  %v9993_v2 = vpop.f32.mrb[46].mxu0  ;;  %v9995_v10 = vpop.eup %5672  ;;  %vm4109_vm1 = vcmp.lt.s32.totalorder %v9881_v51, 513  ;;  %v3777_v61 = vmax.f32 %v3681_v4, 1e-07  ;;  %v3463_v27 = vmul.f32 %v9920_v55, %v9920_v55 }
 0x305   :  { %5692 = vlog2.f32 %v3772_v22  ;;  %v10001_v54 = vpop.f32.mrb[46].mxu1  ;;  %v10003_v8 = vpop.f32.mrb[47].mxu0  ;;  %v3778_v45 = vmax.f32 %v3682_v63, 1e-07  ;;  %v3468_v48 = vmul.f32 %v9923_v32, %v9923_v32  ;;  %v3470_v25 = vmul.f32 %v9930_v36, %v9930_v36 }
 0x306   :  { %v10005_v9 = vpop.eup %5674  ;;  %5694 = vlog2.f32 %v3781_v30  ;;  %v10011_v43 = vpop.f32.mrb[47].mxu1  ;;  %v10015_v17 = vmul.f32 0.6931472, %v5665_v59  ;;  %v3684_v55 = vadd.f32 %v3463_v27, %v9780_v52  ;;  %v3469_v22 = vmul.f32 %v9932_v0, %v9932_v0  ;;  %v10255_v0 = vld [vmem:[#allocation2_spill] sm:$0xff] }
 0x307   :  { %v10013_v47 = vpop.eup %5676  ;;  %5696 = vlog2.f32 %v3777_v61  ;;  %v3593_v32 = vsel %vm3505_vm0, %v3468_v48, 0.0  ;;  %v3789_v36 = vmax.f32 %v3468_v48, 1e-07  ;;  %v10025_v35 = vmul.f32 0.6931472, %v5667_v6 }
 0x308   :  { %10252 = vst [vmem:[#allocation13_spill] sm:$0xff] %v10013_v47  ;;  %10253 = vst [vmem:[#allocation14_spill] sm:$0xff] %v10015_v17  ;;  %v10020_v4 = vpop.eup %5678  ;;  %5698 = vlog2.f32 %v3779_v19  ;;  %v3780_v59 = vmax.f32 %v3684_v55, 1e-07  ;;  %v3689_v61 = vadd.f32 %v3593_v32, %v9784_v33  ;;  %v3691_v47 = vadd.f32 %v3470_v25, %v10255_v0 }
 0x309   :  { %10254 = vst [vmem:[#allocation15_spill] sm:$0xff] %v10020_v4  ;;  %v5681_v63 = vpop.eup %5680  ;;  %5700 = vlog2.f32 %v3778_v45  ;;  %v3690_v4 = vadd.f32 %v3469_v22, %v9794_v16  ;;  %v3471_v48 = vmul.f32 %v9939_v15, %v9939_v15  ;;  %v10041_v22 = vmul.f32 %v9949_v38, %v9949_v38 }
 0x30a   :  { %v5683_v52 = vpop.eup %5682  ;;  %v3922_v27 = vmul.f32 0.6931472, %v5681_v63  ;;  %5702 = vlog2.f32 %v3789_v36  ;;  %v3785_v17 = vmax.f32 %v3689_v61, 1e-07  ;;  %v3787_v33 = vmax.f32 %v3691_v47, 1e-07 }
 0x30b   :  { %v5685_v30 = vpop.eup %5684  ;;  %v3914_v19 = vmul.f32 0.6931472, %v5683_v52  ;;  %5704 = vlog2.f32 %v3780_v59  ;;  %v3786_v32 = vmax.f32 %v3690_v4, 1e-07  ;;  %v3692_v16 = vadd.f32 %v3471_v48, %v9798_v28 }
 0x30c   :  { %v10032_v6 = vpop.eup %5686  ;;  %v4013_v45 = vsub.f32 %v3922_v27, %v9877_v21  ;;  %v3918_v55 = vmul.f32 0.6931472, %v5685_v30  ;;  %5706 = vlog2.f32 %v3785_v17  ;;  %v10046_v21 = vmul.f32 %v9954_v31, %v9954_v31 }
 0x30d   :  { %v10035_v63 = vpop.eup %5688  ;;  %v4009_v25 = vsub.f32 %v3914_v19, %v9883_v53  ;;  %5708 = vlog2.f32 %v3787_v33  ;;  %v3788_v53 = vmax.f32 %v3692_v16, 1e-07  ;;  %v3493_v7 = vmul.f32 %v10003_v8, %v10003_v8 }
 0x30e   :  { %v5691_v36 = vpop.eup %5690  ;;  %v4061_v15 = vand.u32 2147483647, %v4013_v45  ;;  %v4011_v59 = vsub.f32 %v3918_v55, %v9885_v26  ;;  %5710 = vlog2.f32 %v3786_v32  ;;  %v3601_v26 = vsel %vm3505_vm0, %v10041_v22, 0.0 }
 0x30f   :  { %v5693_v47 = vpop.eup %5692  ;;  %v4057_v4 = vand.u32 2147483647, %v4009_v25  ;;  %v3916_v30 = vmul.f32 0.6931472, %v5691_v36  ;;  %5712 = vlog2.f32 %v3788_v53 }
 0x310   :  { %v5695_v17 = vpop.eup %5694  ;;  %v4165_v28 = vsel %vm4109_vm1, %v4061_v15, 0.0  ;;  %v4059_v38 = vand.u32 2147483647, %v4011_v59  ;;  %v3920_v61 = vmul.f32 0.6931472, %v5693_v47 }
 0x311   :  { %v5697_v52 = vpop.eup %5696  ;;  %v4010_v27 = vsub.f32 %v3916_v30, %v9890_v13  ;;  %v3938_v31 = vmul.f32 0.6931472, %v5695_v17  ;;  %4257 = vst [vmem:[%s10240_s2] sm:$0xff] %v4057_v4  ;;  %4261 = vst [vmem:[%s10240_s2 + $0x20] sm:$0xff] %v4165_v28  ;;  %v10256_v13 = vld [vmem:[#allocation3_spill] sm:$0xff]  ;;  %v3797_v59 = vmax.f32 %v10041_v22, 1e-07 }
 0x312   :  { %v5699_v0 = vpop.eup %5698  ;;  %v4012_v19 = vsub.f32 %v3920_v61, %v9897_v24  ;;  %v3930_v48 = vmul.f32 0.6931472, %v5697_v52  ;;  %v3697_v25 = vadd.f32 %v3601_v26, %v10256_v13  ;;  %4259 = vst [vmem:[%s10240_s2 + $0x10] sm:$0xff] %v4059_v38  ;;  %v3699_v13 = vadd.f32 %v10046_v21, %v9806_v37 }
 0x313   :  { %v5701_v45 = vpop.eup %5700  ;;  %v4058_v55 = vand.u32 2147483647, %v4010_v27  ;;  %v4021_v33 = vsub.f32 %v3938_v31, %v9908_v34  ;;  %v3934_v32 = vmul.f32 0.6931472, %v5699_v0  ;;  %v3484_v37 = vmul.f32 %v9969_v23, %v9969_v23 }
 0x314   :  { %v5703_v16 = vpop.eup %5702  ;;  %v4060_v24 = vand.u32 2147483647, %v4012_v19  ;;  %v4017_v36 = vsub.f32 %v3930_v48, %v9901_v50  ;;  %v3932_v15 = vmul.f32 0.6931472, %v5701_v45  ;;  %v3793_v26 = vmax.f32 %v3697_v25, 1e-07 }
 0x315   :  { %v5705_v47 = vpop.eup %5704  ;;  %v4069_v4 = vand.u32 2147483647, %v4021_v33  ;;  %v4019_v30 = vsub.f32 %v3934_v32, %v9912_v39  ;;  %v3954_v53 = vmul.f32 0.6931472, %v5703_v16  ;;  %4258 = vst [vmem:[%s10240_s2 + $0x8] sm:$0xff] %v4058_v55 }
 0x316   :  { %v4065_v34 = vand.u32 2147483647, %v4017_v36  ;;  %v4018_v17 = vsub.f32 %v3932_v15, %v9914_v29  ;;  %v3936_v28 = vmul.f32 0.6931472, %v5705_v47  ;;  %v5707_v61 = vpop.eup %5706  ;;  %4260 = vst [vmem:[%s10240_s2 + $0x18] sm:$0xff] %v4060_v24  ;;  %5714 = vlog2.f32 %v3793_v26 }
 0x317   :  { %v4173_v50 = vsel %vm4109_vm1, %v4069_v4, 0.0  ;;  %v4067_v38 = vand.u32 2147483647, %v4019_v30  ;;  %v4029_v22 = vsub.f32 %v3954_v53, %v9934_v11  ;;  %v5709_v52 = vpop.eup %5708  ;;  %v3946_v31 = vmul.f32 0.6931472, %v5707_v61 }
 0x318   :  { %v4066_v39 = vand.u32 2147483647, %v4018_v17  ;;  %v4020_v29 = vsub.f32 %v3936_v28, %v9918_v5  ;;  %v5711_v27 = vpop.eup %5710  ;;  %v3950_v19 = vmul.f32 0.6931472, %v5709_v52  ;;  %4265 = vst [vmem:[%s10240_s2 + $0x40] sm:$0xff] %v4065_v34  ;;  %4269 = vst [vmem:[%s10240_s2 + $0x60] sm:$0xff] %v4173_v50  ;;  %5716 = vlog2.f32 %v3797_v59 }
 0x319   :  { %v4077_v0 = vand.u32 2147483647, %v4029_v22  ;;  %v3948_v48 = vmul.f32 0.6931472, %v5711_v27  ;;  %4267 = vst [vmem:[%s10240_s2 + $0x50] sm:$0xff] %v4067_v38  ;;  %v4025_v5 = vsub.f32 %v3946_v31, %v9925_v20  ;;  %v5713_v33 = vpop.eup %5712  ;;  %v3477_v20 = vmul.f32 %v9956_v42, %v9956_v42  ;;  %v10257_v28 = vld [vmem:[#allocation4_spill] sm:$0xff] }
 0x31a   :  { %v4068_v11 = vand.u32 2147483647, %v4020_v29  ;;  %v4027_v55 = vsub.f32 %v3950_v19, %v9941_v3  ;;  %4266 = vst [vmem:[%s10240_s2 + $0x48] sm:$0xff] %v4066_v39  ;;  %v3952_v24 = vmul.f32 0.6931472, %v5713_v33  ;;  %v3609_v59 = vsel %vm3505_vm0, %v3484_v37, 0.0 }
 0x31b   :  { %v4181_v45 = vsel %vm4109_vm1, %v4077_v0, 0.0  ;;  %v4026_v32 = vsub.f32 %v3948_v48, %v9945_v57  ;;  %v4073_v25 = vand.u32 2147483647, %v4025_v5  ;;  %v3795_v36 = vmax.f32 %v3699_v13, 1e-07  ;;  %v10258_v50 = vld [vmem:[#allocation5_spill] sm:$0xff] }
 0x31c   :  { %v4075_v16 = vand.u32 2147483647, %v4027_v55  ;;  %4268 = vst [vmem:[%s10240_s2 + $0x58] sm:$0xff] %v4068_v11  ;;  %4277 = vst [vmem:[%s10240_s2 + $0xa0] sm:$0xff] %v4181_v45  ;;  %v3479_v57 = vmul.f32 %v9962_v56, %v9962_v56  ;;  %v4028_v21 = vsub.f32 %v3952_v24, %v9951_v62  ;;  %v3698_v42 = vadd.f32 %v3477_v20, %v9814_v1  ;;  %v10260_v27 = vld [vmem:[#allocation6_spill] sm:$0xff]  ;;  %v10261_v0 = vld [vmem:[#allocation11_spill] sm:$0xff] }
 0x31d   :  { %v4074_v3 = vand.u32 2147483647, %v4026_v32  ;;  %5718 = vlog2.f32 %v3795_v36  ;;  %4273 = vst [vmem:[%s10240_s2 + $0x80] sm:$0xff] %v4073_v25  ;;  %v3705_v62 = vadd.f32 %v3609_v59, %v9824_v40  ;;  %v3805_v47 = vmax.f32 %v3484_v37, 1e-07  ;;  %v10262_v32 = vld [vmem:[#allocation7_spill] sm:$0xff] }
 0x31e   :  { %v3700_v15 = vadd.f32 %v3479_v57, %v9819_v46  ;;  %4275 = vst [vmem:[%s10240_s2 + $0x90] sm:$0xff] %v4075_v16  ;;  %v4076_v56 = vand.u32 2147483647, %v4028_v21  ;;  %v3794_v23 = vmax.f32 %v3698_v42, 1e-07  ;;  %v3486_v46 = vmul.f32 %v9976_v14, %v9976_v14  ;;  %v10263_v25 = vld [vmem:[#allocation8_spill] sm:$0xff] }
 0x31f   :  { %4274 = vst [vmem:[%s10240_s2 + $0x88] sm:$0xff] %v4074_v3  ;;  %v3485_v4 = vmul.f32 %v9978_v58, %v9978_v58  ;;  %v3487_v30 = vmul.f32 %v9985_v44, %v9985_v44  ;;  %v3801_v53 = vmax.f32 %v3705_v62, 1e-07  ;;  %v3492_v40 = vmul.f32 %v9993_v2, %v9993_v2  ;;  %v10264_v20 = vld [vmem:[#allocation9_spill] sm:$0xff]  ;;  %v10267_v59 = vld [vmem:[#allocation12_spill] sm:$0xff] }
 0x320   :  { %v3796_v1 = vmax.f32 %v3700_v15, 1e-07  ;;  %5720 = vlog2.f32 %v3794_v23  ;;  %v5715_v34 = vpop.eup %5714  ;;  %v3707_v17 = vadd.f32 %v3486_v46, %v9839_v41  ;;  %4276 = vst [vmem:[%s10240_s2 + $0x98] sm:$0xff] %v4076_v56  ;;  %v10259_v41 = vld [vmem:[#allocation10_spill] sm:$0xff]  ;;  %v3494_v11 = vmul.f32 %v10001_v54, %v10001_v54 }
 0x321   :  { %v3706_v61 = vadd.f32 %v3485_v4, %v10257_v28  ;;  %v3708_v38 = vadd.f32 %v3487_v30, %v10258_v50  ;;  %v3962_v58 = vmul.f32 0.6931472, %v5715_v34  ;;  %v3617_v44 = vsel %vm3505_vm0, %v3492_v40, 0.0  ;;  %v10268_v4 = vld [vmem:[#allocation14_spill] sm:$0xff] }
 0x322   :  { %5722 = vlog2.f32 %v3796_v1  ;;  %v5717_v14 = vpop.eup %5716  ;;  %v3813_v22 = vmax.f32 %v3492_v40, 1e-07  ;;  %v3803_v26 = vmax.f32 %v3707_v17, 1e-07  ;;  %v3713_v31 = vadd.f32 %v3617_v44, %v10260_v27  ;;  %v10269_v40 = vld [vmem:[#allocation13_spill] sm:$0xff] }
 0x323   :  { %5724 = vlog2.f32 %v3801_v53  ;;  %v3970_v2 = vmul.f32 0.6931472, %v5717_v14  ;;  %v3802_v52 = vmax.f32 %v3706_v61, 1e-07  ;;  %v4033_v39 = vsub.f32 %v3962_v58, %v10259_v41 }
 0x324   :  { %5726 = vlog2.f32 %v3805_v47  ;;  %v3804_v29 = vmax.f32 %v3708_v38, 1e-07  ;;  %v3809_v5 = vmax.f32 %v3713_v31, 1e-07  ;;  %v3495_v45 = vmul.f32 %v10011_v43, %v10011_v43 }
 0x325   :  { %5728 = vlog2.f32 %v3813_v22  ;;  %v4037_v19 = vsub.f32 %v3970_v2, %v10261_v0  ;;  %v4081_v48 = vand.u32 2147483647, %v4033_v39  ;;  %v3715_v13 = vadd.f32 %v3494_v11, %v10262_v32  ;;  %v10270_v22 = vld [vmem:[#allocation15_spill] sm:$0xff] }
 0x326   :  { %5730 = vlog2.f32 %v3803_v26  ;;  %v3714_v16 = vadd.f32 %v3493_v7, %v10263_v25  ;;  %v3716_v54 = vadd.f32 %v3495_v45, %v10264_v20  ;;  %v10265_v3 = vmax.f32 %v9928_v18, 1e-07 }
 0x327   :  { %5732 = vlog2.f32 %v3802_v52  ;;  %v5719_v55 = vpop.eup %5718  ;;  %v4085_v33 = vand.u32 2147483647, %v4037_v19  ;;  %v3811_v36 = vmax.f32 %v3715_v13, 1e-07  ;;  %v10266_v37 = vmax.f32 %v9937_v49, 1e-07 }
 0x328   :  { %5734 = vlog2.f32 %v3804_v29  ;;  %v3966_v24 = vmul.f32 0.6931472, %v5719_v55  ;;  %v3810_v57 = vmax.f32 %v3714_v16, 1e-07  ;;  %4281 = vst [vmem:[%s10240_s2 + $0xc0] sm:$0xff] %v4081_v48 }
 0x329   :  { %5736 = vlog2.f32 %v3809_v5  ;;  %v4189_v8 = vsel %vm4109_vm1, %v4085_v33, 0.0  ;;  %v3812_v42 = vmax.f32 %v3716_v54, 1e-07  ;;  %v3882_v18 = vmul.f32 0.6931472, %v10267_v59 }
 0x32a   :  { %5738 = vlog2.f32 %v10265_v3  ;;  %v5721_v43 = vpop.eup %5720  ;;  %v4035_v21 = vsub.f32 %v3966_v24, %v9990_v12  ;;  %v3890_v56 = vmul.f32 0.6931472, %v9988_v60  ;;  %v3886_v47 = vmul.f32 0.6931472, %v9995_v10  ;;  %4285 = vst [vmem:[%s10240_s2 + $0xe0] sm:$0xff] %v4189_v8  ;;  %v10176_v10 = vld [vmem:[%s10240_s2 + $0x28] sm:$0xff] }
 0x32b   :  { %5740 = vlog2.f32 %v10266_v37  ;;  %v3964_v23 = vmul.f32 0.6931472, %v5721_v43  ;;  %v3884_v12 = vmul.f32 0.6931472, %v10005_v9  ;;  %v3888_v34 = vmul.f32 0.6931472, %v10269_v40 }
 0x32c   :  { %v5723_v15 = vpop.eup %5722  ;;  %5742 = vlog2.f32 %v3811_v36  ;;  %v4083_v49 = vand.u32 2147483647, %v4035_v21  ;;  %v3906_v9 = vmul.f32 0.6931472, %v10032_v6  ;;  %v3898_v2 = vmul.f32 0.6931472, %v10270_v22 }
 0x32d   :  { %v5725_v62 = vpop.eup %5724  ;;  %v3968_v1 = vmul.f32 0.6931472, %v5723_v15  ;;  %5744 = vlog2.f32 %v3810_v57  ;;  %v4034_v30 = vsub.f32 %v3964_v23, %v10268_v4  ;;  %v3902_v13 = vmul.f32 0.6931472, %v10035_v63 }
 0x32e   :  { %v5727_v46 = vpop.eup %5726  ;;  %v3978_v53 = vmul.f32 0.6931472, %v5725_v62  ;;  %5746 = vlog2.f32 %v3812_v42  ;;  %v4235_v17 = vadd.f32 %v10176_v10, %v4083_v49 }
 0x32f   :  { %v5729_v60 = vpop.eup %5728  ;;  %v4036_v28 = vsub.f32 %v3968_v1, %v10025_v35  ;;  %v3986_v61 = vmul.f32 0.6931472, %v5727_v46  ;;  %v4082_v38 = vand.u32 2147483647, %v4034_v30 }
 0x330   :  { %v5731_v50 = vpop.eup %5730  ;;  %v4041_v14 = vsub.f32 %v3978_v53, %v3882_v18  ;;  %v4002_v58 = vmul.f32 0.6931472, %v5729_v60  ;;  %4283 = vst [vmem:[%s10240_s2 + $0xd0] sm:$0xff] %v4235_v17 }
 0x331   :  { %v5733_v44 = vpop.eup %5732  ;;  %v4084_v26 = vand.u32 2147483647, %v4036_v28  ;;  %v4045_v52 = vsub.f32 %v3986_v61, %v3890_v56  ;;  %v3982_v41 = vmul.f32 0.6931472, %v5731_v50  ;;  %v4234_v35 = vadd.f32 %v10176_v10, %v4082_v38 }
 0x332   :  { %v5735_v39 = vpop.eup %5734  ;;  %v4089_v29 = vand.u32 2147483647, %v4041_v14  ;;  %v3980_v27 = vmul.f32 0.6931472, %v5733_v44  ;;  %v4053_v31 = vsub.f32 %v4002_v58, %v3906_v9 }
 0x333   :  { %v5737_v6 = vpop.eup %5736  ;;  %v4236_v0 = vadd.f32 %v10176_v10, %v4084_v26  ;;  %v4093_v19 = vand.u32 2147483647, %v4045_v52  ;;  %v4043_v11 = vsub.f32 %v3982_v41, %v3886_v47  ;;  %v3984_v7 = vmul.f32 0.6931472, %v5735_v39  ;;  %4282 = vst [vmem:[%s10240_s2 + $0xc8] sm:$0xff] %v4234_v35 }
 0x334   :  { %v5739_v48 = vpop.eup %5738  ;;  %v4241_v5 = vadd.f32 %v10176_v10, %v4089_v29  ;;  %v4042_v45 = vsub.f32 %v3980_v27, %v3884_v12  ;;  %v3994_v55 = vmul.f32 0.6931472, %v5737_v6  ;;  %v4101_v33 = vand.u32 2147483647, %v4053_v31 }
 0x335   :  { %v5741_v32 = vpop.eup %5740  ;;  %4284 = vst [vmem:[%s10240_s2 + $0xd8] sm:$0xff] %v4236_v0  ;;  %v4197_v25 = vsel %vm4109_vm1, %v4093_v19, 0.0  ;;  %v4091_v16 = vand.u32 2147483647, %v4043_v11  ;;  %v4044_v24 = vsub.f32 %v3984_v7, %v3888_v34  ;;  %v3900_v15 = vmul.f32 0.6931472, %v5739_v48 }
 0x336   :  { %v5743_v20 = vpop.eup %5742  ;;  %v4245_v54 = vadd.f32 %v10176_v10, %v4197_v25  ;;  %4289 = vst [vmem:[%s10240_s2 + $0x100] sm:$0xff] %v4241_v5  ;;  %v4090_v3 = vand.u32 2147483647, %v4042_v45  ;;  %v4049_v8 = vsub.f32 %v3994_v55, %v3898_v2  ;;  %v4205_v63 = vsel %vm4109_vm1, %v4101_v33, 0.0 }
 0x337   :  { %v5745_v36 = vpop.eup %5744  ;;  %v4243_v57 = vadd.f32 %v10176_v10, %v4091_v16  ;;  %v4092_v43 = vand.u32 2147483647, %v4044_v24  ;;  %v4253_v37 = vadd.f32 %v10176_v10, %v4205_v63  ;;  %v3998_v21 = vmul.f32 0.6931472, %v5743_v20 }
 0x338   :  { %v5747_v42 = vpop.eup %5746  ;;  %4293 = vst [vmem:[%s10240_s2 + $0x120] sm:$0xff] %v4245_v54  ;;  %v4242_v59 = vadd.f32 %v10176_v10, %v4090_v3  ;;  %v4097_v18 = vand.u32 2147483647, %v4049_v8  ;;  %v3996_v56 = vmul.f32 0.6931472, %v5745_v36 }
 0x339   :  { %v3904_v23 = vmul.f32 0.6931472, %v5741_v32  ;;  %4291 = vst [vmem:[%s10240_s2 + $0x110] sm:$0xff] %v4243_v57  ;;  %v4244_v51 = vadd.f32 %v10176_v10, %v4092_v43  ;;  %4301 = vst [vmem:[%s10240_s2 + $0x160] sm:$0xff] %v4253_v37  ;;  %v4051_v62 = vsub.f32 %v3998_v21, %v3902_v13  ;;  %v4000_v47 = vmul.f32 0.6931472, %v5747_v42 }
 0x33a   :  { %4290 = vst [vmem:[%s10240_s2 + $0x108] sm:$0xff] %v4242_v59  ;;  %v4249_v49 = vadd.f32 %v10176_v10, %v4097_v18  ;;  %v4050_v1 = vsub.f32 %v3996_v56, %v3900_v15 }
 0x33b   :  { %4292 = vst [vmem:[%s10240_s2 + $0x118] sm:$0xff] %v4244_v51  ;;  %v4099_v46 = vand.u32 2147483647, %v4051_v62  ;;  %v4052_v12 = vsub.f32 %v4000_v47, %v3904_v23 }
 0x33c   :  { %4297 = vst [vmem:[%s10240_s2 + $0x140] sm:$0xff] %v4249_v49  ;;  %v4098_v4 = vand.u32 2147483647, %v4050_v1 }
 0x33d   :  { %v4251_v30 = vadd.f32 %v10176_v10, %v4099_v46  ;;  %v4100_v53 = vand.u32 2147483647, %v4052_v12 }
 0x33e   :  { %v4250_v60 = vadd.f32 %v10176_v10, %v4098_v4 }
 0x33f   :  { %4299 = vst [vmem:[%s10240_s2 + $0x150] sm:$0xff] %v4251_v30  ;;  %v4252_v40 = vadd.f32 %v10176_v10, %v4100_v53 }
 0x340   :  { %4298 = vst [vmem:[%s10240_s2 + $0x148] sm:$0xff] %v4250_v60 }
 0x341   :  { %4300 = vst [vmem:[%s10240_s2 + $0x158] sm:$0xff] %v4252_v40 }

</bundles_post_ra>
